<compile_context>
chip_gen: v7x
topology: tpu7x:2x2x1
jax: 0.10.0
libtpu: 0.0.40
codegen_flags: <defaults>
</compile_context>

<pallas_src>
import functools

import jax
import jax.numpy as jnp
from jax.experimental import pallas as pl
from jax.experimental.pallas import tpu as pltpu  # noqa: F401  (kept for TPU-specific tuning hooks)

# ---- Fourier ILT constants (torchlaplace Fourier defaults: alpha=1e-3, eps=1e-6, scale=2.0) ----
ILT_ALPHA = 1e-3
ILT_EPS = 1e-6
ILT_TOL = 10.0 * ILT_EPS  # TODO(synk): verify torchlaplace's exact default convention when tol=None
ILT_SCALE = 2.0


# ----------------------------------------------------------------------------------------------
# Kernel 1: ReverseGRUEncoder (2-layer GRU over the reversed action sequence + linear head)
# ----------------------------------------------------------------------------------------------
def _gru_encoder_kernel(x_ref,                       # (T_a*B, A) time-major flat, ORIGINAL order
                        wih0_ref, whh0_ref, gb0_ref, bhh0n_ref,
                        wih1_ref, whh1_ref, gb1_ref, bhh1n_ref,
                        wout_ref, bout_ref,
                        o_ref,                       # (B, latent)
                        *, hidden, n_steps, batch):
    H = hidden
    B = batch

    # Hoisted layer-0 input projection across ALL timesteps (M = T_a*B instead of B per step).
    # gb0 already contains bih0 + [bhh0_r | bhh0_z | 0].
    gx0_all = (jnp.dot(x_ref[...], wih0_ref[...], preferred_element_type=jnp.float32)
               + gb0_ref[...])                                   # (T_a*B, 3H)

    def cell(gx, h, whh_ref, bhhn):
        gh = jnp.dot(h, whh_ref[...], preferred_element_type=jnp.float32)   # (B, 3H)
        rz = jax.nn.sigmoid(gx[:, :2 * H] + gh[:, :2 * H])       # fused r/z sigmoid (one push)
        r = rz[:, :H]
        z = rz[:, H:]
        n = jnp.tanh(gx[:, 2 * H:] + r * (gh[:, 2 * H:] + bhhn))
        return (1.0 - z) * n + z * h

    h0 = jnp.zeros((B, H), jnp.float32)
    h1 = jnp.zeros((B, H), jnp.float32)
    # Statically unrolled recurrence (T_a is small); time reversal via static row indexing.
    for t in range(n_steps):
        row = (n_steps - 1 - t) * B
        gx0 = gx0_all[row:row + B]                               # (B, 3H)
        h0 = cell(gx0, h0, whh0_ref, bhh0n_ref[...])
        gx1 = (jnp.dot(h0, wih1_ref[...], preferred_element_type=jnp.float32)
               + gb1_ref[...])
        h1 = cell(gx1, h1, whh1_ref, bhh1n_ref[...])

    o_ref[...] = (jnp.dot(h1, wout_ref[...], preferred_element_type=jnp.float32)
                  + bout_ref[...]).astype(o_ref.dtype)


def gru_encode(x_flat_tm, enc, *, batch, n_steps):
    H = enc["whh0"].shape[0]
    latent = enc["wout"].shape[1]
    # Pre-sum input/hidden biases for the r/z gate columns; bhh_n stays separate (lives inside r*(...)).
    zeros_n = jnp.zeros((1, H), jnp.float32)
    gb0 = enc["bih0"] + jnp.concatenate([enc["bhh0"][:, :2 * H], zeros_n], axis=1)
    gb1 = enc["bih1"] + jnp.concatenate([enc["bhh1"][:, :2 * H], zeros_n], axis=1)
    bhh0n = enc["bhh0"][:, 2 * H:]
    bhh1n = enc["bhh1"][:, 2 * H:]
    kernel = functools.partial(_gru_encoder_kernel, hidden=H, n_steps=n_steps, batch=batch)
    return pl.pallas_call(
        kernel,
        out_shape=jax.ShapeDtypeStruct((batch, latent), jnp.float32),
    )(x_flat_tm,
      enc["wih0"], enc["whh0"], gb0, bhh0n,
      enc["wih1"], enc["whh1"], gb1, bhh1n,
      enc["wout"], enc["bout"])


# ----------------------------------------------------------------------------------------------
# Kernel 2: LaplaceRepresentationFunc MLP + Riemann-sphere projection + Fourier-series ILT
#           (single block over all N = B*T_pred rows; no grid, weights loaded once)
# ----------------------------------------------------------------------------------------------
def _laplace_ilt_kernel(x_ref,                       # (N, 2S+L)
                        e_re_ref, e_im_ref,          # (N, D*S) each, scale & k-weight folded in
                        red_ref,                     # (D*S, D) block-diagonal ones (per-d reduce)
                        col_scale_ref,               # (1, 2*D*S): pi (theta cols) / pi/2 (phi cols)
                        w1_ref, b1_ref, w2_ref, b2_ref, w3_ref, b3_ref,
                        o_ref,                       # (N, D)
                        *, out_dim, s_terms):
    DS = out_dim * s_terms
    x = x_ref[...]
    h = jnp.tanh(jnp.dot(x, w1_ref[...], preferred_element_type=jnp.float32) + b1_ref[...])
    h = jnp.tanh(jnp.dot(h, w2_ref[...], preferred_element_type=jnp.float32) + b2_ref[...])
    out = jnp.dot(h, w3_ref[...], preferred_element_type=jnp.float32) + b3_ref[...]   # (N, 2*D*S)

    # One tanh over the whole output; per-column scale picks pi (theta) vs pi/2 (phi).
    ang = jnp.tanh(out) * col_scale_ref[...]                     # (N, 2*D*S)
    theta = ang[:, :DS]                                          # (N, D*S)
    phi = ang[:, DS:]                                            # (N, D*S)

    # spherical Riemann -> complex F(s):  r = tan(phi/2 + pi/4)
    half = phi * 0.5 + (jnp.pi / 4.0)
    r = jnp.sin(half) * pl.reciprocal(jnp.cos(half), approx=True)
    f_re = r * jnp.cos(theta)
    f_im = r * jnp.sin(theta)

    # Re( F(s_k) * exp(i*pi*k*t/T) ) with k=0 half-weight and exp(gamma*t)/T already in e_re/e_im.
    contrib = f_re * e_re_ref[...] - f_im * e_im_ref[...]        # (N, D*S)
    # Per-output-dim reduction via block-diagonal-ones matmul (MXU; avoids per-d slices/concats).
    o_ref[...] = jnp.dot(contrib, red_ref[...],
                         preferred_element_type=jnp.float32).astype(o_ref.dtype)


def laplace_ilt(net_in, e_re_rows, e_im_rows, red, col_scale, rep, *, out_dim, s_terms):
    N = net_in.shape[0]
    kernel = functools.partial(_laplace_ilt_kernel, out_dim=out_dim, s_terms=s_terms)
    return pl.pallas_call(
        kernel,
        out_shape=jax.ShapeDtypeStruct((N, out_dim), jnp.float32),
    )(net_in, e_re_rows, e_im_rows, red, col_scale,
      rep["w1"], rep["b1"], rep["w2"], rep["b2"], rep["w3"], rep["b3"])


# ----------------------------------------------------------------------------------------------
# Glue (plain JAX, all inside one jit): s-point construction, sphere projection of s, init, forward
# ----------------------------------------------------------------------------------------------
def _fourier_query_points(t, s_terms):
    """s_k = gamma + i*pi*k/T with T = scale*t, gamma = alpha - log(tol)/T."""
    T_big = ILT_SCALE * t                                        # (T,)
    gamma = ILT_ALPHA - jnp.log(ILT_TOL) / T_big                 # (T,)
    k = jnp.arange(s_terms, dtype=jnp.float32)                   # (S,)
    s_re = jnp.broadcast_to(gamma[:, None], (t.shape[0], s_terms))
    s_im = jnp.pi * k[None, :] / T_big[:, None]
    return s_re, s_im, gamma, T_big, k


def _complex_to_spherical(s_re, s_im):
    mag2 = s_re * s_re + s_im * s_im
    theta = jnp.arctan2(s_im, s_re)
    phi = jnp.arcsin(jnp.clip((mag2 - 1.0) / (mag2 + 1.0), -1.0, 1.0))
    return theta, phi


def _xavier_uniform(key, shape):
    limit = (6.0 / (shape[0] + shape[1])) ** 0.5
    return jax.random.uniform(key, shape, jnp.float32, -limit, limit)


def init_params(key, state_dim, action_dim, hidden_units, s_terms):
    gru_h = hidden_units // 2
    act_latent = 2
    lap_latent = state_dim + act_latent
    mlp_in = 2 * s_terms + lap_latent
    mlp_out = 2 * state_dim * s_terms
    keys = list(jax.random.split(key, 16))
    ki = iter(keys)
    gs = 1.0 / (gru_h ** 0.5)
    unif = lambda shape, s: jax.random.uniform(next(ki), shape, jnp.float32, -s, s)
    enc = dict(
        wih0=unif((action_dim, 3 * gru_h), gs), whh0=unif((gru_h, 3 * gru_h), gs),
        bih0=unif((1, 3 * gru_h), gs), bhh0=unif((1, 3 * gru_h), gs),
        wih1=unif((gru_h, 3 * gru_h), gs), whh1=unif((gru_h, 3 * gru_h), gs),
        bih1=unif((1, 3 * gru_h), gs), bhh1=unif((1, 3 * gru_h), gs),
        wout=_xavier_uniform(next(ki), (gru_h, act_latent)),
        bout=unif((1, act_latent), gs),
    )
    rep = dict(
        w1=_xavier_uniform(next(ki), (mlp_in, hidden_units)),
        b1=jnp.zeros((1, hidden_units), jnp.float32),
        w2=_xavier_uniform(next(ki), (hidden_units, hidden_units)),
        b2=jnp.zeros((1, hidden_units), jnp.float32),
        w3=_xavier_uniform(next(ki), (hidden_units, mlp_out)),
        b3=jnp.zeros((1, mlp_out), jnp.float32),
    )
    return dict(enc=enc, rep=rep)


def neural_laplace_forward(params, in_batch_obs, in_batch_action, ts_pred,
                           *, state_dim, s_recon_terms):
    # normalize=False branch of the PyTorch forward
    batch_obs = in_batch_obs                                     # (B, state_dim)
    batch_action = in_batch_action / 3.0
    if batch_action.ndim == 2:
        batch_action = batch_action[:, None, :]
    B, T_a, A = batch_action.shape

    # ReverseGRUEncoder: no jnp.flip copy — the kernel reads timesteps in reverse order.
    x_flat_tm = jnp.transpose(batch_action, (1, 0, 2)).reshape(T_a * B, A)   # (T_a*B, A)
    p_action = gru_encode(x_flat_tm, params["enc"], batch=B, n_steps=T_a)    # (B, 2)
    p = jnp.concatenate([batch_obs, p_action], axis=1)           # (B, L)
    L = p.shape[1]

    # Fourier ILT query points and reconstruction factors
    t = jnp.reshape(ts_pred, (-1,)).astype(jnp.float32)          # (T,)
    S = s_recon_terms
    D = state_dim
    Tn = t.shape[0]
    N = B * Tn
    s_re, s_im, gamma, T_big, k = _fourier_query_points(t, S)
    th_s, ph_s = _complex_to_spherical(s_re, s_im)               # (T, S) each
    sph = jnp.concatenate([th_s, ph_s], axis=-1)                 # (T, 2S)

    # Flatten rows as (b, t) so the kernel output reshapes straight to (B, T, D).
    net_in = jnp.concatenate([
        jnp.broadcast_to(sph[None, :, :], (B, Tn, 2 * S)),
        jnp.broadcast_to(p[:, None, :], (B, Tn, L)),
    ], axis=-1).reshape(N, 2 * S + L)                            # (N, 2S+L)

    # exp(i*pi*k*t/T) weights with the k=0 term halved AND exp(gamma*t)/T folded in.
    ang = jnp.pi * k[None, :] * (t / T_big)[:, None]             # (T, S)
    kw = jnp.concatenate([jnp.full((1,), 0.5, jnp.float32),
                          jnp.ones((S - 1,), jnp.float32)])
    scale = (jnp.exp(gamma * t) / T_big)[:, None]                # (T, 1)
    e_re = jnp.cos(ang) * kw[None, :] * scale                    # (T, S)
    e_im = jnp.sin(ang) * kw[None, :] * scale
    e_re_rows = jnp.tile(jnp.broadcast_to(e_re[None], (B, Tn, S)).reshape(N, S), (1, D))
    e_im_rows = jnp.tile(jnp.broadcast_to(e_im[None], (B, Tn, S)).reshape(N, S), (1, D))

    # Block-diagonal ones: column d*S+k of `contrib` reduces into output dim d.
    red = jnp.repeat(jnp.eye(D, dtype=jnp.float32), S, axis=0)   # (D*S, D)
    col_scale = jnp.concatenate([jnp.full((1, D * S), jnp.pi, jnp.float32),
                                 jnp.full((1, D * S), jnp.pi / 2.0, jnp.float32)], axis=1)

    recon_rows = laplace_ilt(net_in, e_re_rows, e_im_rows, red, col_scale, params["rep"],
                             out_dim=D, s_terms=S)               # (N, D)
    recon = recon_rows.reshape(B, Tn, D)                         # (B, T, D)
    return jnp.squeeze(recon)                                    # torch.squeeze


if __name__ == "__main__":
    B, state_dim, action_dim = 2, 3, 2
    T_a, T_pred = 8, 6
    hidden_units, s_terms = 64, 33

    root = jax.random.PRNGKey(0)
    k_param, k_obs, k_act = jax.random.split(root, 3)
    params = init_params(k_param, state_dim, action_dim, hidden_units, s_terms)

    obs = jax.random.normal(k_obs, (B, state_dim), jnp.float32)
    act = jax.random.normal(k_act, (B, T_a, action_dim), jnp.float32)
    ts = jnp.linspace(0.05, 0.3, T_pred).astype(jnp.float32)     # strictly positive pred times

    fwd = jax.jit(functools.partial(neural_laplace_forward,
                                    state_dim=state_dim, s_recon_terms=s_terms))
    out = fwd(params, obs, act, ts)
    jax.block_until_ready(out)
    assert out.shape == (B, T_pred, state_dim)
    print("KERNEL_OK")
</pallas_src>

<mosaic_0001>
module attributes {stable_mosaic.version = 11 : i64} {
  func.func @_gru_encoder_kernel(%arg0: memref<16x2xf32, #tpu.memory_space<vmem>>, %arg1: memref<2x96xf32, #tpu.memory_space<vmem>>, %arg2: memref<32x96xf32, #tpu.memory_space<vmem>>, %arg3: memref<1x96xf32, #tpu.memory_space<vmem>>, %arg4: memref<1x32xf32, #tpu.memory_space<vmem>>, %arg5: memref<32x96xf32, #tpu.memory_space<vmem>>, %arg6: memref<32x96xf32, #tpu.memory_space<vmem>>, %arg7: memref<1x96xf32, #tpu.memory_space<vmem>>, %arg8: memref<1x32xf32, #tpu.memory_space<vmem>>, %arg9: memref<32x2xf32, #tpu.memory_space<vmem>>, %arg10: memref<1x2xf32, #tpu.memory_space<vmem>>, %arg11: memref<2x2xf32, #tpu.memory_space<vmem>>) attributes {dimension_semantics = [], scalar_prefetch = 0 : i64, scratch_operands = 0 : i64, tpu.core_type = #tpu.core_type<tc>} {
    %c0 = arith.constant 0 : index
    %c0_0 = arith.constant 0 : index
    %0 = vector.load %arg0[%c0, %c0_0] : memref<16x2xf32, #tpu.memory_space<vmem>>, vector<16x2xf32>
    %c0_1 = arith.constant 0 : index
    %c0_2 = arith.constant 0 : index
    %1 = vector.load %arg1[%c0_1, %c0_2] : memref<2x96xf32, #tpu.memory_space<vmem>>, vector<2x96xf32>
    %cst = arith.constant dense<0.000000e+00> : vector<16x96xf32>
    %2 = tpu.matmul %0, %1, %cst {dimension_numbers = #tpu.dot_dimension_numbers<[1], [0], [0], [1], [0, 0, 1, 1], [], []>} : vector<16x2xf32>, vector<2x96xf32>, vector<16x96xf32> -> vector<16x96xf32>
    %c0_3 = arith.constant 0 : index
    %c0_4 = arith.constant 0 : index
    %3 = vector.load %arg3[%c0_3, %c0_4] : memref<1x96xf32, #tpu.memory_space<vmem>>, vector<1x96xf32>
    %4 = vector.broadcast %3 : vector<1x96xf32> to vector<16x96xf32>
    %5 = arith.addf %2, %4 : vector<16x96xf32>
    %cst_5 = arith.constant 0.000000e+00 : f32
    %6 = vector.broadcast %cst_5 : f32 to vector<2x32xf32>
    %cst_6 = arith.constant 0.000000e+00 : f32
    %7 = vector.broadcast %cst_6 : f32 to vector<2x32xf32>
    %8 = vector.extract_strided_slice %5 {offsets = [14, 0], sizes = [2, 96], strides = [1, 1]} : vector<16x96xf32> to vector<2x96xf32>
    %c0_7 = arith.constant 0 : index
    %c0_8 = arith.constant 0 : index
    %9 = vector.load %arg4[%c0_7, %c0_8] : memref<1x32xf32, #tpu.memory_space<vmem>>, vector<1x32xf32>
    %c0_9 = arith.constant 0 : index
    %c0_10 = arith.constant 0 : index
    %10 = vector.load %arg2[%c0_9, %c0_10] : memref<32x96xf32, #tpu.memory_space<vmem>>, vector<32x96xf32>
    %cst_11 = arith.constant dense<0.000000e+00> : vector<2x96xf32>
    %11 = tpu.matmul %6, %10, %cst_11 {dimension_numbers = #tpu.dot_dimension_numbers<[1], [0], [0], [1], [0, 0, 1, 1], [], []>} : vector<2x32xf32>, vector<32x96xf32>, vector<2x96xf32> -> vector<2x96xf32>
    %12 = vector.extract_strided_slice %8 {offsets = [0, 0], sizes = [2, 64], strides = [1, 1]} : vector<2x96xf32> to vector<2x64xf32>
    %13 = vector.extract_strided_slice %11 {offsets = [0, 0], sizes = [2, 64], strides = [1, 1]} : vector<2x96xf32> to vector<2x64xf32>
    %14 = arith.addf %12, %13 : vector<2x64xf32>
    %15 = arith.negf %14 : vector<2x64xf32>
    %16 = math.exp %15 : vector<2x64xf32>
    %cst_12 = arith.constant 1.000000e+00 : f32
    %17 = vector.broadcast %cst_12 : f32 to vector<2x64xf32>
    %18 = arith.addf %17, %16 : vector<2x64xf32>
    %19 = arith.divf %17, %18 : vector<2x64xf32>
    %20 = vector.extract_strided_slice %19 {offsets = [0, 0], sizes = [2, 32], strides = [1, 1]} : vector<2x64xf32> to vector<2x32xf32>
    %21 = vector.extract_strided_slice %19 {offsets = [0, 32], sizes = [2, 32], strides = [1, 1]} : vector<2x64xf32> to vector<2x32xf32>
    %22 = vector.extract_strided_slice %8 {offsets = [0, 64], sizes = [2, 32], strides = [1, 1]} : vector<2x96xf32> to vector<2x32xf32>
    %23 = vector.extract_strided_slice %11 {offsets = [0, 64], sizes = [2, 32], strides = [1, 1]} : vector<2x96xf32> to vector<2x32xf32>
    %24 = vector.broadcast %9 : vector<1x32xf32> to vector<2x32xf32>
    %25 = arith.addf %23, %24 : vector<2x32xf32>
    %26 = arith.mulf %20, %25 : vector<2x32xf32>
    %27 = arith.addf %22, %26 : vector<2x32xf32>
    %28 = math.tanh %27 : vector<2x32xf32>
    %cst_13 = arith.constant 1.000000e+00 : f32
    %29 = vector.broadcast %cst_13 : f32 to vector<2x32xf32>
    %30 = arith.subf %29, %21 : vector<2x32xf32>
    %31 = arith.mulf %30, %28 : vector<2x32xf32>
    %32 = arith.mulf %21, %6 : vector<2x32xf32>
    %33 = arith.addf %31, %32 : vector<2x32xf32>
    %c0_14 = arith.constant 0 : index
    %c0_15 = arith.constant 0 : index
    %34 = vector.load %arg5[%c0_14, %c0_15] : memref<32x96xf32, #tpu.memory_space<vmem>>, vector<32x96xf32>
    %cst_16 = arith.constant dense<0.000000e+00> : vector<2x96xf32>
    %35 = tpu.matmul %33, %34, %cst_16 {dimension_numbers = #tpu.dot_dimension_numbers<[1], [0], [0], [1], [0, 0, 1, 1], [], []>} : vector<2x32xf32>, vector<32x96xf32>, vector<2x96xf32> -> vector<2x96xf32>
    %c0_17 = arith.constant 0 : index
    %c0_18 = arith.constant 0 : index
    %36 = vector.load %arg7[%c0_17, %c0_18] : memref<1x96xf32, #tpu.memory_space<vmem>>, vector<1x96xf32>
    %37 = vector.broadcast %36 : vector<1x96xf32> to vector<2x96xf32>
    %38 = arith.addf %35, %37 : vector<2x96xf32>
    %c0_19 = arith.constant 0 : index
    %c0_20 = arith.constant 0 : index
    %39 = vector.load %arg8[%c0_19, %c0_20] : memref<1x32xf32, #tpu.memory_space<vmem>>, vector<1x32xf32>
    %c0_21 = arith.constant 0 : index
    %c0_22 = arith.constant 0 : index
    %40 = vector.load %arg6[%c0_21, %c0_22] : memref<32x96xf32, #tpu.memory_space<vmem>>, vector<32x96xf32>
    %cst_23 = arith.constant dense<0.000000e+00> : vector<2x96xf32>
    %41 = tpu.matmul %7, %40, %cst_23 {dimension_numbers = #tpu.dot_dimension_numbers<[1], [0], [0], [1], [0, 0, 1, 1], [], []>} : vector<2x32xf32>, vector<32x96xf32>, vector<2x96xf32> -> vector<2x96xf32>
    %42 = vector.extract_strided_slice %38 {offsets = [0, 0], sizes = [2, 64], strides = [1, 1]} : vector<2x96xf32> to vector<2x64xf32>
    %43 = vector.extract_strided_slice %41 {offsets = [0, 0], sizes = [2, 64], strides = [1, 1]} : vector<2x96xf32> to vector<2x64xf32>
    %44 = arith.addf %42, %43 : vector<2x64xf32>
    %45 = arith.negf %44 : vector<2x64xf32>
    %46 = math.exp %45 : vector<2x64xf32>
    %cst_24 = arith.constant 1.000000e+00 : f32
    %47 = vector.broadcast %cst_24 : f32 to vector<2x64xf32>
    %48 = arith.addf %47, %46 : vector<2x64xf32>
    %49 = arith.divf %47, %48 : vector<2x64xf32>
    %50 = vector.extract_strided_slice %49 {offsets = [0, 0], sizes = [2, 32], strides = [1, 1]} : vector<2x64xf32> to vector<2x32xf32>
    %51 = vector.extract_strided_slice %49 {offsets = [0, 32], sizes = [2, 32], strides = [1, 1]} : vector<2x64xf32> to vector<2x32xf32>
    %52 = vector.extract_strided_slice %38 {offsets = [0, 64], sizes = [2, 32], strides = [1, 1]} : vector<2x96xf32> to vector<2x32xf32>
    %53 = vector.extract_strided_slice %41 {offsets = [0, 64], sizes = [2, 32], strides = [1, 1]} : vector<2x96xf32> to vector<2x32xf32>
    %54 = vector.broadcast %39 : vector<1x32xf32> to vector<2x32xf32>
    %55 = arith.addf %53, %54 : vector<2x32xf32>
    %56 = arith.mulf %50, %55 : vector<2x32xf32>
    %57 = arith.addf %52, %56 : vector<2x32xf32>
    %58 = math.tanh %57 : vector<2x32xf32>
    %cst_25 = arith.constant 1.000000e+00 : f32
    %59 = vector.broadcast %cst_25 : f32 to vector<2x32xf32>
    %60 = arith.subf %59, %51 : vector<2x32xf32>
    %61 = arith.mulf %60, %58 : vector<2x32xf32>
    %62 = arith.mulf %51, %7 : vector<2x32xf32>
    %63 = arith.addf %61, %62 : vector<2x32xf32>
    %64 = vector.extract_strided_slice %5 {offsets = [12, 0], sizes = [2, 96], strides = [1, 1]} : vector<16x96xf32> to vector<2x96xf32>
    %c0_26 = arith.constant 0 : index
    %c0_27 = arith.constant 0 : index
    %65 = vector.load %arg4[%c0_26, %c0_27] : memref<1x32xf32, #tpu.memory_space<vmem>>, vector<1x32xf32>
    %c0_28 = arith.constant 0 : index
    %c0_29 = arith.constant 0 : index
    %66 = vector.load %arg2[%c0_28, %c0_29] : memref<32x96xf32, #tpu.memory_space<vmem>>, vector<32x96xf32>
    %cst_30 = arith.constant dense<0.000000e+00> : vector<2x96xf32>
    %67 = tpu.matmul %33, %66, %cst_30 {dimension_numbers = #tpu.dot_dimension_numbers<[1], [0], [0], [1], [0, 0, 1, 1], [], []>} : vector<2x32xf32>, vector<32x96xf32>, vector<2x96xf32> -> vector<2x96xf32>
    %68 = vector.extract_strided_slice %64 {offsets = [0, 0], sizes = [2, 64], strides = [1, 1]} : vector<2x96xf32> to vector<2x64xf32>
    %69 = vector.extract_strided_slice %67 {offsets = [0, 0], sizes = [2, 64], strides = [1, 1]} : vector<2x96xf32> to vector<2x64xf32>
    %70 = arith.addf %68, %69 : vector<2x64xf32>
    %71 = arith.negf %70 : vector<2x64xf32>
    %72 = math.exp %71 : vector<2x64xf32>
    %cst_31 = arith.constant 1.000000e+00 : f32
    %73 = vector.broadcast %cst_31 : f32 to vector<2x64xf32>
    %74 = arith.addf %73, %72 : vector<2x64xf32>
    %75 = arith.divf %73, %74 : vector<2x64xf32>
    %76 = vector.extract_strided_slice %75 {offsets = [0, 0], sizes = [2, 32], strides = [1, 1]} : vector<2x64xf32> to vector<2x32xf32>
    %77 = vector.extract_strided_slice %75 {offsets = [0, 32], sizes = [2, 32], strides = [1, 1]} : vector<2x64xf32> to vector<2x32xf32>
    %78 = vector.extract_strided_slice %64 {offsets = [0, 64], sizes = [2, 32], strides = [1, 1]} : vector<2x96xf32> to vector<2x32xf32>
    %79 = vector.extract_strided_slice %67 {offsets = [0, 64], sizes = [2, 32], strides = [1, 1]} : vector<2x96xf32> to vector<2x32xf32>
    %80 = vector.broadcast %65 : vector<1x32xf32> to vector<2x32xf32>
    %81 = arith.addf %79, %80 : vector<2x32xf32>
    %82 = arith.mulf %76, %81 : vector<2x32xf32>
    %83 = arith.addf %78, %82 : vector<2x32xf32>
    %84 = math.tanh %83 : vector<2x32xf32>
    %cst_32 = arith.constant 1.000000e+00 : f32
    %85 = vector.broadcast %cst_32 : f32 to vector<2x32xf32>
    %86 = arith.subf %85, %77 : vector<2x32xf32>
    %87 = arith.mulf %86, %84 : vector<2x32xf32>
    %88 = arith.mulf %77, %33 : vector<2x32xf32>
    %89 = arith.addf %87, %88 : vector<2x32xf32>
    %c0_33 = arith.constant 0 : index
    %c0_34 = arith.constant 0 : index
    %90 = vector.load %arg5[%c0_33, %c0_34] : memref<32x96xf32, #tpu.memory_space<vmem>>, vector<32x96xf32>
    %cst_35 = arith.constant dense<0.000000e+00> : vector<2x96xf32>
    %91 = tpu.matmul %89, %90, %cst_35 {dimension_numbers = #tpu.dot_dimension_numbers<[1], [0], [0], [1], [0, 0, 1, 1], [], []>} : vector<2x32xf32>, vector<32x96xf32>, vector<2x96xf32> -> vector<2x96xf32>
    %c0_36 = arith.constant 0 : index
    %c0_37 = arith.constant 0 : index
    %92 = vector.load %arg7[%c0_36, %c0_37] : memref<1x96xf32, #tpu.memory_space<vmem>>, vector<1x96xf32>
    %93 = vector.broadcast %92 : vector<1x96xf32> to vector<2x96xf32>
    %94 = arith.addf %91, %93 : vector<2x96xf32>
    %c0_38 = arith.constant 0 : index
    %c0_39 = arith.constant 0 : index
    %95 = vector.load %arg8[%c0_38, %c0_39] : memref<1x32xf32, #tpu.memory_space<vmem>>, vector<1x32xf32>
    %c0_40 = arith.constant 0 : index
    %c0_41 = arith.constant 0 : index
    %96 = vector.load %arg6[%c0_40, %c0_41] : memref<32x96xf32, #tpu.memory_space<vmem>>, vector<32x96xf32>
    %cst_42 = arith.constant dense<0.000000e+00> : vector<2x96xf32>
    %97 = tpu.matmul %63, %96, %cst_42 {dimension_numbers = #tpu.dot_dimension_numbers<[1], [0], [0], [1], [0, 0, 1, 1], [], []>} : vector<2x32xf32>, vector<32x96xf32>, vector<2x96xf32> -> vector<2x96xf32>
    %98 = vector.extract_strided_slice %94 {offsets = [0, 0], sizes = [2, 64], strides = [1, 1]} : vector<2x96xf32> to vector<2x64xf32>
    %99 = vector.extract_strided_slice %97 {offsets = [0, 0], sizes = [2, 64], strides = [1, 1]} : vector<2x96xf32> to vector<2x64xf32>
    %100 = arith.addf %98, %99 : vector<2x64xf32>
    %101 = arith.negf %100 : vector<2x64xf32>
    %102 = math.exp %101 : vector<2x64xf32>
    %cst_43 = arith.constant 1.000000e+00 : f32
    %103 = vector.broadcast %cst_43 : f32 to vector<2x64xf32>
    %104 = arith.addf %103, %102 : vector<2x64xf32>
    %105 = arith.divf %103, %104 : vector<2x64xf32>
    %106 = vector.extract_strided_slice %105 {offsets = [0, 0], sizes = [2, 32], strides = [1, 1]} : vector<2x64xf32> to vector<2x32xf32>
    %107 = vector.extract_strided_slice %105 {offsets = [0, 32], sizes = [2, 32], strides = [1, 1]} : vector<2x64xf32> to vector<2x32xf32>
    %108 = vector.extract_strided_slice %94 {offsets = [0, 64], sizes = [2, 32], strides = [1, 1]} : vector<2x96xf32> to vector<2x32xf32>
    %109 = vector.extract_strided_slice %97 {offsets = [0, 64], sizes = [2, 32], strides = [1, 1]} : vector<2x96xf32> to vector<2x32xf32>
    %110 = vector.broadcast %95 : vector<1x32xf32> to vector<2x32xf32>
    %111 = arith.addf %109, %110 : vector<2x32xf32>
    %112 = arith.mulf %106, %111 : vector<2x32xf32>
    %113 = arith.addf %108, %112 : vector<2x32xf32>
    %114 = math.tanh %113 : vector<2x32xf32>
    %cst_44 = arith.constant 1.000000e+00 : f32
    %115 = vector.broadcast %cst_44 : f32 to vector<2x32xf32>
    %116 = arith.subf %115, %107 : vector<2x32xf32>
    %117 = arith.mulf %116, %114 : vector<2x32xf32>
    %118 = arith.mulf %107, %63 : vector<2x32xf32>
    %119 = arith.addf %117, %118 : vector<2x32xf32>
    %120 = vector.extract_strided_slice %5 {offsets = [10, 0], sizes = [2, 96], strides = [1, 1]} : vector<16x96xf32> to vector<2x96xf32>
    %c0_45 = arith.constant 0 : index
    %c0_46 = arith.constant 0 : index
    %121 = vector.load %arg4[%c0_45, %c0_46] : memref<1x32xf32, #tpu.memory_space<vmem>>, vector<1x32xf32>
    %c0_47 = arith.constant 0 : index
    %c0_48 = arith.constant 0 : index
    %122 = vector.load %arg2[%c0_47, %c0_48] : memref<32x96xf32, #tpu.memory_space<vmem>>, vector<32x96xf32>
    %cst_49 = arith.constant dense<0.000000e+00> : vector<2x96xf32>
    %123 = tpu.matmul %89, %122, %cst_49 {dimension_numbers = #tpu.dot_dimension_numbers<[1], [0], [0], [1], [0, 0, 1, 1], [], []>} : vector<2x32xf32>, vector<32x96xf32>, vector<2x96xf32> -> vector<2x96xf32>
    %124 = vector.extract_strided_slice %120 {offsets = [0, 0], sizes = [2, 64], strides = [1, 1]} : vector<2x96xf32> to vector<2x64xf32>
    %125 = vector.extract_strided_slice %123 {offsets = [0, 0], sizes = [2, 64], strides = [1, 1]} : vector<2x96xf32> to vector<2x64xf32>
    %126 = arith.addf %124, %125 : vector<2x64xf32>
    %127 = arith.negf %126 : vector<2x64xf32>
    %128 = math.exp %127 : vector<2x64xf32>
    %cst_50 = arith.constant 1.000000e+00 : f32
    %129 = vector.broadcast %cst_50 : f32 to vector<2x64xf32>
    %130 = arith.addf %129, %128 : vector<2x64xf32>
    %131 = arith.divf %129, %130 : vector<2x64xf32>
    %132 = vector.extract_strided_slice %131 {offsets = [0, 0], sizes = [2, 32], strides = [1, 1]} : vector<2x64xf32> to vector<2x32xf32>
    %133 = vector.extract_strided_slice %131 {offsets = [0, 32], sizes = [2, 32], strides = [1, 1]} : vector<2x64xf32> to vector<2x32xf32>
    %134 = vector.extract_strided_slice %120 {offsets = [0, 64], sizes = [2, 32], strides = [1, 1]} : vector<2x96xf32> to vector<2x32xf32>
    %135 = vector.extract_strided_slice %123 {offsets = [0, 64], sizes = [2, 32], strides = [1, 1]} : vector<2x96xf32> to vector<2x32xf32>
    %136 = vector.broadcast %121 : vector<1x32xf32> to vector<2x32xf32>
    %137 = arith.addf %135, %136 : vector<2x32xf32>
    %138 = arith.mulf %132, %137 : vector<2x32xf32>
    %139 = arith.addf %134, %138 : vector<2x32xf32>
    %140 = math.tanh %139 : vector<2x32xf32>
    %cst_51 = arith.constant 1.000000e+00 : f32
    %141 = vector.broadcast %cst_51 : f32 to vector<2x32xf32>
    %142 = arith.subf %141, %133 : vector<2x32xf32>
    %143 = arith.mulf %142, %140 : vector<2x32xf32>
    %144 = arith.mulf %133, %89 : vector<2x32xf32>
    %145 = arith.addf %143, %144 : vector<2x32xf32>
    %c0_52 = arith.constant 0 : index
    %c0_53 = arith.constant 0 : index
    %146 = vector.load %arg5[%c0_52, %c0_53] : memref<32x96xf32, #tpu.memory_space<vmem>>, vector<32x96xf32>
    %cst_54 = arith.constant dense<0.000000e+00> : vector<2x96xf32>
    %147 = tpu.matmul %145, %146, %cst_54 {dimension_numbers = #tpu.dot_dimension_numbers<[1], [0], [0], [1], [0, 0, 1, 1], [], []>} : vector<2x32xf32>, vector<32x96xf32>, vector<2x96xf32> -> vector<2x96xf32>
    %c0_55 = arith.constant 0 : index
    %c0_56 = arith.constant 0 : index
    %148 = vector.load %arg7[%c0_55, %c0_56] : memref<1x96xf32, #tpu.memory_space<vmem>>, vector<1x96xf32>
    %149 = vector.broadcast %148 : vector<1x96xf32> to vector<2x96xf32>
    %150 = arith.addf %147, %149 : vector<2x96xf32>
    %c0_57 = arith.constant 0 : index
    %c0_58 = arith.constant 0 : index
    %151 = vector.load %arg8[%c0_57, %c0_58] : memref<1x32xf32, #tpu.memory_space<vmem>>, vector<1x32xf32>
    %c0_59 = arith.constant 0 : index
    %c0_60 = arith.constant 0 : index
    %152 = vector.load %arg6[%c0_59, %c0_60] : memref<32x96xf32, #tpu.memory_space<vmem>>, vector<32x96xf32>
    %cst_61 = arith.constant dense<0.000000e+00> : vector<2x96xf32>
    %153 = tpu.matmul %119, %152, %cst_61 {dimension_numbers = #tpu.dot_dimension_numbers<[1], [0], [0], [1], [0, 0, 1, 1], [], []>} : vector<2x32xf32>, vector<32x96xf32>, vector<2x96xf32> -> vector<2x96xf32>
    %154 = vector.extract_strided_slice %150 {offsets = [0, 0], sizes = [2, 64], strides = [1, 1]} : vector<2x96xf32> to vector<2x64xf32>
    %155 = vector.extract_strided_slice %153 {offsets = [0, 0], sizes = [2, 64], strides = [1, 1]} : vector<2x96xf32> to vector<2x64xf32>
    %156 = arith.addf %154, %155 : vector<2x64xf32>
    %157 = arith.negf %156 : vector<2x64xf32>
    %158 = math.exp %157 : vector<2x64xf32>
    %cst_62 = arith.constant 1.000000e+00 : f32
    %159 = vector.broadcast %cst_62 : f32 to vector<2x64xf32>
    %160 = arith.addf %159, %158 : vector<2x64xf32>
    %161 = arith.divf %159, %160 : vector<2x64xf32>
    %162 = vector.extract_strided_slice %161 {offsets = [0, 0], sizes = [2, 32], strides = [1, 1]} : vector<2x64xf32> to vector<2x32xf32>
    %163 = vector.extract_strided_slice %161 {offsets = [0, 32], sizes = [2, 32], strides = [1, 1]} : vector<2x64xf32> to vector<2x32xf32>
    %164 = vector.extract_strided_slice %150 {offsets = [0, 64], sizes = [2, 32], strides = [1, 1]} : vector<2x96xf32> to vector<2x32xf32>
    %165 = vector.extract_strided_slice %153 {offsets = [0, 64], sizes = [2, 32], strides = [1, 1]} : vector<2x96xf32> to vector<2x32xf32>
    %166 = vector.broadcast %151 : vector<1x32xf32> to vector<2x32xf32>
    %167 = arith.addf %165, %166 : vector<2x32xf32>
    %168 = arith.mulf %162, %167 : vector<2x32xf32>
    %169 = arith.addf %164, %168 : vector<2x32xf32>
    %170 = math.tanh %169 : vector<2x32xf32>
    %cst_63 = arith.constant 1.000000e+00 : f32
    %171 = vector.broadcast %cst_63 : f32 to vector<2x32xf32>
    %172 = arith.subf %171, %163 : vector<2x32xf32>
    %173 = arith.mulf %172, %170 : vector<2x32xf32>
    %174 = arith.mulf %163, %119 : vector<2x32xf32>
    %175 = arith.addf %173, %174 : vector<2x32xf32>
    %176 = vector.extract_strided_slice %5 {offsets = [8, 0], sizes = [2, 96], strides = [1, 1]} : vector<16x96xf32> to vector<2x96xf32>
    %c0_64 = arith.constant 0 : index
    %c0_65 = arith.constant 0 : index
    %177 = vector.load %arg4[%c0_64, %c0_65] : memref<1x32xf32, #tpu.memory_space<vmem>>, vector<1x32xf32>
    %c0_66 = arith.constant 0 : index
    %c0_67 = arith.constant 0 : index
    %178 = vector.load %arg2[%c0_66, %c0_67] : memref<32x96xf32, #tpu.memory_space<vmem>>, vector<32x96xf32>
    %cst_68 = arith.constant dense<0.000000e+00> : vector<2x96xf32>
    %179 = tpu.matmul %145, %178, %cst_68 {dimension_numbers = #tpu.dot_dimension_numbers<[1], [0], [0], [1], [0, 0, 1, 1], [], []>} : vector<2x32xf32>, vector<32x96xf32>, vector<2x96xf32> -> vector<2x96xf32>
    %180 = vector.extract_strided_slice %176 {offsets = [0, 0], sizes = [2, 64], strides = [1, 1]} : vector<2x96xf32> to vector<2x64xf32>
    %181 = vector.extract_strided_slice %179 {offsets = [0, 0], sizes = [2, 64], strides = [1, 1]} : vector<2x96xf32> to vector<2x64xf32>
    %182 = arith.addf %180, %181 : vector<2x64xf32>
    %183 = arith.negf %182 : vector<2x64xf32>
    %184 = math.exp %183 : vector<2x64xf32>
    %cst_69 = arith.constant 1.000000e+00 : f32
    %185 = vector.broadcast %cst_69 : f32 to vector<2x64xf32>
    %186 = arith.addf %185, %184 : vector<2x64xf32>
    %187 = arith.divf %185, %186 : vector<2x64xf32>
    %188 = vector.extract_strided_slice %187 {offsets = [0, 0], sizes = [2, 32], strides = [1, 1]} : vector<2x64xf32> to vector<2x32xf32>
    %189 = vector.extract_strided_slice %187 {offsets = [0, 32], sizes = [2, 32], strides = [1, 1]} : vector<2x64xf32> to vector<2x32xf32>
    %190 = vector.extract_strided_slice %176 {offsets = [0, 64], sizes = [2, 32], strides = [1, 1]} : vector<2x96xf32> to vector<2x32xf32>
    %191 = vector.extract_strided_slice %179 {offsets = [0, 64], sizes = [2, 32], strides = [1, 1]} : vector<2x96xf32> to vector<2x32xf32>
    %192 = vector.broadcast %177 : vector<1x32xf32> to vector<2x32xf32>
    %193 = arith.addf %191, %192 : vector<2x32xf32>
    %194 = arith.mulf %188, %193 : vector<2x32xf32>
    %195 = arith.addf %190, %194 : vector<2x32xf32>
    %196 = math.tanh %195 : vector<2x32xf32>
    %cst_70 = arith.constant 1.000000e+00 : f32
    %197 = vector.broadcast %cst_70 : f32 to vector<2x32xf32>
    %198 = arith.subf %197, %189 : vector<2x32xf32>
    %199 = arith.mulf %198, %196 : vector<2x32xf32>
    %200 = arith.mulf %189, %145 : vector<2x32xf32>
    %201 = arith.addf %199, %200 : vector<2x32xf32>
    %c0_71 = arith.constant 0 : index
    %c0_72 = arith.constant 0 : index
    %202 = vector.load %arg5[%c0_71, %c0_72] : memref<32x96xf32, #tpu.memory_space<vmem>>, vector<32x96xf32>
    %cst_73 = arith.constant dense<0.000000e+00> : vector<2x96xf32>
    %203 = tpu.matmul %201, %202, %cst_73 {dimension_numbers = #tpu.dot_dimension_numbers<[1], [0], [0], [1], [0, 0, 1, 1], [], []>} : vector<2x32xf32>, vector<32x96xf32>, vector<2x96xf32> -> vector<2x96xf32>
    %c0_74 = arith.constant 0 : index
    %c0_75 = arith.constant 0 : index
    %204 = vector.load %arg7[%c0_74, %c0_75] : memref<1x96xf32, #tpu.memory_space<vmem>>, vector<1x96xf32>
    %205 = vector.broadcast %204 : vector<1x96xf32> to vector<2x96xf32>
    %206 = arith.addf %203, %205 : vector<2x96xf32>
    %c0_76 = arith.constant 0 : index
    %c0_77 = arith.constant 0 : index
    %207 = vector.load %arg8[%c0_76, %c0_77] : memref<1x32xf32, #tpu.memory_space<vmem>>, vector<1x32xf32>
    %c0_78 = arith.constant 0 : index
    %c0_79 = arith.constant 0 : index
    %208 = vector.load %arg6[%c0_78, %c0_79] : memref<32x96xf32, #tpu.memory_space<vmem>>, vector<32x96xf32>
    %cst_80 = arith.constant dense<0.000000e+00> : vector<2x96xf32>
    %209 = tpu.matmul %175, %208, %cst_80 {dimension_numbers = #tpu.dot_dimension_numbers<[1], [0], [0], [1], [0, 0, 1, 1], [], []>} : vector<2x32xf32>, vector<32x96xf32>, vector<2x96xf32> -> vector<2x96xf32>
    %210 = vector.extract_strided_slice %206 {offsets = [0, 0], sizes = [2, 64], strides = [1, 1]} : vector<2x96xf32> to vector<2x64xf32>
    %211 = vector.extract_strided_slice %209 {offsets = [0, 0], sizes = [2, 64], strides = [1, 1]} : vector<2x96xf32> to vector<2x64xf32>
    %212 = arith.addf %210, %211 : vector<2x64xf32>
    %213 = arith.negf %212 : vector<2x64xf32>
    %214 = math.exp %213 : vector<2x64xf32>
    %cst_81 = arith.constant 1.000000e+00 : f32
    %215 = vector.broadcast %cst_81 : f32 to vector<2x64xf32>
    %216 = arith.addf %215, %214 : vector<2x64xf32>
    %217 = arith.divf %215, %216 : vector<2x64xf32>
    %218 = vector.extract_strided_slice %217 {offsets = [0, 0], sizes = [2, 32], strides = [1, 1]} : vector<2x64xf32> to vector<2x32xf32>
    %219 = vector.extract_strided_slice %217 {offsets = [0, 32], sizes = [2, 32], strides = [1, 1]} : vector<2x64xf32> to vector<2x32xf32>
    %220 = vector.extract_strided_slice %206 {offsets = [0, 64], sizes = [2, 32], strides = [1, 1]} : vector<2x96xf32> to vector<2x32xf32>
    %221 = vector.extract_strided_slice %209 {offsets = [0, 64], sizes = [2, 32], strides = [1, 1]} : vector<2x96xf32> to vector<2x32xf32>
    %222 = vector.broadcast %207 : vector<1x32xf32> to vector<2x32xf32>
    %223 = arith.addf %221, %222 : vector<2x32xf32>
    %224 = arith.mulf %218, %223 : vector<2x32xf32>
    %225 = arith.addf %220, %224 : vector<2x32xf32>
    %226 = math.tanh %225 : vector<2x32xf32>
    %cst_82 = arith.constant 1.000000e+00 : f32
    %227 = vector.broadcast %cst_82 : f32 to vector<2x32xf32>
    %228 = arith.subf %227, %219 : vector<2x32xf32>
    %229 = arith.mulf %228, %226 : vector<2x32xf32>
    %230 = arith.mulf %219, %175 : vector<2x32xf32>
    %231 = arith.addf %229, %230 : vector<2x32xf32>
    %232 = vector.extract_strided_slice %5 {offsets = [6, 0], sizes = [2, 96], strides = [1, 1]} : vector<16x96xf32> to vector<2x96xf32>
    %c0_83 = arith.constant 0 : index
    %c0_84 = arith.constant 0 : index
    %233 = vector.load %arg4[%c0_83, %c0_84] : memref<1x32xf32, #tpu.memory_space<vmem>>, vector<1x32xf32>
    %c0_85 = arith.constant 0 : index
    %c0_86 = arith.constant 0 : index
    %234 = vector.load %arg2[%c0_85, %c0_86] : memref<32x96xf32, #tpu.memory_space<vmem>>, vector<32x96xf32>
    %cst_87 = arith.constant dense<0.000000e+00> : vector<2x96xf32>
    %235 = tpu.matmul %201, %234, %cst_87 {dimension_numbers = #tpu.dot_dimension_numbers<[1], [0], [0], [1], [0, 0, 1, 1], [], []>} : vector<2x32xf32>, vector<32x96xf32>, vector<2x96xf32> -> vector<2x96xf32>
    %236 = vector.extract_strided_slice %232 {offsets = [0, 0], sizes = [2, 64], strides = [1, 1]} : vector<2x96xf32> to vector<2x64xf32>
    %237 = vector.extract_strided_slice %235 {offsets = [0, 0], sizes = [2, 64], strides = [1, 1]} : vector<2x96xf32> to vector<2x64xf32>
    %238 = arith.addf %236, %237 : vector<2x64xf32>
    %239 = arith.negf %238 : vector<2x64xf32>
    %240 = math.exp %239 : vector<2x64xf32>
    %cst_88 = arith.constant 1.000000e+00 : f32
    %241 = vector.broadcast %cst_88 : f32 to vector<2x64xf32>
    %242 = arith.addf %241, %240 : vector<2x64xf32>
    %243 = arith.divf %241, %242 : vector<2x64xf32>
    %244 = vector.extract_strided_slice %243 {offsets = [0, 0], sizes = [2, 32], strides = [1, 1]} : vector<2x64xf32> to vector<2x32xf32>
    %245 = vector.extract_strided_slice %243 {offsets = [0, 32], sizes = [2, 32], strides = [1, 1]} : vector<2x64xf32> to vector<2x32xf32>
    %246 = vector.extract_strided_slice %232 {offsets = [0, 64], sizes = [2, 32], strides = [1, 1]} : vector<2x96xf32> to vector<2x32xf32>
    %247 = vector.extract_strided_slice %235 {offsets = [0, 64], sizes = [2, 32], strides = [1, 1]} : vector<2x96xf32> to vector<2x32xf32>
    %248 = vector.broadcast %233 : vector<1x32xf32> to vector<2x32xf32>
    %249 = arith.addf %247, %248 : vector<2x32xf32>
    %250 = arith.mulf %244, %249 : vector<2x32xf32>
    %251 = arith.addf %246, %250 : vector<2x32xf32>
    %252 = math.tanh %251 : vector<2x32xf32>
    %cst_89 = arith.constant 1.000000e+00 : f32
    %253 = vector.broadcast %cst_89 : f32 to vector<2x32xf32>
    %254 = arith.subf %253, %245 : vector<2x32xf32>
    %255 = arith.mulf %254, %252 : vector<2x32xf32>
    %256 = arith.mulf %245, %201 : vector<2x32xf32>
    %257 = arith.addf %255, %256 : vector<2x32xf32>
    %c0_90 = arith.constant 0 : index
    %c0_91 = arith.constant 0 : index
    %258 = vector.load %arg5[%c0_90, %c0_91] : memref<32x96xf32, #tpu.memory_space<vmem>>, vector<32x96xf32>
    %cst_92 = arith.constant dense<0.000000e+00> : vector<2x96xf32>
    %259 = tpu.matmul %257, %258, %cst_92 {dimension_numbers = #tpu.dot_dimension_numbers<[1], [0], [0], [1], [0, 0, 1, 1], [], []>} : vector<2x32xf32>, vector<32x96xf32>, vector<2x96xf32> -> vector<2x96xf32>
    %c0_93 = arith.constant 0 : index
    %c0_94 = arith.constant 0 : index
    %260 = vector.load %arg7[%c0_93, %c0_94] : memref<1x96xf32, #tpu.memory_space<vmem>>, vector<1x96xf32>
    %261 = vector.broadcast %260 : vector<1x96xf32> to vector<2x96xf32>
    %262 = arith.addf %259, %261 : vector<2x96xf32>
    %c0_95 = arith.constant 0 : index
    %c0_96 = arith.constant 0 : index
    %263 = vector.load %arg8[%c0_95, %c0_96] : memref<1x32xf32, #tpu.memory_space<vmem>>, vector<1x32xf32>
    %c0_97 = arith.constant 0 : index
    %c0_98 = arith.constant 0 : index
    %264 = vector.load %arg6[%c0_97, %c0_98] : memref<32x96xf32, #tpu.memory_space<vmem>>, vector<32x96xf32>
    %cst_99 = arith.constant dense<0.000000e+00> : vector<2x96xf32>
    %265 = tpu.matmul %231, %264, %cst_99 {dimension_numbers = #tpu.dot_dimension_numbers<[1], [0], [0], [1], [0, 0, 1, 1], [], []>} : vector<2x32xf32>, vector<32x96xf32>, vector<2x96xf32> -> vector<2x96xf32>
    %266 = vector.extract_strided_slice %262 {offsets = [0, 0], sizes = [2, 64], strides = [1, 1]} : vector<2x96xf32> to vector<2x64xf32>
    %267 = vector.extract_strided_slice %265 {offsets = [0, 0], sizes = [2, 64], strides = [1, 1]} : vector<2x96xf32> to vector<2x64xf32>
    %268 = arith.addf %266, %267 : vector<2x64xf32>
    %269 = arith.negf %268 : vector<2x64xf32>
    %270 = math.exp %269 : vector<2x64xf32>
    %cst_100 = arith.constant 1.000000e+00 : f32
    %271 = vector.broadcast %cst_100 : f32 to vector<2x64xf32>
    %272 = arith.addf %271, %270 : vector<2x64xf32>
    %273 = arith.divf %271, %272 : vector<2x64xf32>
    %274 = vector.extract_strided_slice %273 {offsets = [0, 0], sizes = [2, 32], strides = [1, 1]} : vector<2x64xf32> to vector<2x32xf32>
    %275 = vector.extract_strided_slice %273 {offsets = [0, 32], sizes = [2, 32], strides = [1, 1]} : vector<2x64xf32> to vector<2x32xf32>
    %276 = vector.extract_strided_slice %262 {offsets = [0, 64], sizes = [2, 32], strides = [1, 1]} : vector<2x96xf32> to vector<2x32xf32>
    %277 = vector.extract_strided_slice %265 {offsets = [0, 64], sizes = [2, 32], strides = [1, 1]} : vector<2x96xf32> to vector<2x32xf32>
    %278 = vector.broadcast %263 : vector<1x32xf32> to vector<2x32xf32>
    %279 = arith.addf %277, %278 : vector<2x32xf32>
    %280 = arith.mulf %274, %279 : vector<2x32xf32>
    %281 = arith.addf %276, %280 : vector<2x32xf32>
    %282 = math.tanh %281 : vector<2x32xf32>
    %cst_101 = arith.constant 1.000000e+00 : f32
    %283 = vector.broadcast %cst_101 : f32 to vector<2x32xf32>
    %284 = arith.subf %283, %275 : vector<2x32xf32>
    %285 = arith.mulf %284, %282 : vector<2x32xf32>
    %286 = arith.mulf %275, %231 : vector<2x32xf32>
    %287 = arith.addf %285, %286 : vector<2x32xf32>
    %288 = vector.extract_strided_slice %5 {offsets = [4, 0], sizes = [2, 96], strides = [1, 1]} : vector<16x96xf32> to vector<2x96xf32>
    %c0_102 = arith.constant 0 : index
    %c0_103 = arith.constant 0 : index
    %289 = vector.load %arg4[%c0_102, %c0_103] : memref<1x32xf32, #tpu.memory_space<vmem>>, vector<1x32xf32>
    %c0_104 = arith.constant 0 : index
    %c0_105 = arith.constant 0 : index
    %290 = vector.load %arg2[%c0_104, %c0_105] : memref<32x96xf32, #tpu.memory_space<vmem>>, vector<32x96xf32>
    %cst_106 = arith.constant dense<0.000000e+00> : vector<2x96xf32>
    %291 = tpu.matmul %257, %290, %cst_106 {dimension_numbers = #tpu.dot_dimension_numbers<[1], [0], [0], [1], [0, 0, 1, 1], [], []>} : vector<2x32xf32>, vector<32x96xf32>, vector<2x96xf32> -> vector<2x96xf32>
    %292 = vector.extract_strided_slice %288 {offsets = [0, 0], sizes = [2, 64], strides = [1, 1]} : vector<2x96xf32> to vector<2x64xf32>
    %293 = vector.extract_strided_slice %291 {offsets = [0, 0], sizes = [2, 64], strides = [1, 1]} : vector<2x96xf32> to vector<2x64xf32>
    %294 = arith.addf %292, %293 : vector<2x64xf32>
    %295 = arith.negf %294 : vector<2x64xf32>
    %296 = math.exp %295 : vector<2x64xf32>
    %cst_107 = arith.constant 1.000000e+00 : f32
    %297 = vector.broadcast %cst_107 : f32 to vector<2x64xf32>
    %298 = arith.addf %297, %296 : vector<2x64xf32>
    %299 = arith.divf %297, %298 : vector<2x64xf32>
    %300 = vector.extract_strided_slice %299 {offsets = [0, 0], sizes = [2, 32], strides = [1, 1]} : vector<2x64xf32> to vector<2x32xf32>
    %301 = vector.extract_strided_slice %299 {offsets = [0, 32], sizes = [2, 32], strides = [1, 1]} : vector<2x64xf32> to vector<2x32xf32>
    %302 = vector.extract_strided_slice %288 {offsets = [0, 64], sizes = [2, 32], strides = [1, 1]} : vector<2x96xf32> to vector<2x32xf32>
    %303 = vector.extract_strided_slice %291 {offsets = [0, 64], sizes = [2, 32], strides = [1, 1]} : vector<2x96xf32> to vector<2x32xf32>
    %304 = vector.broadcast %289 : vector<1x32xf32> to vector<2x32xf32>
    %305 = arith.addf %303, %304 : vector<2x32xf32>
    %306 = arith.mulf %300, %305 : vector<2x32xf32>
    %307 = arith.addf %302, %306 : vector<2x32xf32>
    %308 = math.tanh %307 : vector<2x32xf32>
    %cst_108 = arith.constant 1.000000e+00 : f32
    %309 = vector.broadcast %cst_108 : f32 to vector<2x32xf32>
    %310 = arith.subf %309, %301 : vector<2x32xf32>
    %311 = arith.mulf %310, %308 : vector<2x32xf32>
    %312 = arith.mulf %301, %257 : vector<2x32xf32>
    %313 = arith.addf %311, %312 : vector<2x32xf32>
    %c0_109 = arith.constant 0 : index
    %c0_110 = arith.constant 0 : index
    %314 = vector.load %arg5[%c0_109, %c0_110] : memref<32x96xf32, #tpu.memory_space<vmem>>, vector<32x96xf32>
    %cst_111 = arith.constant dense<0.000000e+00> : vector<2x96xf32>
    %315 = tpu.matmul %313, %314, %cst_111 {dimension_numbers = #tpu.dot_dimension_numbers<[1], [0], [0], [1], [0, 0, 1, 1], [], []>} : vector<2x32xf32>, vector<32x96xf32>, vector<2x96xf32> -> vector<2x96xf32>
    %c0_112 = arith.constant 0 : index
    %c0_113 = arith.constant 0 : index
    %316 = vector.load %arg7[%c0_112, %c0_113] : memref<1x96xf32, #tpu.memory_space<vmem>>, vector<1x96xf32>
    %317 = vector.broadcast %316 : vector<1x96xf32> to vector<2x96xf32>
    %318 = arith.addf %315, %317 : vector<2x96xf32>
    %c0_114 = arith.constant 0 : index
    %c0_115 = arith.constant 0 : index
    %319 = vector.load %arg8[%c0_114, %c0_115] : memref<1x32xf32, #tpu.memory_space<vmem>>, vector<1x32xf32>
    %c0_116 = arith.constant 0 : index
    %c0_117 = arith.constant 0 : index
    %320 = vector.load %arg6[%c0_116, %c0_117] : memref<32x96xf32, #tpu.memory_space<vmem>>, vector<32x96xf32>
    %cst_118 = arith.constant dense<0.000000e+00> : vector<2x96xf32>
    %321 = tpu.matmul %287, %320, %cst_118 {dimension_numbers = #tpu.dot_dimension_numbers<[1], [0], [0], [1], [0, 0, 1, 1], [], []>} : vector<2x32xf32>, vector<32x96xf32>, vector<2x96xf32> -> vector<2x96xf32>
    %322 = vector.extract_strided_slice %318 {offsets = [0, 0], sizes = [2, 64], strides = [1, 1]} : vector<2x96xf32> to vector<2x64xf32>
    %323 = vector.extract_strided_slice %321 {offsets = [0, 0], sizes = [2, 64], strides = [1, 1]} : vector<2x96xf32> to vector<2x64xf32>
    %324 = arith.addf %322, %323 : vector<2x64xf32>
    %325 = arith.negf %324 : vector<2x64xf32>
    %326 = math.exp %325 : vector<2x64xf32>
    %cst_119 = arith.constant 1.000000e+00 : f32
    %327 = vector.broadcast %cst_119 : f32 to vector<2x64xf32>
    %328 = arith.addf %327, %326 : vector<2x64xf32>
    %329 = arith.divf %327, %328 : vector<2x64xf32>
    %330 = vector.extract_strided_slice %329 {offsets = [0, 0], sizes = [2, 32], strides = [1, 1]} : vector<2x64xf32> to vector<2x32xf32>
    %331 = vector.extract_strided_slice %329 {offsets = [0, 32], sizes = [2, 32], strides = [1, 1]} : vector<2x64xf32> to vector<2x32xf32>
    %332 = vector.extract_strided_slice %318 {offsets = [0, 64], sizes = [2, 32], strides = [1, 1]} : vector<2x96xf32> to vector<2x32xf32>
    %333 = vector.extract_strided_slice %321 {offsets = [0, 64], sizes = [2, 32], strides = [1, 1]} : vector<2x96xf32> to vector<2x32xf32>
    %334 = vector.broadcast %319 : vector<1x32xf32> to vector<2x32xf32>
    %335 = arith.addf %333, %334 : vector<2x32xf32>
    %336 = arith.mulf %330, %335 : vector<2x32xf32>
    %337 = arith.addf %332, %336 : vector<2x32xf32>
    %338 = math.tanh %337 : vector<2x32xf32>
    %cst_120 = arith.constant 1.000000e+00 : f32
    %339 = vector.broadcast %cst_120 : f32 to vector<2x32xf32>
    %340 = arith.subf %339, %331 : vector<2x32xf32>
    %341 = arith.mulf %340, %338 : vector<2x32xf32>
    %342 = arith.mulf %331, %287 : vector<2x32xf32>
    %343 = arith.addf %341, %342 : vector<2x32xf32>
    %344 = vector.extract_strided_slice %5 {offsets = [2, 0], sizes = [2, 96], strides = [1, 1]} : vector<16x96xf32> to vector<2x96xf32>
    %c0_121 = arith.constant 0 : index
    %c0_122 = arith.constant 0 : index
    %345 = vector.load %arg4[%c0_121, %c0_122] : memref<1x32xf32, #tpu.memory_space<vmem>>, vector<1x32xf32>
    %c0_123 = arith.constant 0 : index
    %c0_124 = arith.constant 0 : index
    %346 = vector.load %arg2[%c0_123, %c0_124] : memref<32x96xf32, #tpu.memory_space<vmem>>, vector<32x96xf32>
    %cst_125 = arith.constant dense<0.000000e+00> : vector<2x96xf32>
    %347 = tpu.matmul %313, %346, %cst_125 {dimension_numbers = #tpu.dot_dimension_numbers<[1], [0], [0], [1], [0, 0, 1, 1], [], []>} : vector<2x32xf32>, vector<32x96xf32>, vector<2x96xf32> -> vector<2x96xf32>
    %348 = vector.extract_strided_slice %344 {offsets = [0, 0], sizes = [2, 64], strides = [1, 1]} : vector<2x96xf32> to vector<2x64xf32>
    %349 = vector.extract_strided_slice %347 {offsets = [0, 0], sizes = [2, 64], strides = [1, 1]} : vector<2x96xf32> to vector<2x64xf32>
    %350 = arith.addf %348, %349 : vector<2x64xf32>
    %351 = arith.negf %350 : vector<2x64xf32>
    %352 = math.exp %351 : vector<2x64xf32>
    %cst_126 = arith.constant 1.000000e+00 : f32
    %353 = vector.broadcast %cst_126 : f32 to vector<2x64xf32>
    %354 = arith.addf %353, %352 : vector<2x64xf32>
    %355 = arith.divf %353, %354 : vector<2x64xf32>
    %356 = vector.extract_strided_slice %355 {offsets = [0, 0], sizes = [2, 32], strides = [1, 1]} : vector<2x64xf32> to vector<2x32xf32>
    %357 = vector.extract_strided_slice %355 {offsets = [0, 32], sizes = [2, 32], strides = [1, 1]} : vector<2x64xf32> to vector<2x32xf32>
    %358 = vector.extract_strided_slice %344 {offsets = [0, 64], sizes = [2, 32], strides = [1, 1]} : vector<2x96xf32> to vector<2x32xf32>
    %359 = vector.extract_strided_slice %347 {offsets = [0, 64], sizes = [2, 32], strides = [1, 1]} : vector<2x96xf32> to vector<2x32xf32>
    %360 = vector.broadcast %345 : vector<1x32xf32> to vector<2x32xf32>
    %361 = arith.addf %359, %360 : vector<2x32xf32>
    %362 = arith.mulf %356, %361 : vector<2x32xf32>
    %363 = arith.addf %358, %362 : vector<2x32xf32>
    %364 = math.tanh %363 : vector<2x32xf32>
    %cst_127 = arith.constant 1.000000e+00 : f32
    %365 = vector.broadcast %cst_127 : f32 to vector<2x32xf32>
    %366 = arith.subf %365, %357 : vector<2x32xf32>
    %367 = arith.mulf %366, %364 : vector<2x32xf32>
    %368 = arith.mulf %357, %313 : vector<2x32xf32>
    %369 = arith.addf %367, %368 : vector<2x32xf32>
    %c0_128 = arith.constant 0 : index
    %c0_129 = arith.constant 0 : index
    %370 = vector.load %arg5[%c0_128, %c0_129] : memref<32x96xf32, #tpu.memory_space<vmem>>, vector<32x96xf32>
    %cst_130 = arith.constant dense<0.000000e+00> : vector<2x96xf32>
    %371 = tpu.matmul %369, %370, %cst_130 {dimension_numbers = #tpu.dot_dimension_numbers<[1], [0], [0], [1], [0, 0, 1, 1], [], []>} : vector<2x32xf32>, vector<32x96xf32>, vector<2x96xf32> -> vector<2x96xf32>
    %c0_131 = arith.constant 0 : index
    %c0_132 = arith.constant 0 : index
    %372 = vector.load %arg7[%c0_131, %c0_132] : memref<1x96xf32, #tpu.memory_space<vmem>>, vector<1x96xf32>
    %373 = vector.broadcast %372 : vector<1x96xf32> to vector<2x96xf32>
    %374 = arith.addf %371, %373 : vector<2x96xf32>
    %c0_133 = arith.constant 0 : index
    %c0_134 = arith.constant 0 : index
    %375 = vector.load %arg8[%c0_133, %c0_134] : memref<1x32xf32, #tpu.memory_space<vmem>>, vector<1x32xf32>
    %c0_135 = arith.constant 0 : index
    %c0_136 = arith.constant 0 : index
    %376 = vector.load %arg6[%c0_135, %c0_136] : memref<32x96xf32, #tpu.memory_space<vmem>>, vector<32x96xf32>
    %cst_137 = arith.constant dense<0.000000e+00> : vector<2x96xf32>
    %377 = tpu.matmul %343, %376, %cst_137 {dimension_numbers = #tpu.dot_dimension_numbers<[1], [0], [0], [1], [0, 0, 1, 1], [], []>} : vector<2x32xf32>, vector<32x96xf32>, vector<2x96xf32> -> vector<2x96xf32>
    %378 = vector.extract_strided_slice %374 {offsets = [0, 0], sizes = [2, 64], strides = [1, 1]} : vector<2x96xf32> to vector<2x64xf32>
    %379 = vector.extract_strided_slice %377 {offsets = [0, 0], sizes = [2, 64], strides = [1, 1]} : vector<2x96xf32> to vector<2x64xf32>
    %380 = arith.addf %378, %379 : vector<2x64xf32>
    %381 = arith.negf %380 : vector<2x64xf32>
    %382 = math.exp %381 : vector<2x64xf32>
    %cst_138 = arith.constant 1.000000e+00 : f32
    %383 = vector.broadcast %cst_138 : f32 to vector<2x64xf32>
    %384 = arith.addf %383, %382 : vector<2x64xf32>
    %385 = arith.divf %383, %384 : vector<2x64xf32>
    %386 = vector.extract_strided_slice %385 {offsets = [0, 0], sizes = [2, 32], strides = [1, 1]} : vector<2x64xf32> to vector<2x32xf32>
    %387 = vector.extract_strided_slice %385 {offsets = [0, 32], sizes = [2, 32], strides = [1, 1]} : vector<2x64xf32> to vector<2x32xf32>
    %388 = vector.extract_strided_slice %374 {offsets = [0, 64], sizes = [2, 32], strides = [1, 1]} : vector<2x96xf32> to vector<2x32xf32>
    %389 = vector.extract_strided_slice %377 {offsets = [0, 64], sizes = [2, 32], strides = [1, 1]} : vector<2x96xf32> to vector<2x32xf32>
    %390 = vector.broadcast %375 : vector<1x32xf32> to vector<2x32xf32>
    %391 = arith.addf %389, %390 : vector<2x32xf32>
    %392 = arith.mulf %386, %391 : vector<2x32xf32>
    %393 = arith.addf %388, %392 : vector<2x32xf32>
    %394 = math.tanh %393 : vector<2x32xf32>
    %cst_139 = arith.constant 1.000000e+00 : f32
    %395 = vector.broadcast %cst_139 : f32 to vector<2x32xf32>
    %396 = arith.subf %395, %387 : vector<2x32xf32>
    %397 = arith.mulf %396, %394 : vector<2x32xf32>
    %398 = arith.mulf %387, %343 : vector<2x32xf32>
    %399 = arith.addf %397, %398 : vector<2x32xf32>
    %400 = vector.extract_strided_slice %5 {offsets = [0, 0], sizes = [2, 96], strides = [1, 1]} : vector<16x96xf32> to vector<2x96xf32>
    %c0_140 = arith.constant 0 : index
    %c0_141 = arith.constant 0 : index
    %401 = vector.load %arg4[%c0_140, %c0_141] : memref<1x32xf32, #tpu.memory_space<vmem>>, vector<1x32xf32>
    %c0_142 = arith.constant 0 : index
    %c0_143 = arith.constant 0 : index
    %402 = vector.load %arg2[%c0_142, %c0_143] : memref<32x96xf32, #tpu.memory_space<vmem>>, vector<32x96xf32>
    %cst_144 = arith.constant dense<0.000000e+00> : vector<2x96xf32>
    %403 = tpu.matmul %369, %402, %cst_144 {dimension_numbers = #tpu.dot_dimension_numbers<[1], [0], [0], [1], [0, 0, 1, 1], [], []>} : vector<2x32xf32>, vector<32x96xf32>, vector<2x96xf32> -> vector<2x96xf32>
    %404 = vector.extract_strided_slice %400 {offsets = [0, 0], sizes = [2, 64], strides = [1, 1]} : vector<2x96xf32> to vector<2x64xf32>
    %405 = vector.extract_strided_slice %403 {offsets = [0, 0], sizes = [2, 64], strides = [1, 1]} : vector<2x96xf32> to vector<2x64xf32>
    %406 = arith.addf %404, %405 : vector<2x64xf32>
    %407 = arith.negf %406 : vector<2x64xf32>
    %408 = math.exp %407 : vector<2x64xf32>
    %cst_145 = arith.constant 1.000000e+00 : f32
    %409 = vector.broadcast %cst_145 : f32 to vector<2x64xf32>
    %410 = arith.addf %409, %408 : vector<2x64xf32>
    %411 = arith.divf %409, %410 : vector<2x64xf32>
    %412 = vector.extract_strided_slice %411 {offsets = [0, 0], sizes = [2, 32], strides = [1, 1]} : vector<2x64xf32> to vector<2x32xf32>
    %413 = vector.extract_strided_slice %411 {offsets = [0, 32], sizes = [2, 32], strides = [1, 1]} : vector<2x64xf32> to vector<2x32xf32>
    %414 = vector.extract_strided_slice %400 {offsets = [0, 64], sizes = [2, 32], strides = [1, 1]} : vector<2x96xf32> to vector<2x32xf32>
    %415 = vector.extract_strided_slice %403 {offsets = [0, 64], sizes = [2, 32], strides = [1, 1]} : vector<2x96xf32> to vector<2x32xf32>
    %416 = vector.broadcast %401 : vector<1x32xf32> to vector<2x32xf32>
    %417 = arith.addf %415, %416 : vector<2x32xf32>
    %418 = arith.mulf %412, %417 : vector<2x32xf32>
    %419 = arith.addf %414, %418 : vector<2x32xf32>
    %420 = math.tanh %419 : vector<2x32xf32>
    %cst_146 = arith.constant 1.000000e+00 : f32
    %421 = vector.broadcast %cst_146 : f32 to vector<2x32xf32>
    %422 = arith.subf %421, %413 : vector<2x32xf32>
    %423 = arith.mulf %422, %420 : vector<2x32xf32>
    %424 = arith.mulf %413, %369 : vector<2x32xf32>
    %425 = arith.addf %423, %424 : vector<2x32xf32>
    %c0_147 = arith.constant 0 : index
    %c0_148 = arith.constant 0 : index
    %426 = vector.load %arg5[%c0_147, %c0_148] : memref<32x96xf32, #tpu.memory_space<vmem>>, vector<32x96xf32>
    %cst_149 = arith.constant dense<0.000000e+00> : vector<2x96xf32>
    %427 = tpu.matmul %425, %426, %cst_149 {dimension_numbers = #tpu.dot_dimension_numbers<[1], [0], [0], [1], [0, 0, 1, 1], [], []>} : vector<2x32xf32>, vector<32x96xf32>, vector<2x96xf32> -> vector<2x96xf32>
    %c0_150 = arith.constant 0 : index
    %c0_151 = arith.constant 0 : index
    %428 = vector.load %arg7[%c0_150, %c0_151] : memref<1x96xf32, #tpu.memory_space<vmem>>, vector<1x96xf32>
    %429 = vector.broadcast %428 : vector<1x96xf32> to vector<2x96xf32>
    %430 = arith.addf %427, %429 : vector<2x96xf32>
    %c0_152 = arith.constant 0 : index
    %c0_153 = arith.constant 0 : index
    %431 = vector.load %arg8[%c0_152, %c0_153] : memref<1x32xf32, #tpu.memory_space<vmem>>, vector<1x32xf32>
    %c0_154 = arith.constant 0 : index
    %c0_155 = arith.constant 0 : index
    %432 = vector.load %arg6[%c0_154, %c0_155] : memref<32x96xf32, #tpu.memory_space<vmem>>, vector<32x96xf32>
    %cst_156 = arith.constant dense<0.000000e+00> : vector<2x96xf32>
    %433 = tpu.matmul %399, %432, %cst_156 {dimension_numbers = #tpu.dot_dimension_numbers<[1], [0], [0], [1], [0, 0, 1, 1], [], []>} : vector<2x32xf32>, vector<32x96xf32>, vector<2x96xf32> -> vector<2x96xf32>
    %434 = vector.extract_strided_slice %430 {offsets = [0, 0], sizes = [2, 64], strides = [1, 1]} : vector<2x96xf32> to vector<2x64xf32>
    %435 = vector.extract_strided_slice %433 {offsets = [0, 0], sizes = [2, 64], strides = [1, 1]} : vector<2x96xf32> to vector<2x64xf32>
    %436 = arith.addf %434, %435 : vector<2x64xf32>
    %437 = arith.negf %436 : vector<2x64xf32>
    %438 = math.exp %437 : vector<2x64xf32>
    %cst_157 = arith.constant 1.000000e+00 : f32
    %439 = vector.broadcast %cst_157 : f32 to vector<2x64xf32>
    %440 = arith.addf %439, %438 : vector<2x64xf32>
    %441 = arith.divf %439, %440 : vector<2x64xf32>
    %442 = vector.extract_strided_slice %441 {offsets = [0, 0], sizes = [2, 32], strides = [1, 1]} : vector<2x64xf32> to vector<2x32xf32>
    %443 = vector.extract_strided_slice %441 {offsets = [0, 32], sizes = [2, 32], strides = [1, 1]} : vector<2x64xf32> to vector<2x32xf32>
    %444 = vector.extract_strided_slice %430 {offsets = [0, 64], sizes = [2, 32], strides = [1, 1]} : vector<2x96xf32> to vector<2x32xf32>
    %445 = vector.extract_strided_slice %433 {offsets = [0, 64], sizes = [2, 32], strides = [1, 1]} : vector<2x96xf32> to vector<2x32xf32>
    %446 = vector.broadcast %431 : vector<1x32xf32> to vector<2x32xf32>
    %447 = arith.addf %445, %446 : vector<2x32xf32>
    %448 = arith.mulf %442, %447 : vector<2x32xf32>
    %449 = arith.addf %444, %448 : vector<2x32xf32>
    %450 = math.tanh %449 : vector<2x32xf32>
    %cst_158 = arith.constant 1.000000e+00 : f32
    %451 = vector.broadcast %cst_158 : f32 to vector<2x32xf32>
    %452 = arith.subf %451, %443 : vector<2x32xf32>
    %453 = arith.mulf %452, %450 : vector<2x32xf32>
    %454 = arith.mulf %443, %399 : vector<2x32xf32>
    %455 = arith.addf %453, %454 : vector<2x32xf32>
    %c0_159 = arith.constant 0 : index
    %c0_160 = arith.constant 0 : index
    %456 = vector.load %arg9[%c0_159, %c0_160] : memref<32x2xf32, #tpu.memory_space<vmem>>, vector<32x2xf32>
    %cst_161 = arith.constant dense<0.000000e+00> : vector<2x2xf32>
    %457 = tpu.matmul %455, %456, %cst_161 {dimension_numbers = #tpu.dot_dimension_numbers<[1], [0], [0], [1], [0, 0, 1, 1], [], []>} : vector<2x32xf32>, vector<32x2xf32>, vector<2x2xf32> -> vector<2x2xf32>
    %c0_162 = arith.constant 0 : index
    %c0_163 = arith.constant 0 : index
    %458 = vector.load %arg10[%c0_162, %c0_163] : memref<1x2xf32, #tpu.memory_space<vmem>>, vector<1x2xf32>
    %459 = vector.broadcast %458 : vector<1x2xf32> to vector<2x2xf32>
    %460 = arith.addf %457, %459 : vector<2x2xf32>
    %c0_164 = arith.constant 0 : index
    %c0_165 = arith.constant 0 : index
    %461 = vector.load %arg11[%c0_164, %c0_165] : memref<2x2xf32, #tpu.memory_space<vmem>>, vector<2x2xf32>
    tpu.vector_store %arg11[%c0_164, %c0_165], %460 {strides = array<i32>} : memref<2x2xf32, #tpu.memory_space<vmem>>, vector<2x2xf32>,
    return
  }
}

module attributes {stable_mosaic.version = 11 : i64} {
  func.func @_laplace_ilt_kernel(%arg0: memref<12x71xf32, #tpu.memory_space<vmem>>, %arg1: memref<12x99xf32, #tpu.memory_space<vmem>>, %arg2: memref<12x99xf32, #tpu.memory_space<vmem>>, %arg3: memref<99x3xf32, #tpu.memory_space<vmem>>, %arg4: memref<1x198xf32, #tpu.memory_space<vmem>>, %arg5: memref<71x64xf32, #tpu.memory_space<vmem>>, %arg6: memref<1x64xf32, #tpu.memory_space<vmem>>, %arg7: memref<64x64xf32, #tpu.memory_space<vmem>>, %arg8: memref<1x64xf32, #tpu.memory_space<vmem>>, %arg9: memref<64x198xf32, #tpu.memory_space<vmem>>, %arg10: memref<1x198xf32, #tpu.memory_space<vmem>>, %arg11: memref<12x3xf32, #tpu.memory_space<vmem>>) attributes {dimension_semantics = [], scalar_prefetch = 0 : i64, scratch_operands = 0 : i64, tpu.core_type = #tpu.core_type<tc>} {
    %c0 = arith.constant 0 : index
    %c0_0 = arith.constant 0 : index
    %0 = vector.load %arg0[%c0, %c0_0] : memref<12x71xf32, #tpu.memory_space<vmem>>, vector<12x71xf32>
    %c0_1 = arith.constant 0 : index
    %c0_2 = arith.constant 0 : index
    %1 = vector.load %arg5[%c0_1, %c0_2] : memref<71x64xf32, #tpu.memory_space<vmem>>, vector<71x64xf32>
    %cst = arith.constant dense<0.000000e+00> : vector<12x64xf32>
    %2 = tpu.matmul %0, %1, %cst {dimension_numbers = #tpu.dot_dimension_numbers<[1], [0], [0], [1], [0, 0, 1, 1], [], []>} : vector<12x71xf32>, vector<71x64xf32>, vector<12x64xf32> -> vector<12x64xf32>
    %c0_3 = arith.constant 0 : index
    %c0_4 = arith.constant 0 : index
    %3 = vector.load %arg6[%c0_3, %c0_4] : memref<1x64xf32, #tpu.memory_space<vmem>>, vector<1x64xf32>
    %4 = vector.broadcast %3 : vector<1x64xf32> to vector<12x64xf32>
    %5 = arith.addf %2, %4 : vector<12x64xf32>
    %6 = math.tanh %5 : vector<12x64xf32>
    %c0_5 = arith.constant 0 : index
    %c0_6 = arith.constant 0 : index
    %7 = vector.load %arg7[%c0_5, %c0_6] : memref<64x64xf32, #tpu.memory_space<vmem>>, vector<64x64xf32>
    %cst_7 = arith.constant dense<0.000000e+00> : vector<12x64xf32>
    %8 = tpu.matmul %6, %7, %cst_7 {dimension_numbers = #tpu.dot_dimension_numbers<[1], [0], [0], [1], [0, 0, 1, 1], [], []>} : vector<12x64xf32>, vector<64x64xf32>, vector<12x64xf32> -> vector<12x64xf32>
    %c0_8 = arith.constant 0 : index
    %c0_9 = arith.constant 0 : index
    %9 = vector.load %arg8[%c0_8, %c0_9] : memref<1x64xf32, #tpu.memory_space<vmem>>, vector<1x64xf32>
    %10 = vector.broadcast %9 : vector<1x64xf32> to vector<12x64xf32>
    %11 = arith.addf %8, %10 : vector<12x64xf32>
    %12 = math.tanh %11 : vector<12x64xf32>
    %c0_10 = arith.constant 0 : index
    %c0_11 = arith.constant 0 : index
    %13 = vector.load %arg9[%c0_10, %c0_11] : memref<64x198xf32, #tpu.memory_space<vmem>>, vector<64x198xf32>
    %cst_12 = arith.constant dense<0.000000e+00> : vector<12x198xf32>
    %14 = tpu.matmul %12, %13, %cst_12 {dimension_numbers = #tpu.dot_dimension_numbers<[1], [0], [0], [1], [0, 0, 1, 1], [], []>} : vector<12x64xf32>, vector<64x198xf32>, vector<12x198xf32> -> vector<12x198xf32>
    %c0_13 = arith.constant 0 : index
    %c0_14 = arith.constant 0 : index
    %15 = vector.load %arg10[%c0_13, %c0_14] : memref<1x198xf32, #tpu.memory_space<vmem>>, vector<1x198xf32>
    %16 = vector.broadcast %15 : vector<1x198xf32> to vector<12x198xf32>
    %17 = arith.addf %14, %16 : vector<12x198xf32>
    %18 = math.tanh %17 : vector<12x198xf32>
    %c0_15 = arith.constant 0 : index
    %c0_16 = arith.constant 0 : index
    %19 = vector.load %arg4[%c0_15, %c0_16] : memref<1x198xf32, #tpu.memory_space<vmem>>, vector<1x198xf32>
    %20 = vector.broadcast %19 : vector<1x198xf32> to vector<12x198xf32>
    %21 = arith.mulf %18, %20 : vector<12x198xf32>
    %22 = vector.extract_strided_slice %21 {offsets = [0, 0], sizes = [12, 99], strides = [1, 1]} : vector<12x198xf32> to vector<12x99xf32>
    %23 = vector.extract_strided_slice %21 {offsets = [0, 99], sizes = [12, 99], strides = [1, 1]} : vector<12x198xf32> to vector<12x99xf32>
    %cst_17 = arith.constant 5.000000e-01 : f32
    %24 = vector.broadcast %cst_17 : f32 to vector<12x99xf32>
    %25 = arith.mulf %23, %24 : vector<12x99xf32>
    %cst_18 = arith.constant 0.785398185 : f32
    %26 = vector.broadcast %cst_18 : f32 to vector<12x99xf32>
    %27 = arith.addf %25, %26 : vector<12x99xf32>
    %28 = math.sin %27 : vector<12x99xf32>
    %29 = math.cos %27 : vector<12x99xf32>
    %30 = tpu.reciprocal %29 {approx = true} : vector<12x99xf32> -> vector<12x99xf32>
    %31 = arith.mulf %28, %30 : vector<12x99xf32>
    %32 = math.cos %22 : vector<12x99xf32>
    %33 = arith.mulf %31, %32 : vector<12x99xf32>
    %34 = math.sin %22 : vector<12x99xf32>
    %35 = arith.mulf %31, %34 : vector<12x99xf32>
    %c0_19 = arith.constant 0 : index
    %c0_20 = arith.constant 0 : index
    %36 = vector.load %arg1[%c0_19, %c0_20] : memref<12x99xf32, #tpu.memory_space<vmem>>, vector<12x99xf32>
    %37 = arith.mulf %33, %36 : vector<12x99xf32>
    %c0_21 = arith.constant 0 : index
    %c0_22 = arith.constant 0 : index
    %38 = vector.load %arg2[%c0_21, %c0_22] : memref<12x99xf32, #tpu.memory_space<vmem>>, vector<12x99xf32>
    %39 = arith.mulf %35, %38 : vector<12x99xf32>
    %40 = arith.subf %37, %39 : vector<12x99xf32>
    %c0_23 = arith.constant 0 : index
    %c0_24 = arith.constant 0 : index
    %41 = vector.load %arg3[%c0_23, %c0_24] : memref<99x3xf32, #tpu.memory_space<vmem>>, vector<99x3xf32>
    %cst_25 = arith.constant dense<0.000000e+00> : vector<12x3xf32>
    %42 = tpu.matmul %40, %41, %cst_25 {dimension_numbers = #tpu.dot_dimension_numbers<[1], [0], [0], [1], [0, 0, 1, 1], [], []>} : vector<12x99xf32>, vector<99x3xf32>, vector<12x3xf32> -> vector<12x3xf32>
    %c0_26 = arith.constant 0 : index
    %c0_27 = arith.constant 0 : index
    %43 = vector.load %arg11[%c0_26, %c0_27] : memref<12x3xf32, #tpu.memory_space<vmem>>, vector<12x3xf32>
    tpu.vector_store %arg11[%c0_26, %c0_27], %42 {strides = array<i32>} : memref<12x3xf32, #tpu.memory_space<vmem>>, vector<12x3xf32>,
    return
  }
}

</mosaic_0001>

<bundles_post_ra>
// kernel: mul.0
= control target key start
LH: loop header
LB: loop body
LE: loop exit
PB: predicated region body
PF: predicated region fallthrough
CT: control target
= control target key end

     0   :  { %s34_s0 = inlined_call_operand.vmem [shape: f32[6], index: 0, kind: input, shape index: {}, may-alias: {0,1}]   ;;  %s35_s1 = inlined_call_operand.vmem [shape: f32[6], index: 1, kind: input, shape index: {}, may-alias: {0,1}]   ;;  %s36_s2 = inlined_call_operand.vmem [shape: f32[6], index: 2, kind: output, shape index: {}]  }
   0x1   :  { %v3_v0 = vld [vmem:[%s34_s0] sm:$0x1] }
   0x2   :  { %v4_v1 = vld [vmem:[%s35_s1] sm:$0x1] }
   0x3   :  { %v7_v2 = vmul.f32 %v4_v1, %v3_v0 }
   0x5   :  { %9 = vst [vmem:[%s36_s2] sm:$0x1] %v7_v2 }

// kernel: tile.11
= control target key start
LH: loop header
LB: loop body
LE: loop exit
PB: predicated region body
PF: predicated region fallthrough
CT: control target
= control target key end

     0   :  { %vm62_vm0 = vcmask 1047556   ;;  %vm64_vm1 = vcmask 269312   ;;  %s132_s30 = smov 33   ;;  %vm79_vm2 = vcmask 810512   ;;  %vm96_vm3 = vcmask 539912   ;;  %s199_s0 = inlined_call_operand.vmem [shape: f32[12,3,33], index: 0, kind: input, shape index: {}]   ;;  %s200_s1 = inlined_call_operand.vmem [shape: f32[12,99], index: 1, kind: output, shape index: {}]  }
   0x1   :  { %v119_v0 = vld [vmem:[%s199_s0 + $0x1c] sm:$0xf]  ;;  %v120_v1 = vld [vmem:[%s199_s0 + $0x18] sm:$0xf]  ;;  %v121_v2 = vld [vmem:[%s199_s0 + $0x14] sm:$0xf] }
   0x2   :  { %28 = vst [vmem:[#allocation0 + $0x38] sm:$0xf] %v119_v0  ;;  %33 = vst [vmem:[#allocation0 + $0x30] sm:$0xf] %v120_v1  ;;  %v122_v3 = vld [vmem:[%s199_s0 + $0x10] sm:$0xf] }
   0x3   :  { %38 = vst [vmem:[#allocation0 + $0x28] sm:$0xf] %v121_v2  ;;  %v123_v4 = vld [vmem:[%s199_s0 + $0xc] sm:$0xf]  ;;  %v124_v5 = vld [vmem:[%s199_s0 + $0x8] sm:$0xf] }
   0x4   :  { %43 = vst [vmem:[#allocation0 + $0x20] sm:$0xf] %v122_v3  ;;  %48 = vst [vmem:[#allocation0 + $0x18] sm:$0xf] %v123_v4  ;;  %v125_v6 = vld [vmem:[%s199_s0 + $0x4] sm:$0xf] }
   0x5   :  { %53 = vst [vmem:[#allocation0 + $0x10] sm:$0xf] %v124_v5  ;;  %v58_v7 = vld [vmem:[%s199_s0] sm:$0xf]  ;;  %57 = vst [vmem:[#allocation0 + $0x8] sm:$0xf] %v125_v6 }
   0x6   :  { %59 = vst [vmem:[#allocation0] sm:$0xf] %v58_v7  ;;  %v115_v8 = vld [vmem:[%s199_s0 + $0x2c] sm:$0xf]  ;;  %v116_v9 = vld [vmem:[%s199_s0 + $0x28] sm:$0xf] }
   0x7   :  { %8 = vst [vmem:[#allocation0 + $0x58] sm:$0xf] %v115_v8  ;;  %13 = vst [vmem:[#allocation0 + $0x50] sm:$0xf] %v116_v9  ;;  %v117_v10 = vld [vmem:[%s199_s0 + $0x24] sm:$0xf] }
   0x8   :  { %v118_v11 = vld [vmem:[%s199_s0 + $0x20] sm:$0xf]  ;;  %18 = vst [vmem:[#allocation0 + $0x48] sm:$0xf] %v117_v10  ;;  %s131_s0 = smov 66  }
   0x9   :  { %23 = vst [vmem:[#allocation0 + $0x40] sm:$0xf] %v118_v11 }
   0xb   :  { %v74_v12 = vld [vmem:[#allocation0 + $0x2] ss:$8 sm:$0xf0]   ;;  %v91_v13 = vld [vmem:[#allocation0 + $0x1] ss:$8 sm:$0xf0]  }
   0xc   :  { %v61_v18 = vld [vmem:[#allocation0] ss:$8 sm:$0xf0]  }
   0xd   :  { %v72_v14 = vld [vmem:[#allocation0 + $0x2] ss:$8 sm:$0xf]   ;;  %v60_v15 = vld [vmem:[#allocation0] ss:$8 sm:$0xf]  }
   0xe   :  { %v76_v16 = vsel %vm62_vm0, %v74_v12, %v72_v14  ;;  %v89_v17 = vld [vmem:[#allocation0 + $0x1] ss:$8 sm:$0xf]   ;;  %v63_v20 = vsel %vm62_vm0, %v61_v18, %v60_v15 }
   0xf   :  { %77 = vrot.lane.b32.xlu0 %v76_v16, %s131_s0  ;;  %v93_v19 = vsel %vm62_vm0, %v91_v13, %v89_v17  ;;  %65 = vst.msk [vmem:[%s200_s1] sm:$0xff] %vm64_vm1, %v63_v20  }
  0x10   :  { %94 = vrot.lane.b32.xlu1 %v93_v19, %s132_s30  ;;  %v82_v21 = vld [vmem:[#allocation0 + $0x42] ss:$8 sm:$0xf]   ;;  %v67_v22 = vld [vmem:[#allocation0 + $0x40] ss:$8 sm:$0xf]  }
  0x11   :  { %v99_v23 = vld [vmem:[#allocation0 + $0x41] ss:$8 sm:$0xf]   ;;  %126 = vst.msk [vmem:[%s200_s1 + $0x8] sm:$0xf] %vm64_vm1, %v67_v22  }
  0x13   :  { %83 = vrot.lane.b32.xlu0 %v82_v21, %s131_s0 }
  0x14   :  { %100 = vrot.lane.b32.xlu1 %v99_v23, %s132_s30 }
  0x81   :  { %v78_v24 = vpop.permute.xlu0 %77  }
  0x82   :  { %80 = vst.msk [vmem:[%s200_s1] sm:$0xff] %vm79_vm2, %v78_v24   ;;  %v95_v25 = vpop.permute.xlu1 %94  }
  0x83   :  { %97 = vst.msk [vmem:[%s200_s1] sm:$0xff] %vm96_vm3, %v95_v25  }
  0x85   :  { %v84_v26 = vpop.permute.xlu0 %83  }
  0x86   :  { %127 = vst.msk [vmem:[%s200_s1 + $0x8] sm:$0xf] %vm79_vm2, %v84_v26   ;;  %v101_v27 = vpop.permute.xlu1 %100  }
  0x87   :  { %128 = vst.msk [vmem:[%s200_s1 + $0x8] sm:$0xf] %vm96_vm3, %v101_v27  }

// kernel: neural_laplace_forward.3
= control target key start
LH: loop header
LB: loop body
LE: loop exit
PB: predicated region body
PF: predicated region fallthrough
CT: control target
= control target key end

     0   :  { %vm56_vm0 = vcmask 580608   ;;  %vm63_vm1 = vcmask 1046528   ;;  %vm159_vm2 = vcmask 523264   ;;  %v2126_v53 = vmov 0.0   ;;  %s2926_s5 = inlined_call_operand.vmem [shape: f32[71,64], index: 5, kind: input, shape index: {}]   ;;  %s2927_s0 = inlined_call_operand.vmem [shape: f32[12,71], index: 0, kind: input, shape index: {}]   ;;  %s2928_s7 = inlined_call_operand.vmem [shape: f32[64,64], index: 7, kind: input, shape index: {}]   ;;  %s2929_s9 = inlined_call_operand.vmem [shape: f32[64,198], index: 9, kind: input, shape index: {}]   ;;  %s2930_s6 = inlined_call_operand.vmem [shape: f32[1,64], index: 6, kind: input, shape index: {}]   ;;  %s2931_s8 = inlined_call_operand.vmem [shape: f32[1,64], index: 8, kind: input, shape index: {}]   ;;  %s2932_s1 = inlined_call_operand.vmem [shape: f32[12,99], index: 1, kind: input, shape index: {}]   ;;  %s2933_s2 = inlined_call_operand.vmem [shape: f32[12,99], index: 2, kind: input, shape index: {}]   ;;  %s2934_s10 = inlined_call_operand.vmem [shape: f32[1,198], index: 10, kind: input, shape index: {}]   ;;  %s2935_s4 = inlined_call_operand.vmem [shape: f32[1,198], index: 4, kind: input, shape index: {}]   ;;  %s2936_s3 = inlined_call_operand.vmem [shape: f32[99,3], index: 3, kind: input, shape index: {}]   ;;  %s2937_s11 = inlined_call_operand.vmem [shape: f32[12,3], index: 11, kind: output, shape index: {}]  }
   0x1   :  { %v40_v0 = vld [vmem:[%s2926_s5] sm:$0xff]  ;;  %v41_v1 = vld [vmem:[%s2926_s5 + $0x8] sm:$0xff]  ;;  %v42_v2 = vld [vmem:[%s2926_s5 + $0x10] sm:$0xff] }
   0x2   :  { %v1973_v3 = vpack.c.bf16 %v41_v1, %v40_v0  ;;  %v43_v4 = vld [vmem:[%s2926_s5 + $0x18] sm:$0xff]  ;;  %v44_v6 = vld [vmem:[%s2926_s5 + $0x20] sm:$0xff]  ;;  %v45_v7 = vld [vmem:[%s2926_s5 + $0x28] sm:$0xff] }
   0x3   :  { %v1977_v5 = vpack.c.bf16 %v43_v4, %v42_v2  ;;  %v38_v8 = vld [vmem:[%s2927_s0] sm:$0xff]  ;;  %v1981_v9 = vpack.c.bf16 %v45_v7, %v44_v6  ;;  %v46_v10 = vld [vmem:[%s2926_s5 + $0x30] sm:$0xff]  ;;  %v47_v11 = vld [vmem:[%s2926_s5 + $0x38] sm:$0xff]  ;;  %v261_v4 = vlaneseq }
   0x4   :  { %1974 = vmatprep.subr.bf16.mxu0 %v1973_v3  ;;  %1922 = vmatprep.mubr.msk.f32.mxu0 %vm56_vm0, %v38_v8  ;;  %v1985_v12 = vpack.c.bf16 %v47_v11, %v46_v10  ;;  %v48_v13 = vld [vmem:[%s2926_s5 + $0x40] sm:$0x7f]  ;;  %v39_v14 = vld [vmem:[%s2927_s0 + $0x8] sm:$0xf]  ;;  %v146_v18 = vld [vmem:[%s2928_s7 + $0x10] sm:$0xff] }
   0x5   :  { %1976 = vmatpush3.bf16.msra.mxu0 %v1973_v3  ;;  %v144_v15 = vld [vmem:[%s2928_s7] sm:$0xff]  ;;  %v145_v16 = vld [vmem:[%s2928_s7 + $0x8] sm:$0xff]  ;;  %v147_v19 = vld [vmem:[%s2928_s7 + $0x18] sm:$0xff] }
   0x6   :  { %1978 = vmatprep.subr.bf16.mxu0 %v1977_v5  ;;  %v1989_v17 = vpack.c.bf16 %v145_v16, %v144_v15  ;;  %v1993_v20 = vpack.c.bf16 %v147_v19, %v146_v18  ;;  %v148_v21 = vld [vmem:[%s2928_s7 + $0x20] sm:$0xff]  ;;  %v149_v22 = vld [vmem:[%s2928_s7 + $0x28] sm:$0xff]  ;;  %v150_v23 = vld [vmem:[%s2928_s7 + $0x30] sm:$0xff] }
   0x7   :  { %v1997_v24 = vpack.c.bf16 %v149_v22, %v148_v21  ;;  %v151_v25 = vld [vmem:[%s2928_s7 + $0x38] sm:$0xff]  ;;  %v244_v27 = vld [vmem:[%s2929_s9 + $0x8] sm:$0xff]  ;;  %v1808_v30 = vld [vmem:[%s2930_s6] ss:$0 sm:$0xff] }
   0x8   :  { %1990 = vmatprep.subr.bf16.mxu1 %v1989_v17  ;;  %v2001_v26 = vpack.c.bf16 %v151_v25, %v150_v23  ;;  %v246_v28 = vld [vmem:[%s2929_s9 + $0x18] sm:$0xff]  ;;  %v243_v37 = vld [vmem:[%s2929_s9] sm:$0xff]  ;;  %v245_v38 = vld [vmem:[%s2929_s9 + $0x10] sm:$0xff] }
   0x9   :  { %1980 = vmatpush3.bf16.msra.mxu0 %v1977_v5  ;;  %1992 = vmatpush3.bf16.msra.mxu1 %v1989_v17  ;;  %v2005_v29 = vpack.c.bf16 %v246_v28, %v244_v27  ;;  %v2007_v39 = vpack.c.bf16 %v245_v38, %v243_v37  ;;  %v248_v40 = vld [vmem:[%s2929_s9 + $0x28] sm:$0xff]  ;;  %v250_v41 = vld [vmem:[%s2929_s9 + $0x38] sm:$0xff]  ;;  %v247_v43 = vld [vmem:[%s2929_s9 + $0x20] sm:$0xff]  ;;  %v262_v5 = vshrl.u32 %v261_v4, 7  ;;  %v2132_v4 = vmov 920167782  }
   0xa   :  { %1982 = vmatprep.subr.bf16.mxu0 %v1981_v9  ;;  %1994 = vmatprep.subr.bf16.mxu1 %v1993_v20  ;;  %v2009_v42 = vpack.c.bf16 %v250_v41, %v248_v40  ;;  %v249_v44 = vld [vmem:[%s2929_s9 + $0x30] sm:$0xff]  ;;  %v252_v46 = vld [vmem:[%s2929_s9 + $0x48] sm:$0xff]  ;;  %v254_v47 = vld [vmem:[%s2929_s9 + $0x58] sm:$0xff] }
   0xb   :  { %v2011_v45 = vpack.c.bf16 %v249_v44, %v247_v43  ;;  %v251_v48 = vld [vmem:[%s2929_s9 + $0x40] sm:$0xff]  ;;  %v2013_v49 = vpack.c.bf16 %v254_v47, %v252_v46  ;;  %v253_v50 = vld [vmem:[%s2929_s9 + $0x50] sm:$0xff]  ;;  %v256_v51 = vld [vmem:[%s2929_s9 + $0x68] sm:$0xff]  ;;  %v263_v6 = vsub.s32 0, %v262_v5  ;;  %v267_v8 = vsub.s32 1, %v262_v5 }
   0xc   :  { %v258_v52 = vld [vmem:[%s2929_s9 + $0x78] sm:$0xff]  ;;  %v2015_v54 = vpack.c.bf16 %v253_v50, %v251_v48  ;;  %v255_v56 = vld [vmem:[%s2929_s9 + $0x60] sm:$0xff]  ;;  %v257_v57 = vld [vmem:[%s2929_s9 + $0x70] sm:$0xff] }
   0xd   :  { %1984 = vmatpush3.bf16.msra.mxu0 %v1981_v9  ;;  %1996 = vmatpush3.bf16.msra.mxu1 %v1993_v20  ;;  %v2017_v55 = vpack.c.bf16 %v258_v52, %v256_v51  ;;  %v2019_v58 = vpack.c.bf16 %v257_v57, %v255_v56  ;;  %v1812_v59 = vld [vmem:[%s2931_s8] ss:$0 sm:$0xff]  ;;  %s2127_s8 = smov 99  }
   0xe   :  { %1986 = vmatprep.subr.bf16.mxu0 %v1985_v12  ;;  %1998 = vmatprep.subr.bf16.mxu1 %v1997_v24  ;;  %v1656_v2 = vld [vmem:[%s2932_s1] sm:$0xff] }
   0xf   :  { %v1670_v3 = vld [vmem:[%s2933_s2] sm:$0xff]  ;;  %1660 = vrot.lane.b32.xlu0 %v1656_v2, %s2127_s8 }
  0x10   :  { %1674 = vrot.lane.b32.xlu1 %v1670_v3, %s2127_s8  ;;  %v259_v7 = vld [vmem:[%s2934_s10] sm:$0x3] }
  0x11   :  { %1988 = vmatpush3.bf16.msra.mxu0 %v1985_v12  ;;  %2000 = vmatpush3.bf16.msra.mxu1 %v1997_v24  ;;  %v264_v9 = vrot.slane %v259_v7, %v263_v6  ;;  %v268_v10 = vrot.slane %v259_v7, %v267_v8  ;;  %v358_v19 = vld [vmem:[%s2935_s4] sm:$0x3] }
  0x12   :  { %1920 = vmatprep.subr.msk.mxu0 %vm63_vm1, %v48_v13  ;;  %2002 = vmatprep.subr.bf16.mxu1 %v2001_v26  ;;  %v363_v20 = vrot.slane %v358_v19, %v263_v6  ;;  %v367_v21 = vrot.slane %v358_v19, %v267_v8  ;;  %v2133_v8 = vmov 1326507024  }
  0x15   :  { %1921 = vmatpush3.msk.msra.mxu0 %vm63_vm1, %v48_v13  ;;  %2004 = vmatpush3.bf16.msra.mxu1 %v2001_v26 }
  0x16   :  { %1923 = vmatmul.mubr.msk.f32.vlgmr.msra.gmra.mrb[0].mxu0 %vm56_vm0, %v39_v14  ;;  %2006 = vmatprep.subr.bf16.mxu1 %v2005_v29 }
  0xe9   :  { %v1924_v31 = vpop.f32.mrb[0].mxu0 }
  0xea   :  { %v139_v32 = vadd.f32 %v1924_v31, %v1808_v30  ;;  %v133_v33 = vpop.f32.mrb[1].mxu0 }
  0xeb   :  { %v134_v34 = vadd.f32 %v1808_v30, %v133_v33 }
  0xed   :  { %2078 = vtanh.f32 %v134_v34 }
  0xee   :  { %2080 = vtanh.f32 %v139_v32 }
  0xf7   :  { %v2079_v35 = vpop.eup %2078 }
  0xf8   :  { %v2081_v36 = vpop.eup %2080  ;;  %1941 = vmatprep.mubr.msk.f32.mxu1 %vm159_vm2, %v2079_v35 }
  0xf9   :  { %1942 = vmatmul.mubr.msk.f32.vlgmr.msra.gmra.mrb[0].mxu1 %vm159_vm2, %v2081_v36 }
  0xfa   :  { %2008 = vmatpush1.bf16.msra.mxu1 %v2007_v39  ;;  %341 = vmatprep.mubr.f32.mxu1 %v2126_v53 }
  0xfb   :  { %2010 = vmatprep.subr.bf16.mxu1 %v2009_v42 }
  0xfe   :  { %2012 = vmatpush1.bf16.msra.mxu1 %v2011_v45 }
  0xff   :  { %2014 = vmatprep.subr.bf16.mxu1 %v2013_v49 }
 0x102   :  { %2016 = vmatpush1.bf16.msra.mxu1 %v2015_v54 }
 0x103   :  { %2018 = vmatprep.subr.bf16.mxu1 %v2017_v55  ;;  %v2129_v55 = vmov 2475754826  }
 0x106   :  { %2020 = vmatpush1.bf16.msra.mxu1 %v2019_v58  ;;  %v2130_v58 = vmov 2131351028  }
 0x1cc   :  { %v1943_v60 = vpop.f32.mrb[0].mxu1 }
 0x1cd   :  { %v232_v61 = vpop.f32.mrb[1].mxu1  ;;  %v238_v63 = vadd.f32 %v1943_v60, %v1812_v59 }
 0x1ce   :  { %v233_v62 = vadd.f32 %v1812_v59, %v232_v61 }
 0x1d0   :  { %2082 = vtanh.f32 %v233_v62  ;;  %v2131_v62 = vmov 2102212464  }
 0x1d1   :  { %2084 = vtanh.f32 %v238_v63 }
 0x1da   :  { %v2083_v0 = vpop.eup %2082 }
 0x1db   :  { %1815 = vmatmul.mubr.msk.f32.vlgmr.msra.gmra.mrb[2].mxu1 %vm159_vm2, %v2083_v0  ;;  %v2085_v1 = vpop.eup %2084 }
 0x1dc   :  { %347 = vmatprep.mubr.f32.mxu1 %v2126_v53  ;;  %v2128_v53 = vmov 683565275  }
 0x1df   :  { %1816 = vmatmul.mubr.msk.f32.gmra.mrb[4].mxu1 %vm159_vm2, %v2085_v1 }
 0x2ae   :  { %v343_v11 = vpop.f32.mrb[2].mxu1 }
 0x2af   :  { %v344_v12 = vadd.f32 %v343_v11, %v264_v9  ;;  %v345_v13 = vpop.f32.mrb[3].mxu1 }
 0x2b0   :  { %v346_v14 = vadd.f32 %v345_v13, %v268_v10 }
 0x2b1   :  { %2086 = vtanh.f32 %v344_v12 }
 0x2b2   :  { %2088 = vtanh.f32 %v346_v14  ;;  %v349_v15 = vpop.f32.mrb[4].mxu1 }
 0x2b3   :  { %v350_v16 = vadd.f32 %v349_v15, %v264_v9  ;;  %v351_v17 = vpop.f32.mrb[5].mxu1 }
 0x2b4   :  { %v352_v18 = vadd.f32 %v351_v17, %v268_v10 }
 0x2b5   :  { %2090 = vtanh.f32 %v350_v16 }
 0x2b6   :  { %2092 = vtanh.f32 %v352_v18 }
 0x2bb   :  { %v2087_v22 = vpop.eup %2086 }
 0x2bc   :  { %v2089_v23 = vpop.eup %2088  ;;  %v2326_v24 = vmul.f32 %v2087_v22, %v363_v20 }
 0x2bd   :  { %v371_v25 = vmul.f32 %v2089_v23, %v367_v21 }
 0x2be   :  { %v1221_v26 = vand.u32 2139095040, %v2326_v24  ;;  %v1218_v36 = vand.u32 2147483647, %v2326_v24 }
 0x2bf   :  { %v2091_v27 = vpop.eup %2090  ;;  %v375_v28 = vmul.f32 0.5, %v371_v25 }
 0x2c0   :  { %v2093_v29 = vpop.eup %2092  ;;  %v1222_v30 = vshrl.u32 %v1221_v26, 23  ;;  %v2329_v31 = vmul.f32 %v2091_v27, %v363_v20  ;;  %v1225_v41 = vand.u32 8388607, %v1218_v36 }
 0x2c1   :  { %v2331_v32 = vadd.f32 0.7853982, %v375_v28  ;;  %v373_v33 = vmul.f32 %v2093_v29, %v367_v21 }
 0x2c2   :  { %v1849_v34 = vadd.s32 4294967169, %v1222_v30  ;;  %v1324_v35 = vand.u32 2139095040, %v2329_v31  ;;  %v1321_v40 = vand.u32 2147483647, %v2329_v31  ;;  %v1226_v52 = vor.u32 8388608, %v1225_v41 }
 0x2c3   :  { %v489_v37 = vand.u32 2139095040, %v2331_v32  ;;  %v377_v45 = vmul.f32 0.5, %v373_v33 }
 0x2c4   :  { %v1228_v38 = vadd.s32 1, %v1849_v34  ;;  %v1325_v39 = vshrl.u32 %v1324_v35, 23  ;;  %v1328_v47 = vand.u32 8388607, %v1321_v40  ;;  %v1266_v12 = vshll.u32 %v1226_v52, 8 }
 0x2c5   :  { %v490_v43 = vshrl.u32 %v489_v37, 23  ;;  %v2341_v51 = vadd.f32 0.7853982, %v377_v45 }
 0x2c6   :  { %vm1229_vm3 = vcmp.gt.s32.totalorder %v1228_v38, 0  ;;  %v1853_v44 = vadd.s32 4294967169, %v1325_v39  ;;  %v1329_v0 = vor.u32 8388608, %v1328_v47 }
 0x2c7   :  { %v1230_v42 = vsel %vm1229_vm3, %v1228_v38, 0  ;;  %v1821_v49 = vadd.s32 4294967169, %v490_v43  ;;  %v697_v10 = vand.u32 2139095040, %v2341_v51 }
 0x2c8   :  { %v1232_v46 = vand.u32 31, %v1230_v42  ;;  %v1331_v50 = vadd.s32 1, %v1853_v44  ;;  %v1231_v60 = vshrl.u32 %v1230_v42, 5  ;;  %v2354_v15 = vshll.u32 %v1329_v0, 8 }
 0x2c9   :  { %v496_v13 = vadd.s32 1, %v1821_v49 }
 0x2ca   :  { %v1233_v48 = vsub.s32 32, %v1232_v46  ;;  %v1235_v54 = vshll.u32 %v2128_v53, %v1232_v46  ;;  %v1238_v57 = vshll.u32 %v2129_v55, %v1232_v46  ;;  %v1241_v61 = vshll.u32 %v2130_v58, %v1232_v46 }
 0x2cb   :  { %v1244_v3 = vshll.u32 %v2131_v62, %v1232_v46  ;;  %v1247_v7 = vshll.u32 %v2132_v4, %v1232_v46  ;;  %vm1332_vm4 = vcmp.gt.s32.totalorder %v1331_v50, 0  ;;  %vm1250_vm5 = vcmp.lt.s32.totalorder %v1231_v60, 1 }
 0x2cc   :  { %v1236_v56 = vshrl.u32 %v2129_v55, %v1233_v48  ;;  %v1239_v59 = vshrl.u32 %v2130_v58, %v1233_v48  ;;  %v1242_v63 = vshrl.u32 %v2131_v62, %v1233_v48  ;;  %v1245_v5 = vshrl.u32 %v2132_v4, %v1233_v48 }
 0x2cd   :  { %v1248_v9 = vshrl.u32 %v2133_v8, %v1233_v48  ;;  %v1234_v16 = vshrl.u32 %v2128_v53, %v1233_v48  ;;  %vm1252_vm6 = vcmp.lt.s32.totalorder %v1231_v60, 3  ;;  %vm1253_vm7 = vcmp.lt.s32.totalorder %v1231_v60, 4 }
 0x2ce   :  { %v1237_v1 = vor.u32 %v1236_v56, %v1235_v54  ;;  %v1240_v2 = vor.u32 %v1239_v59, %v1238_v57  ;;  %v1243_v6 = vor.u32 %v1242_v63, %v1241_v61  ;;  %v1246_v11 = vor.u32 %v1245_v5, %v1244_v3 }
 0x2cf   :  { %v1249_v14 = vor.u32 %v1248_v9, %v1247_v7  ;;  %v1333_v21 = vsel %vm1332_vm4, %v1331_v50, 0  ;;  %vm1251_vm8 = vcmp.lt.s32.totalorder %v1231_v60, 2  ;;  %vm497_vm9 = vcmp.gt.s32.totalorder %v496_v13, 0 }
 0x2d0   :  { %v1258_v17 = vsel %vm1250_vm5, %v1237_v1, %v1240_v2  ;;  %v1255_v18 = vsel %vm1253_vm7, %v1243_v6, 2102212464  ;;  %v1259_v19 = vsel %vm1253_vm7, %v1246_v11, 920167782  ;;  %v1262_v20 = vsel %vm1250_vm5, %v1240_v2, %v1243_v6 }
 0x2d1   :  { %v1254_v22 = vsel %vm1250_vm5, %v1234_v16, %v1237_v1  ;;  %v1260_v23 = vsel %vm1252_vm6, %v1243_v6, %v1259_v19  ;;  %v1263_v25 = vsel %vm1253_vm7, %v1249_v14, 1326507024  ;;  %v1256_v26 = vsel %vm1252_vm6, %v1240_v2, %v1255_v18 }
 0x2d2   :  { %v1261_v27 = vsel %vm1251_vm8, %v1258_v17, %v1260_v23  ;;  %v1264_v28 = vsel %vm1252_vm6, %v1246_v11, %v1263_v25  ;;  %v1335_v29 = vand.u32 31, %v1333_v21  ;;  %v1334_v38 = vshrl.u32 %v1333_v21, 5 }
 0x2d3   :  { %v1265_v30 = vsel %vm1251_vm8, %v1262_v20, %v1264_v28  ;;  %v2357_v33 = vmul.u32.u64.low %v1266_v12, %v1261_v27  ;;  %v2358_v34 = vmul.u32.u64.high %v1266_v12, %v1261_v27, %v2357_v33  ;;  %v1257_v41 = vsel %vm1251_vm8, %v1254_v22, %v1256_v26 }
 0x2d4   :  { %v2361_v35 = vmul.u32.u64.low %v1266_v12, %v1265_v30  ;;  %v2362_v37 = vmul.u32.u64.high %v1266_v12, %v1265_v30, %v2361_v35  ;;  %v1336_v39 = vsub.s32 32, %v1335_v29  ;;  %v1338_v42 = vshll.u32 %v2128_v53, %v1335_v29 }
 0x2d5   :  { %v1341_v43 = vshll.u32 %v2129_v55, %v1335_v29  ;;  %v1344_v44 = vshll.u32 %v2130_v58, %v1335_v29  ;;  %v1347_v48 = vshll.u32 %v2131_v62, %v1335_v29  ;;  %v1276_v49 = vadd.s32 1, %v2358_v34 }
 0x2d6   :  { %v1339_v45 = vshrl.u32 %v2129_v55, %v1336_v39  ;;  %v1342_v46 = vshrl.u32 %v2130_v58, %v1336_v39  ;;  %v1345_v47 = vshrl.u32 %v2131_v62, %v1336_v39  ;;  %v1348_v50 = vshrl.u32 %v2132_v4, %v1336_v39 }
 0x2d7   :  { %v1350_v52 = vshll.u32 %v2132_v4, %v1335_v29  ;;  %v1351_v54 = vshrl.u32 %v2133_v8, %v1336_v39  ;;  %v1273_v56 = vmul.u32 %v1266_v12, %v1257_v41  ;;  %vm1275_vm10 = vc.u32 %v2362_v37, %v2357_v33 }
 0x2d8   :  { %v1340_v57 = vor.u32 %v1339_v45, %v1338_v42  ;;  %v1343_v59 = vor.u32 %v1342_v46, %v1341_v43  ;;  %v1277_v60 = vsel %vm1275_vm10, %v1276_v49, %v2358_v34  ;;  %v1346_v61 = vor.u32 %v1345_v47, %v1344_v44 }
 0x2d9   :  { %v1349_v63 = vor.u32 %v1348_v50, %v1347_v48  ;;  %v1352_v0 = vor.u32 %v1351_v54, %v1350_v52  ;;  %v498_v1 = vsel %vm497_vm9, %v496_v13, 0  ;;  %v1278_v2 = vadd.s32 %v1277_v60, %v1273_v56 }
 0x2da   :  { %vm1353_vm11 = vcmp.lt.s32.totalorder %v1334_v38, 1  ;;  %vm1356_vm12 = vcmp.lt.s32.totalorder %v1334_v38, 4  ;;  %vm1354_vm13 = vcmp.lt.s32.totalorder %v1334_v38, 2  ;;  %vm1355_vm14 = vcmp.lt.s32.totalorder %v1334_v38, 3 }
 0x2db   :  { %v1361_v3 = vsel %vm1353_vm11, %v1340_v57, %v1343_v59  ;;  %v1362_v5 = vsel %vm1356_vm12, %v1349_v63, 920167782  ;;  %v1279_v6 = vadd.s32 536870912, %v1278_v2  ;;  %v1358_v7 = vsel %vm1356_vm12, %v1346_v61, 2102212464 }
 0x2dc   :  { %v1363_v9 = vsel %vm1355_vm14, %v1346_v61, %v1362_v5  ;;  %v1365_v11 = vsel %vm1353_vm11, %v1343_v59, %v1346_v61  ;;  %v500_v12 = vand.u32 31, %v498_v1  ;;  %v1337_v14 = vshrl.u32 %v2128_v53, %v1336_v39 }
 0x2dd   :  { %v1364_v16 = vsel %vm1354_vm13, %v1361_v3, %v1363_v9  ;;  %v1366_v17 = vsel %vm1356_vm12, %v1352_v0, 1326507024  ;;  %v2383_v13 = vshrl.u32 %v1279_v6, 30  ;;  %v1359_v22 = vsel %vm1355_vm14, %v1343_v59, %v1358_v7 }
 0x2de   :  { %v1367_v18 = vsel %vm1355_vm14, %v1349_v63, %v1366_v17  ;;  %v2386_v19 = vmul.u32.u64.low %v2354_v15, %v1364_v16  ;;  %v2387_v20 = vmul.u32.u64.high %v2354_v15, %v1364_v16, %v2386_v19  ;;  %v1357_v21 = vsel %vm1353_vm11, %v1337_v14, %v1340_v57 }
 0x2df   :  { %v1368_v23 = vsel %vm1354_vm13, %v1365_v11, %v1367_v18  ;;  %v1281_v25 = vshll.u32 %v2383_v13, 30  ;;  %v698_v28 = vshrl.u32 %v697_v10, 23  ;;  %v486_v29 = vand.u32 2147483647, %v2331_v32 }
 0x2e0   :  { %v2394_v26 = vmul.u32.u64.low %v2354_v15, %v1368_v23  ;;  %v2395_v27 = vmul.u32.u64.high %v2354_v15, %v1368_v23, %v2394_v26  ;;  %v2400_v30 = vsub.s32 32, %v500_v12  ;;  %v1360_v35 = vsel %vm1354_vm13, %v1357_v21, %v1359_v22 }
 0x2e1   :  { %v1282_v34 = vsub.s32 %v1278_v2, %v1281_v25  ;;  %v1379_v39 = vadd.s32 1, %v2387_v20  ;;  %v1376_v42 = vmul.u32 %v2354_v15, %v1360_v35  ;;  %v374_v44 = vmul.f32 0.5, %v2326_v24 }
 0x2e2   :  { %vm1378_vm15 = vc.u32 %v2395_v27, %v2386_v19  ;;  %v1829_v10 = vadd.s32 4294967169, %v698_v28  ;;  %v493_v46 = vand.u32 8388607, %v486_v29  ;;  %v513_v38 = vshrl.u32 %v2132_v4, %v2400_v30 }
 0x2e3   :  { %v1284_v41 = vsub.s32 0, %v1282_v34  ;;  %v1380_v43 = vsel %vm1378_vm15, %v1379_v39, %v2387_v20  ;;  %v2413_v47 = vshrl.u32 %v498_v1, 5  ;;  %v507_v49 = vshrl.u32 %v2130_v58, %v2400_v30 }
 0x2e4   :  { %v1381_v48 = vadd.s32 %v1380_v43, %v1376_v42  ;;  %v510_v15 = vshrl.u32 %v2131_v62, %v2400_v30  ;;  %v504_v52 = vshrl.u32 %v2129_v55, %v2400_v30  ;;  %v512_v54 = vshll.u32 %v2131_v62, %v500_v12 }
 0x2e5   :  { %v1850_v45 = vmin.u32 %v1284_v41, %v1282_v34  ;;  %v516_v56 = vshrl.u32 %v2133_v8, %v2400_v30  ;;  %v506_v59 = vshll.u32 %v2129_v55, %v500_v12  ;;  %v509_v60 = vshll.u32 %v2130_v58, %v500_v12 }
 0x2e6   :  { %v1382_v57 = vadd.s32 536870912, %v1381_v48  ;;  %v515_v61 = vshll.u32 %v2132_v4, %v500_v12  ;;  %v704_v63 = vadd.s32 1, %v1829_v10  ;;  %v503_v1 = vshll.u32 %v2128_v53, %v500_v12 }
 0x2e7   :  { %v1286_v50 = vclz %v1850_v45  ;;  %v514_v2 = vor.u32 %v513_v38, %v512_v54  ;;  %v508_v5 = vor.u32 %v507_v49, %v506_v59  ;;  %v511_v6 = vor.u32 %v510_v15, %v509_v60 }
 0x2e8   :  { %v2428_v3 = vshrl.u32 %v1382_v57, 30  ;;  %v517_v7 = vor.u32 %v516_v56, %v515_v61  ;;  %v1274_v9 = vadd.s32 %v2357_v33, %v2362_v37  ;;  %v1304_v11 = vsub.s32 4, %v2383_v13 }
 0x2e9   :  { %v1851_v0 = vadd.s32 4294967294, %v1286_v50  ;;  %v494_v14 = vor.u32 8388608, %v493_v46  ;;  %v505_v18 = vor.u32 %v504_v52, %v503_v1  ;;  %vm521_vm1 = vcmp.lt.s32.totalorder %v2413_v47, 4 }
 0x2ea   :  { %v1384_v17 = vshll.u32 %v2428_v3, 30  ;;  %vm518_vm2 = vcmp.lt.s32.totalorder %v2413_v47, 1  ;;  %v527_v21 = vsel %vm521_vm1, %v514_v2, 920167782  ;;  %vm520_vm3 = vcmp.lt.s32.totalorder %v2413_v47, 3 }
 0x2eb   :  { %vm1852_vm0 = vcmp.lt.s32.totalorder %v1851_v0, 0  ;;  %v530_v33 = vsel %vm518_vm2, %v508_v5, %v511_v6  ;;  %v531_v37 = vsel %vm521_vm1, %v517_v7, 1326507024  ;;  %vm519_vm4 = vcmp.lt.s32.totalorder %v2413_v47, 2 }
 0x2ec   :  { %v1289_v16 = vsel %vm1852_vm0, 0, %v1851_v0  ;;  %v2438_v22 = vsub.s32 %v1381_v48, %v1384_v17  ;;  %v532_v28 = vsel %vm520_vm3, %v514_v2, %v531_v37  ;;  %v526_v39 = vsel %vm518_vm2, %v505_v18, %v508_v5 }
 0x2ed   :  { %v1290_v12 = vsub.s32 32, %v1289_v16  ;;  %v1294_v20 = vsub.s32 4294967266, %v1289_v16  ;;  %v1291_v23 = vshll.u32 %v1282_v34, %v1289_v16  ;;  %v528_v41 = vsel %vm520_vm3, %v511_v6, %v527_v21 }
 0x2ee   :  { %v1387_v35 = vsub.s32 0, %v2438_v22  ;;  %v533_v34 = vsel %vm519_vm4, %v530_v33, %v532_v28  ;;  %vm2457_vm5 = vcmp.le.f32.partialorder %v1218_v36, 0.7853982  ;;  %vm1220_vm6 = vcmp.lt.s32.totalorder %v2326_v24, 0 }
 0x2ef   :  { %v1292_v25 = vshrl.u32 %v1274_v9, %v1290_v12  ;;  %v1295_v26 = vadd.s32 127, %v1294_v20  ;;  %v534_v46 = vshll.u32 %v494_v14, 8  ;;  %vm705_vm7 = vcmp.gt.s32.totalorder %v704_v63, 0 }
 0x2f0   :  { %v1854_v45 = vmin.u32 %v1387_v35, %v2438_v22  ;;  %v529_v48 = vsel %vm519_vm4, %v526_v39, %v528_v41  ;;  %v2465_v49 = vadd.f32 0.7853982, %v374_v44  ;;  %v1305_v15 = vsel %vm1220_vm6, %v1304_v11, %v2383_v13 }
 0x2f1   :  { %v1293_v42 = vor.u32 %v1292_v25, %v1291_v23  ;;  %v1296_v43 = vshll.u32 %v1295_v26, 23  ;;  %v2470_v50 = vmul.u32.u64.low %v534_v46, %v533_v34  ;;  %v2471_v52 = vmul.u32.u64.high %v534_v46, %v533_v34, %v2470_v50 }
 0x2f2   :  { %v1389_v36 = vclz %v1854_v45  ;;  %vm1323_vm8 = vcmp.lt.s32.totalorder %v2329_v31, 0  ;;  %v523_v57 = vsel %vm521_vm1, %v511_v6, 2102212464  ;;  %v502_v44 = vshrl.u32 %v2128_v53, %v2400_v30 }
 0x2f3   :  { %v1297_v38 = vor.u32 4788187, %v1296_v43  ;;  %v1300_v56 = vcvt.s32.f32 %v1293_v42  ;;  %v2478_v60 = vmul.u32.u64.low %v534_v46, %v529_v48  ;;  %v2479_v61 = vmul.u32.u64.high %v534_v46, %v529_v48, %v2478_v60 }
 0x2f4   :  { %v1855_v59 = vadd.s32 4294967294, %v1389_v36  ;;  %v706_v13 = vsel %vm705_vm7, %v704_v63, 0  ;;  %v1307_v1 = vsel %vm2457_vm5, 0, %v1305_v15  ;;  %v385_v2 = vand.u32 2139095040, %v2465_v49 }
 0x2f5   :  { %v1298_v54 = vand.u32 2147483647, %v1297_v38  ;;  %v1377_v7 = vadd.s32 %v2386_v19, %v2395_v27  ;;  %v522_v6 = vsel %vm518_vm2, %v502_v44, %v505_v18  ;;  %v524_v30 = vsel %vm520_vm3, %v508_v5, %v523_v57 }
 0x2f6   :  { %vm1856_vm9 = vcmp.lt.s32.totalorder %v1855_v59, 0  ;;  %v1407_v63 = vsub.s32 4, %v2428_v3  ;;  %v386_v14 = vshrl.u32 %v385_v2, 23  ;;  %vm543_vm10 = vc.u32 %v2471_v52, %v2478_v60 }
 0x2f7   :  { %v1301_v0 = vmul.f32 %v1300_v56, %v1298_v54  ;;  %v1392_v11 = vsel %vm1856_vm9, 0, %v1855_v59  ;;  %v544_v12 = vadd.s32 1, %v2479_v61  ;;  %v1529_v27 = vadd.s32 3, %v1307_v1 }
 0x2f8   :  { %v1393_v16 = vsub.s32 32, %v1392_v11  ;;  %v1397_v17 = vsub.s32 4294967266, %v1392_v11  ;;  %v525_v18 = vsel %vm519_vm4, %v522_v6, %v524_v30  ;;  %v1817_v5 = vadd.s32 4294967169, %v386_v14 }
 0x2f9   :  { %v1302_v9 = vxor.u32 2147483648, %v1301_v0  ;;  %v1394_v21 = vshll.u32 %v2438_v22, %v1392_v11  ;;  %v1408_v23 = vsel %vm1323_vm8, %v1407_v63, %v2428_v3  ;;  %v545_v25 = vsel %vm543_vm10, %v544_v12, %v2479_v61 }
 0x2fa   :  { %v1395_v33 = vshrl.u32 %v1377_v7, %v1393_v16  ;;  %v1398_v37 = vadd.s32 127, %v1397_v17  ;;  %v392_v26 = vadd.s32 1, %v1817_v5  ;;  %v541_v35 = vmul.u32 %v534_v46, %v525_v18 }
 0x2fb   :  { %v1303_v19 = vsel %vm1220_vm6, %v1302_v9, %v1301_v0  ;;  %vm2509_vm11 = vcmp.le.f32.partialorder %v1321_v40, 0.7853982  ;;  %v2517_v43 = vand.u32 31, %v706_v13  ;;  %v1311_v34 = vand.u32 3, %v1307_v1 }
 0x2fc   :  { %v1306_v20 = vsel %vm2457_vm5, %v2326_v24, %v1303_v19  ;;  %v1396_v47 = vor.u32 %v1395_v33, %v1394_v21  ;;  %v1399_v28 = vshll.u32 %v1398_v37, 23  ;;  %vm393_vm12 = vcmp.gt.s32.totalorder %v392_v26, 0 }
 0x2fd   :  { %2094 = vcosq.f32 %v1306_v20  ;;  %v1410_v41 = vsel %vm2509_vm11, 0, %v1408_v23  ;;  %v2515_v42 = vadd.s32 %v545_v25, %v541_v35  ;;  %v394_v3 = vsel %vm393_vm12, %v392_v26, 0 }
 0x2fe   :  { %2096 = vsinq.f32 %v1306_v20  ;;  %v1400_v22 = vor.u32 4788187, %v1399_v28  ;;  %v396_v10 = vand.u32 31, %v394_v3  ;;  %v1403_v46 = vcvt.s32.f32 %v1396_v47 }
 0x2ff   :  { %v1530_v38 = vand.u32 3, %v1529_v27  ;;  %v1633_v48 = vadd.s32 3, %v1410_v41  ;;  %vm1310_vm13 = vweird.f32 %v2326_v24  ;;  %v547_v15 = vadd.s32 536870912, %v2515_v42 }
 0x300   :  { %v1401_v45 = vand.u32 2147483647, %v1400_v22  ;;  %v382_v36 = vand.u32 2147483647, %v2465_v49  ;;  %v2522_v50 = vshrl.u32 %v706_v13, 5  ;;  %v2525_v54 = vsub.s32 32, %v2517_v43 }
 0x301   :  { %vm1312_vm14 = vcmp.lt.s32.totalorder %v1311_v34, 2  ;;  %v397_v56 = vsub.s32 32, %v396_v10  ;;  %vm1313_vm15 = vcmp.eq.s32.totalorder %v1311_v34, 0  ;;  %vm1316_vm0 = vcmp.eq.s32.totalorder %v1311_v34, 2 }
 0x302   :  { %v1404_v40 = vmul.f32 %v1403_v46, %v1401_v45  ;;  %vm1531_vm1 = vcmp.lt.s32.totalorder %v1530_v38, 2  ;;  %v2527_v44 = vand.u32 3, %v1410_v41  ;;  %vm1532_vm2 = vcmp.eq.s32.totalorder %v1530_v38, 0 }
 0x303   :  { %vm1535_vm3 = vcmp.eq.s32.totalorder %v1530_v38, 2  ;;  %v2529_v61 = vand.u32 3, %v1633_v48  ;;  %v2533_v2 = vshrl.u32 %v547_v15, 30  ;;  %v389_v7 = vand.u32 8388607, %v382_v36 }
 0x304   :  { %v1405_v57 = vxor.u32 2147483648, %v1404_v40  ;;  %v399_v9 = vshll.u32 %v2128_v53, %v396_v10  ;;  %v400_v11 = vshrl.u32 %v2129_v55, %v397_v56  ;;  %v403_v14 = vshrl.u32 %v2130_v58, %v397_v56 }
 0x305   :  { %v406_v16 = vshrl.u32 %v2131_v62, %v397_v56  ;;  %v390_v18 = vor.u32 8388608, %v389_v7  ;;  %v402_v5 = vshll.u32 %v2129_v55, %v396_v10  ;;  %v405_v20 = vshll.u32 %v2130_v58, %v396_v10 }
 0x306   :  { %v1406_v13 = vsel %vm1323_vm8, %v1405_v57, %v1404_v40  ;;  %v395_v33 = vshrl.u32 %v394_v3, 5  ;;  %v401_v37 = vor.u32 %v400_v11, %v399_v9  ;;  %v408_v23 = vshll.u32 %v2131_v62, %v396_v10  ;;  %v1657_v40 = vld [vmem:[%s2932_s1 + $0x8] sm:$0xf] }
 0x307   :  { %v2095_v59 = vpop.eup %2094  ;;  %v1409_v30 = vsel %vm2509_vm11, %v2329_v31, %v1406_v13  ;;  %vm1419_vm4 = vcmp.eq.s32.totalorder %v2527_v44, 2  ;;  %v404_v26 = vor.u32 %v403_v14, %v402_v5  ;;  %v407_v47 = vor.u32 %v406_v16, %v405_v20 }
 0x308   :  { %v2097_v0 = vpop.eup %2096  ;;  %v1317_v1 = vxor.u32 2147483648, %v2095_v59  ;;  %2098 = vcosq.f32 %v1409_v30  ;;  %v409_v28 = vshrl.u32 %v2132_v4, %v397_v56  ;;  %vm1416_vm5 = vcmp.eq.s32.totalorder %v2527_v44, 0 }
 0x309   :  { %v1314_v6 = vxor.u32 2147483648, %v2097_v0  ;;  %2100 = vsinq.f32 %v1409_v30  ;;  %vm1636_vm6 = vcmp.eq.s32.totalorder %v2529_v61, 0  ;;  %v549_v35 = vshll.u32 %v2533_v2, 30 }
 0x30a   :  { %v1318_v63 = vsel %vm1316_vm0, %v1317_v1, %v2097_v0  ;;  %v1537_v19 = vsel %vm1535_vm3, %v1317_v1, %v2097_v0  ;;  %v411_v39 = vshll.u32 %v2132_v4, %v396_v10  ;;  %v412_v22 = vshrl.u32 %v2133_v8, %v397_v56 }
 0x30b   :  { %v1315_v17 = vsel %vm1313_vm15, %v2095_v59, %v1314_v6  ;;  %v1534_v12 = vsel %vm1532_vm2, %v2095_v59, %v1314_v6  ;;  %vm1415_vm7 = vcmp.lt.s32.totalorder %v2527_v44, 2  ;;  %vm1639_vm8 = vcmp.eq.s32.totalorder %v2529_v61, 2 }
 0x30c   :  { %v1319_v27 = vsel %vm1312_vm14, %v1315_v17, %v1318_v63  ;;  %v1538_v25 = vsel %vm1531_vm1, %v1534_v12, %v1537_v19  ;;  %v398_v41 = vshrl.u32 %v2128_v53, %v397_v56  ;;  %v410_v3 = vor.u32 %v409_v28, %v408_v23 }
 0x30d   :  { %v1320_v21 = vsel %vm1310_vm13, nan, %v1319_v27  ;;  %v2566_v34 = vshll.u32 %v390_v18, 8  ;;  %vm1413_vm9 = vweird.f32 %v2329_v31  ;;  %v1539_v45 = vsel %vm1310_vm13, nan, %v1538_v25 }
 0x30e   :  { %1426 = vrot.lane.b32.xlu0 %v1320_v21, %s2127_s8  ;;  %v413_v46 = vor.u32 %v412_v22, %v411_v39  ;;  %vm414_vm10 = vcmp.lt.s32.totalorder %v395_v33, 1  ;;  %vm417_vm11 = vcmp.lt.s32.totalorder %v395_v33, 4  ;;  %vm1635_vm12 = vcmp.lt.s32.totalorder %v2529_v61, 2 }
 0x30f   :  { %vm416_vm14 = vcmp.lt.s32.totalorder %v395_v33, 3  ;;  %v419_v10 = vsel %vm417_vm11, %v407_v47, 2102212464  ;;  %v422_v38 = vsel %vm414_vm10, %v401_v37, %v404_v26  ;;  %v423_v48 = vsel %vm417_vm11, %v410_v3, 920167782 }
 0x310   :  { %v2580_v24 = vsub.s32 %v2515_v42, %v549_v35  ;;  %vm415_vm13 = vcmp.lt.s32.totalorder %v395_v33, 2  ;;  %v418_v15 = vsel %vm414_vm10, %v398_v41, %v401_v37  ;;  %v424_v56 = vsel %vm416_vm14, %v407_v47, %v423_v48 }
 0x311   :  { %v420_v59 = vsel %vm416_vm14, %v404_v26, %v419_v10  ;;  %v425_v0 = vsel %vm415_vm13, %v422_v38, %v424_v56  ;;  %v426_v1 = vsel %vm414_vm10, %v404_v26, %v407_v47  ;;  %v427_v13 = vsel %vm417_vm11, %v413_v46, 1326507024 }
 0x312   :  { %1646 = vrot.lane.b32.xlu0 %v1539_v45, %s2127_s8  ;;  %v2099_v57 = vpop.eup %2098  ;;  %v428_v30 = vsel %vm416_vm14, %v410_v3, %v427_v13  ;;  %v694_v42 = vand.u32 2147483647, %v2341_v51  ;;  %v712_v9 = vshrl.u32 %v2129_v55, %v2525_v54  ;;  %v552_v19 = vsub.s32 0, %v2580_v24 }
 0x313   :  { %v2101_v7 = vpop.eup %2100  ;;  %v1420_v6 = vxor.u32 2147483648, %v2099_v57  ;;  %v429_v63 = vsel %vm415_vm13, %v426_v1, %v428_v30  ;;  %v2595_v14 = vmul.u32.u64.low %v2566_v34, %v425_v0  ;;  %v2596_v16 = vmul.u32.u64.high %v2566_v34, %v425_v0, %v2595_v14  ;;  %v1671_v0 = vld [vmem:[%s2933_s2 + $0x8] sm:$0xf] }
 0x314   :  { %v1417_v11 = vxor.u32 2147483648, %v2101_v7  ;;  %v421_v27 = vsel %vm415_vm13, %v418_v15, %v420_v59  ;;  %v2610_v20 = vmul.u32.u64.low %v2566_v34, %v429_v63  ;;  %v2611_v21 = vmul.u32.u64.high %v2566_v34, %v429_v63, %v2610_v20 }
 0x315   :  { %v1421_v17 = vsel %vm1419_vm4, %v1420_v6, %v2101_v7  ;;  %v1641_v12 = vsel %vm1639_vm8, %v1420_v6, %v2101_v7  ;;  %v701_v23 = vand.u32 8388607, %v694_v42  ;;  %v711_v33 = vshll.u32 %v2128_v53, %v2517_v43  ;;  %v1690_v20 = vld [vmem:[%s2936_s3 + $0x10] sm:$0xff] }
 0x316   :  { %1662 = vrot.lane.b32.xlu0 %v1657_v40, %s2127_s8  ;;  %v1418_v18 = vsel %vm1416_vm5, %v2099_v57, %v1417_v11  ;;  %v1638_v5 = vsel %vm1636_vm6, %v2099_v57, %v1417_v11  ;;  %v715_v25 = vshrl.u32 %v2130_v58, %v2525_v54  ;;  %v440_v47 = vadd.s32 1, %v2596_v16 }
 0x317   :  { %v1422_v37 = vsel %vm1415_vm7, %v1418_v18, %v1421_v17  ;;  %v714_v28 = vshll.u32 %v2129_v55, %v2517_v43  ;;  %v717_v44 = vshll.u32 %v2130_v58, %v2517_v43  ;;  %v1642_v35 = vsel %vm1635_vm12, %v1638_v5, %v1641_v12  ;;  %v1688_v12 = vld [vmem:[%s2936_s3] sm:$0xff]  ;;  %v1689_v5 = vld [vmem:[%s2936_s3 + $0x8] sm:$0xff] }
 0x318   :  { %v1423_v26 = vsel %vm1413_vm9, nan, %v1422_v37  ;;  %v1822_v39 = vmin.u32 %v552_v19, %v2580_v24  ;;  %v437_v22 = vmul.u32 %v2566_v34, %v421_v27  ;;  %v718_v41 = vshrl.u32 %v2131_v62, %v2525_v54  ;;  %v1691_v37 = vld [vmem:[%s2936_s3 + $0x18] sm:$0xff] }
 0x319   :  { %1428 = vrot.lane.b32.xlu1 %v1423_v26, %s2127_s8  ;;  %vm439_vm15 = vc.u32 %v2611_v21, %v2595_v14  ;;  %v713_v3 = vor.u32 %v712_v9, %v711_v33  ;;  %v720_v45 = vshll.u32 %v2131_v62, %v2517_v43  ;;  %v721_v46 = vshrl.u32 %v2132_v4, %v2525_v54 }
 0x31a   :  { %v441_v61 = vsel %vm439_vm15, %v440_v47, %v2596_v16  ;;  %v716_v10 = vor.u32 %v715_v25, %v714_v28  ;;  %v723_v38 = vshll.u32 %v2132_v4, %v2517_v43  ;;  %v724_v34 = vshrl.u32 %v2133_v8, %v2525_v54 }
 0x31b   :  { %v1643_v48 = vsel %vm1413_vm9, nan, %v1642_v35  ;;  %v442_v40 = vadd.s32 %v441_v61, %v437_v22  ;;  %v719_v15 = vor.u32 %v718_v41, %v717_v44  ;;  %v722_v56 = vor.u32 %v721_v46, %v720_v45  ;;  %v1692_v45 = vld [vmem:[%s2936_s3 + $0x20] sm:$0xff]  ;;  %v1693_v46 = vld [vmem:[%s2936_s3 + $0x28] sm:$0xff] }
 0x31c   :  { %v702_v57 = vor.u32 8388608, %v701_v23  ;;  %v725_v59 = vor.u32 %v724_v34, %v723_v38  ;;  %v554_v1 = vclz %v1822_v39  ;;  %vm726_vm0 = vcmp.lt.s32.totalorder %v2522_v50, 1 }
 0x31d   :  { %1648 = vrot.lane.b32.xlu1 %v1643_v48, %s2127_s8  ;;  %v443_v13 = vadd.s32 536870912, %v442_v40  ;;  %vm729_vm1 = vcmp.lt.s32.totalorder %v2522_v50, 4  ;;  %v710_v43 = vshrl.u32 %v2128_v53, %v2525_v54  ;;  %vm728_vm2 = vcmp.lt.s32.totalorder %v2522_v50, 3 }
 0x31e   :  { %v734_v7 = vsel %vm726_vm0, %v713_v3, %v716_v10  ;;  %v735_v6 = vsel %vm729_vm1, %v722_v56, 920167782  ;;  %vm727_vm3 = vcmp.lt.s32.totalorder %v2522_v50, 2  ;;  %v731_v9 = vsel %vm729_vm1, %v719_v15, 2102212464  ;;  %v1694_v50 = vld [vmem:[%s2936_s3 + $0x30] sm:$0xff] }
 0x31f   :  { %v2659_v30 = vshrl.u32 %v443_v13, 30  ;;  %v736_v11 = vsel %vm728_vm2, %v719_v15, %v735_v6  ;;  %v738_v54 = vsel %vm726_vm0, %v716_v10, %v719_v15  ;;  %v739_v16 = vsel %vm729_vm1, %v725_v59, 1326507024  ;;  %v1696_v6 = vld [vmem:[%s2936_s3 + $0x40] sm:$0xff] }
 0x320   :  { %v737_v63 = vsel %vm727_vm3, %v734_v7, %v736_v11  ;;  %v742_v17 = vshll.u32 %v702_v57, 8  ;;  %v1823_v19 = vadd.s32 4294967294, %v554_v1  ;;  %v740_v18 = vsel %vm728_vm2, %v722_v56, %v739_v16  ;;  %v1695_v56 = vld [vmem:[%s2936_s3 + $0x38] sm:$0xff] }
 0x321   :  { %1676 = vrot.lane.b32.xlu1 %v1671_v0, %s2127_s8  ;;  %v445_v27 = vshll.u32 %v2659_v30, 30  ;;  %v730_v23 = vsel %vm726_vm0, %v710_v43, %v713_v3  ;;  %v741_v33 = vsel %vm727_vm3, %v738_v54, %v740_v18  ;;  %v732_v28 = vsel %vm728_vm2, %v716_v10, %v731_v9  ;;  %v1697_v9 = vld [vmem:[%s2936_s3 + $0x48] sm:$0xff] }
 0x322   :  { %v2688_v25 = vmul.u32.u64.low %v742_v17, %v737_v63  ;;  %v2689_v26 = vmul.u32.u64.high %v742_v17, %v737_v63, %v2688_v25  ;;  %v2696_v44 = vmul.u32.u64.low %v742_v17, %v741_v33  ;;  %v2697_v35 = vmul.u32.u64.high %v742_v17, %v741_v33, %v2696_v44 }
 0x323   :  { %v2692_v47 = vsub.s32 %v442_v40, %v445_v27  ;;  %v376_v39 = vmul.f32 0.5, %v2329_v31  ;;  %v2021_v22 = vpack.c.bf16 %v1689_v5, %v1688_v12  ;;  %v2025_v41 = vpack.c.bf16 %v1691_v37, %v1690_v20 }
 0x324   :  { %vm1824_vm4 = vcmp.lt.s32.totalorder %v1823_v19, 0  ;;  %v733_v61 = vsel %vm727_vm3, %v730_v23, %v732_v28  ;;  %v752_v10 = vadd.s32 1, %v2689_v26  ;;  %vm751_vm5 = vc.u32 %v2697_v35, %v2688_v25 }
 0x325   :  { %v448_v3 = vsub.s32 0, %v2692_v47  ;;  %2022 = vmatprep.subr.bf16.mxu0 %v2021_v22  ;;  %v557_v38 = vsel %vm1824_vm4, 0, %v1823_v19  ;;  %v2713_v34 = vadd.f32 0.7853982, %v376_v39  ;;  %v2029_v48 = vpack.c.bf16 %v1693_v46, %v1692_v45 }
 0x326   :  { %2024 = vmatpush3.bf16.msra.mxu0 %v2021_v22  ;;  %v749_v15 = vmul.u32 %v742_v17, %v733_v61  ;;  %v753_v57 = vsel %vm751_vm5, %v752_v10, %v2689_v26  ;;  %v562_v59 = vsub.s32 4294967266, %v557_v38  ;;  %v2033_v43 = vpack.c.bf16 %v1695_v56, %v1694_v50 }
 0x327   :  { %v1818_v31 = vmin.u32 %v448_v3, %v2692_v47  ;;  %2026 = vmatprep.subr.bf16.mxu0 %v2025_v41  ;;  %v593_v13 = vand.u32 2139095040, %v2713_v34  ;;  %v558_v54 = vsub.s32 32, %v557_v38  ;;  %v2037_v19 = vpack.c.bf16 %v1697_v9, %v1696_v6 }
 0x328   :  { %v754_v1 = vadd.s32 %v753_v57, %v749_v15  ;;  %v563_v16 = vadd.s32 127, %v562_v59  ;;  %v542_v27 = vadd.s32 %v2478_v60, %v2471_v52  ;;  %v590_v28 = vand.u32 2147483647, %v2713_v34 }
 0x329   :  { %v450_v40 = vclz %v1818_v31  ;;  %v594_v63 = vshrl.u32 %v593_v13, 23  ;;  %v559_v44 = vshll.u32 %v2580_v24, %v557_v38  ;;  %v438_v52 = vadd.s32 %v2595_v14, %v2611_v21 }
 0x32a   :  { %2028 = vmatpush3.bf16.msra.mxu0 %v2025_v41  ;;  %v755_v7 = vadd.s32 536870912, %v754_v1  ;;  %v560_v37 = vshrl.u32 %v542_v27, %v558_v54  ;;  %v564_v23 = vshll.u32 %v563_v16, 23  ;;  %v597_v10 = vand.u32 8388607, %v590_v28 }
 0x32b   :  { %v1819_v0 = vadd.s32 4294967294, %v450_v40  ;;  %2030 = vmatprep.subr.bf16.mxu0 %v2029_v48  ;;  %v1825_v12 = vadd.s32 4294967169, %v594_v63  ;;  %vm488_vm14 = vcmp.lt.s32.totalorder %v2331_v32, 0  ;;  %vm384_vm15 = vcmp.lt.s32.totalorder %v2465_v49, 0 }
 0x32c   :  { %v2729_v17 = vshrl.u32 %v755_v7, 30  ;;  %v561_v41 = vor.u32 %v560_v37, %v559_v44  ;;  %v565_v3 = vor.u32 4788187, %v564_v23  ;;  %v598_v56 = vor.u32 8388608, %v597_v10 }
 0x32d   :  { %vm1820_vm6 = vcmp.lt.s32.totalorder %v1819_v0, 0  ;;  %v600_v20 = vadd.s32 1, %v1825_v12  ;;  %vm2777_vm0 = vcmp.le.f32.partialorder %v486_v29, 0.7853982  ;;  %vm2783_vm1 = vcmp.le.f32.partialorder %v382_v36, 0.7853982 }
 0x32e   :  { %v453_v11 = vsel %vm1820_vm6, 0, %v1819_v0  ;;  %2032 = vmatpush3.bf16.msra.mxu0 %v2029_v48  ;;  %v757_v5 = vshll.u32 %v2729_v17, 30  ;;  %v566_v40 = vand.u32 2147483647, %v565_v3  ;;  %v568_v15 = vcvt.s32.f32 %v561_v41 }
 0x32f   :  { %2034 = vmatprep.subr.bf16.mxu0 %v2033_v43  ;;  %v458_v18 = vsub.s32 4294967266, %v453_v11  ;;  %v454_v33 = vsub.s32 32, %v453_v11  ;;  %vm601_vm7 = vcmp.gt.s32.totalorder %v600_v20, 0  ;;  %v455_v24 = vshll.u32 %v2692_v47, %v453_v11 }
 0x330   :  { %v2734_v26 = vsub.s32 %v754_v1, %v757_v5  ;;  %v602_v22 = vsel %vm601_vm7, %v600_v20, 0  ;;  %v569_v63 = vmul.f32 %v568_v15, %v566_v40  ;;  %v638_v5 = vshll.u32 %v598_v56, 8 }
 0x331   :  { %v459_v39 = vadd.s32 127, %v458_v18  ;;  %v604_v45 = vand.u32 31, %v602_v22  ;;  %v456_v46 = vshrl.u32 %v438_v52, %v454_v33  ;;  %v750_v15 = vadd.s32 %v2688_v25, %v2697_v35 }
 0x332   :  { %2036 = vmatpush3.bf16.msra.mxu0 %v2033_v43  ;;  %v760_v60 = vsub.s32 0, %v2734_v26  ;;  %v603_v43 = vshrl.u32 %v602_v22, 5  ;;  %vm696_vm2 = vcmp.lt.s32.totalorder %v2341_v51, 0  ;;  %vm2823_vm4 = vcmp.le.f32.partialorder %v694_v42, 0.7853982 }
 0x333   :  { %2038 = vmatprep.subr.bf16.mxu0 %v2037_v19  ;;  %v460_v31 = vshll.u32 %v459_v39, 23  ;;  %v605_v48 = vsub.s32 32, %v604_v45  ;;  %v457_v21 = vor.u32 %v456_v46, %v455_v24  ;;  %v607_v0 = vshll.u32 %v2128_v53, %v604_v45 }
 0x334   :  { %v1830_v61 = vmin.u32 %v760_v60, %v2734_v26  ;;  %v610_v1 = vshll.u32 %v2129_v55, %v604_v45  ;;  %v613_v47 = vshll.u32 %v2130_v58, %v604_v45  ;;  %v616_v11 = vshll.u32 %v2131_v62, %v604_v45 }
 0x335   :  { %v608_v14 = vshrl.u32 %v2129_v55, %v605_v48  ;;  %v611_v57 = vshrl.u32 %v2130_v58, %v605_v48  ;;  %v461_v59 = vor.u32 4788187, %v460_v31  ;;  %v614_v13 = vshrl.u32 %v2131_v62, %v605_v48 }
 0x336   :  { %2040 = vmatpush3.bf16.msra.mxu0 %v2037_v19  ;;  %v762_v38 = vclz %v1830_v61  ;;  %v617_v7 = vshrl.u32 %v2132_v4, %v605_v48  ;;  %v619_v19 = vshll.u32 %v2132_v4, %v604_v45  ;;  %v620_v55 = vshrl.u32 %v2133_v8, %v605_v48 }
 0x337   :  { %v609_v6 = vor.u32 %v608_v14, %v607_v0  ;;  %v612_v9 = vor.u32 %v611_v57, %v610_v1  ;;  %v615_v54 = vor.u32 %v614_v13, %v613_v47  ;;  %v462_v27 = vand.u32 2147483647, %v461_v59 }
 0x338   :  { %v1831_v50 = vadd.s32 4294967294, %v762_v38  ;;  %v618_v12 = vor.u32 %v617_v7, %v616_v11  ;;  %v464_v18 = vcvt.s32.f32 %v457_v21  ;;  %vm622_vm9 = vcmp.lt.s32.totalorder %v603_v43, 1 }
 0x339   :  { %v606_v58 = vshrl.u32 %v2128_v53, %v605_v48  ;;  %v621_v20 = vor.u32 %v620_v55, %v619_v19  ;;  %vm625_vm10 = vcmp.lt.s32.totalorder %v603_v43, 4  ;;  %v630_v37 = vsel %vm622_vm9, %v609_v6, %v612_v9 }
 0x33a   :  { %vm1832_vm8 = vcmp.lt.s32.totalorder %v1831_v50, 0  ;;  %vm624_vm11 = vcmp.lt.s32.totalorder %v603_v43, 3  ;;  %v627_v62 = vsel %vm625_vm10, %v615_v54, 2102212464  ;;  %v631_v33 = vsel %vm625_vm10, %v618_v12, 920167782 }
 0x33b   :  { %v765_v16 = vsel %vm1832_vm8, 0, %v1831_v50  ;;  %vm623_vm12 = vcmp.lt.s32.totalorder %v603_v43, 2  ;;  %v632_v44 = vsel %vm624_vm11, %v615_v54, %v631_v33  ;;  %v634_v39 = vsel %vm622_vm9, %v612_v9, %v615_v54 }
 0x33c   :  { %v770_v23 = vsub.s32 4294967266, %v765_v16  ;;  %v635_v22 = vsel %vm625_vm10, %v621_v20, 1326507024  ;;  %v465_v4 = vmul.f32 %v464_v18, %v462_v27  ;;  %v626_v52 = vsel %vm622_vm9, %v606_v58, %v609_v6 }
 0x33d   :  { %v633_v8 = vsel %vm623_vm12, %v630_v37, %v632_v44  ;;  %v636_v60 = vsel %vm624_vm11, %v618_v12, %v635_v22  ;;  %v628_v41 = vsel %vm624_vm11, %v612_v9, %v627_v62  ;;  %v570_v31 = vxor.u32 2147483648, %v569_v63 }
 0x33e   :  { %v637_v3 = vsel %vm623_vm12, %v634_v39, %v636_v60  ;;  %v2756_v45 = vmul.u32.u64.low %v638_v5, %v633_v8  ;;  %v2757_v46 = vmul.u32.u64.high %v638_v5, %v633_v8, %v2756_v45  ;;  %v771_v10 = vadd.s32 127, %v770_v23 }
 0x33f   :  { %v2760_v53 = vmul.u32.u64.low %v638_v5, %v637_v3  ;;  %v2761_v61 = vmul.u32.u64.high %v638_v5, %v637_v3, %v2760_v53  ;;  %v629_v48 = vsel %vm623_vm12, %v626_v52, %v628_v41  ;;  %v466_v24 = vxor.u32 2147483648, %v465_v4 }
 0x340   :  { %v766_v38 = vsub.s32 32, %v765_v16  ;;  %v648_v40 = vadd.s32 1, %v2757_v46  ;;  %v772_v14 = vshll.u32 %v771_v10, 23  ;;  %v645_v21 = vmul.u32 %v638_v5, %v629_v48 }
 0x341   :  { %vm647_vm13 = vc.u32 %v2761_v61, %v2756_v45  ;;  %v571_v50 = vsel %vm488_vm14, %v570_v31, %v569_v63  ;;  %v467_v57 = vsel %vm384_vm15, %v466_v24, %v465_v4  ;;  %v767_v13 = vshll.u32 %v2734_v26, %v765_v16 }
 0x342   :  { %v649_v56 = vsel %vm647_vm13, %v648_v40, %v2757_v46  ;;  %v768_v59 = vshrl.u32 %v750_v15, %v766_v38  ;;  %v574_v1 = vsel %vm2777_vm0, %v2331_v32, %v571_v50  ;;  %v773_v43 = vor.u32 4788187, %v772_v14 }
 0x343   :  { %v650_v0 = vadd.s32 %v649_v56, %v645_v21  ;;  %v470_v29 = vsel %vm2783_vm1, %v2465_v49, %v467_v57  ;;  %2102 = vcosq.f32 %v574_v1  ;;  %v468_v11 = vsub.s32 4, %v2659_v30 }
 0x344   :  { %v769_v7 = vor.u32 %v768_v59, %v767_v13  ;;  %2104 = vcosq.f32 %v470_v29  ;;  %v774_v36 = vand.u32 2147483647, %v773_v43  ;;  %v572_v54 = vsub.s32 4, %v2533_v2 }
 0x345   :  { %v651_v47 = vadd.s32 536870912, %v650_v0  ;;  %2106 = vsinq.f32 %v470_v29  ;;  %v469_v19 = vsel %vm384_vm15, %v468_v11, %v2659_v30  ;;  %v646_v60 = vadd.s32 %v2756_v45, %v2761_v61 }
 0x346   :  { %2108 = vsinq.f32 %v574_v1  ;;  %v776_v63 = vcvt.s32.f32 %v769_v7  ;;  %v573_v27 = vsel %vm488_vm14, %v572_v54, %v2533_v2  ;;  %v471_v20 = vsel %vm2783_vm1, 0, %v469_v19 }
 0x347   :  { %v2794_v6 = vshrl.u32 %v651_v47, 30  ;;  %v575_v23 = vsel %vm2777_vm0, 0, %v573_v27  ;;  %v891_v2 = vand.u32 3, %v471_v20  ;;  %v780_v50 = vsub.s32 4, %v2729_v17 }
 0x348   :  { %v777_v16 = vmul.f32 %v776_v63, %v774_v36  ;;  %v994_v39 = vand.u32 3, %v575_v23  ;;  %vm474_vm11 = vweird.f32 %v2465_v49  ;;  %vm578_vm12 = vweird.f32 %v2331_v32 }
 0x349   :  { %v653_v9 = vshll.u32 %v2794_v6, 30  ;;  %vm896_vm5 = vcmp.eq.s32.totalorder %v891_v2, 2  ;;  %vm893_vm8 = vcmp.eq.s32.totalorder %v891_v2, 0  ;;  %vm892_vm9 = vcmp.lt.s32.totalorder %v891_v2, 2 }
 0x34a   :  { %v778_v18 = vxor.u32 2147483648, %v777_v16  ;;  %vm996_vm6 = vcmp.eq.s32.totalorder %v994_v39, 0  ;;  %vm999_vm7 = vcmp.eq.s32.totalorder %v994_v39, 2  ;;  %vm995_vm10 = vcmp.lt.s32.totalorder %v994_v39, 2  ;;  %v1699_v39 = vld [vmem:[%s2936_s3 + $0x58] sm:$0xff] }
 0x34b   :  { %v654_v26 = vsub.s32 %v650_v0, %v653_v9  ;;  %v475_v0 = vadd.s32 3, %v471_v20  ;;  %v579_v1 = vadd.s32 3, %v575_v23  ;;  %v781_v43 = vsel %vm696_vm2, %v780_v50, %v2729_v17 }
 0x34c   :  { %v779_v44 = vsel %vm696_vm2, %v778_v18, %v777_v16  ;;  %vm2853_vm14 = vcmp.le.f32.partialorder %v590_v28, 0.7853982  ;;  %vm592_vm13 = vcmp.lt.s32.totalorder %v2713_v34, 0  ;;  %v783_v9 = vsel %vm2823_vm4, 0, %v781_v43  ;;  %v1661_v18 = vpop.permute.xlu0 %1660 }
 0x34d   :  { %v656_v12 = vsub.s32 0, %v654_v26  ;;  %v2805_v58 = vpop.eup %2102  ;;  %v782_v10 = vsel %vm2823_vm4, %v2341_v51, %v779_v44  ;;  %v476_v29 = vand.u32 3, %v475_v0  ;;  %v676_v11 = vsub.s32 4, %v2794_v6  ;;  %v1698_v44 = vld [vmem:[%s2936_s3 + $0x50] sm:$0xff] }
 0x34e   :  { %v2809_v37 = vpop.eup %2104  ;;  %v586_v53 = vxor.u32 2147483648, %v2805_v58  ;;  %2110 = vcosq.f32 %v782_v10  ;;  %v1200_v54 = vand.u32 3, %v783_v9 }
 0x34f   :  { %v1826_v55 = vmin.u32 %v656_v12, %v654_v26  ;;  %v2813_v33 = vpop.eup %2106  ;;  %v482_v22 = vxor.u32 2147483648, %v2809_v37  ;;  %2112 = vsinq.f32 %v782_v10  ;;  %vm478_vm15 = vcmp.eq.s32.totalorder %v476_v29, 0 }
 0x350   :  { %v2816_v30 = vpop.eup %2108  ;;  %v479_v8 = vxor.u32 2147483648, %v2813_v33  ;;  %vm481_vm0 = vcmp.eq.s32.totalorder %v476_v29, 2  ;;  %v677_v19 = vsel %vm592_vm13, %v676_v11, %v2794_v6  ;;  %vm1202_vm4 = vcmp.eq.s32.totalorder %v1200_v54, 0 }
 0x351   :  { %v658_v5 = vclz %v1826_v55  ;;  %v583_v46 = vxor.u32 2147483648, %v2816_v30  ;;  %v898_v45 = vsel %vm896_vm5, %v482_v22, %v2813_v33  ;;  %v1001_v15 = vsel %vm999_vm7, %v586_v53, %v2816_v30 }
 0x352   :  { %v895_v61 = vsel %vm893_vm8, %v2809_v37, %v479_v8  ;;  %v480_v55 = vsel %vm478_vm15, %v2809_v37, %v479_v8  ;;  %v483_v27 = vsel %vm481_vm0, %v482_v22, %v2813_v33  ;;  %vm1205_vm5 = vcmp.eq.s32.totalorder %v1200_v54, 2 }
 0x353   :  { %v1827_v62 = vadd.s32 4294967294, %v658_v5  ;;  %v998_v40 = vsel %vm996_vm6, %v2805_v58, %v583_v46  ;;  %v899_v21 = vsel %vm892_vm9, %v895_v61, %v898_v45  ;;  %v679_v23 = vsel %vm2853_vm14, 0, %v677_v19 }
 0x354   :  { %v1002_v56 = vsel %vm995_vm10, %v998_v40, %v1001_v15  ;;  %v900_v25 = vsel %vm474_vm11, nan, %v899_v21  ;;  %vm1201_vm7 = vcmp.lt.s32.totalorder %v1200_v54, 2  ;;  %vm1721_vm8 = vcmask 1042432  }
 0x355   :  { %vm1828_vm3 = vcmp.lt.s32.totalorder %v1827_v62, 0  ;;  %v1003_v13 = vsel %vm578_vm12, nan, %v1002_v56  ;;  %2114 = vrcp.f32 %v900_v25  ;;  %vm786_vm9 = vweird.f32 %v2341_v51  ;;  %v1675_v56 = vpop.permute.xlu1 %1674 }
 0x356   :  { %v661_v52 = vsel %vm1828_vm3, 0, %v1827_v62  ;;  %2116 = vrcp.f32 %v1003_v13  ;;  %vm477_vm3 = vcmp.lt.s32.totalorder %v476_v29, 2  ;;  %v683_v49 = vadd.s32 3, %v679_v23 }
 0x357   :  { %v662_v41 = vsub.s32 32, %v661_v52  ;;  %v666_v3 = vsub.s32 4294967266, %v661_v52  ;;  %v663_v42 = vshll.u32 %v654_v26, %v661_v52  ;;  %v580_v26 = vand.u32 3, %v579_v1 }
 0x358   :  { %v2858_v36 = vpop.eup %2110  ;;  %v484_v6 = vsel %vm477_vm3, %v480_v55, %v483_v27  ;;  %v2041_v52 = vpack.c.bf16 %v1699_v39, %v1698_v44 }
 0x359   :  { %v664_v31 = vshrl.u32 %v646_v60, %v662_v41  ;;  %v667_v48 = vadd.s32 127, %v666_v3  ;;  %v2865_v63 = vpop.eup %2112  ;;  %v794_v12 = vxor.u32 2147483648, %v2858_v36  ;;  %vm582_vm1 = vcmp.eq.s32.totalorder %v580_v26, 0 }
 0x35a   :  { %v791_v16 = vxor.u32 2147483648, %v2865_v63  ;;  %vm585_vm2 = vcmp.eq.s32.totalorder %v580_v26, 2  ;;  %v584_v5 = vsel %vm582_vm1, %v2805_v58, %v583_v46  ;;  %vm581_vm6 = vcmp.lt.s32.totalorder %v580_v26, 2  ;;  %2042 = vmatprep.subr.bf16.mxu0 %v2041_v52 }
 0x35b   :  { %v665_v24 = vor.u32 %v664_v31, %v663_v42  ;;  %v668_v38 = vshll.u32 %v667_v48, 23  ;;  %v587_v20 = vsel %vm585_vm2, %v586_v53, %v2816_v30  ;;  %v1207_v37 = vsel %vm1205_vm5, %v794_v12, %v2865_v63  ;;  %v1700_v53 = vld [vmem:[%s2936_s3 + $0x60] sm:$0x7]  ;;  %2044 = vmatpush3.bf16.msra.mxu0 %v2041_v52  ;;  %s2134_s3 = smov 29  }
 0x35c   :  { %v1204_v62 = vsel %vm1202_vm4, %v2858_v36, %v791_v16  ;;  %v588_v58 = vsel %vm581_vm6, %v584_v5, %v587_v20  ;;  %v1097_v30 = vand.u32 3, %v679_v23  ;;  %v485_v22 = vsel %vm474_vm11, nan, %v484_v6  ;;  %1968 = vmatprep.subr.msk.mxu0 %vm1721_vm8, %v1700_v53 }
 0x35d   :  { %v669_v14 = vor.u32 4788187, %v668_v38  ;;  %v672_v59 = vcvt.s32.f32 %v665_v24  ;;  %v1208_v4 = vsel %vm1201_vm7, %v1204_v62, %v1207_v37  ;;  %v589_v60 = vsel %vm578_vm12, nan, %v588_v58 }
 0x35e   :  { %v787_v46 = vadd.s32 3, %v783_v9  ;;  %v1209_v32 = vsel %vm786_vm9, nan, %v1208_v4  ;;  %vm1102_vm10 = vcmp.eq.s32.totalorder %v1097_v30, 2  ;;  %vm1099_vm11 = vcmp.eq.s32.totalorder %v1097_v30, 0 }
 0x35f   :  { %v670_v57 = vand.u32 2147483647, %v669_v14  ;;  %v2115_v33 = vpop.eup %2114  ;;  %vm682_vm12 = vweird.f32 %v2713_v34  ;;  %1969 = vmatpush3.msk.msra.mxu0 %vm1721_vm8, %v1700_v53  ;;  %vm1713_vm4 = vcmask 236544   ;;  %vm1716_vm5 = vcmask 809984  }
 0x360   :  { %v2117_v2 = vpop.eup %2116  ;;  %v1214_v3 = vmul.f32 %v2115_v33, %v485_v22  ;;  %v788_v38 = vand.u32 3, %v787_v46  ;;  %vm1802_vm6 = vcmask 19456   ;;  %vm1800_vm7 = vcmask 23552  }
 0x361   :  { %v673_v35 = vmul.f32 %v672_v59, %v670_v57  ;;  %v1215_v42 = vmul.f32 %v2117_v2, %v589_v60  ;;  %v684_v59 = vand.u32 3, %v683_v49 }
 0x362   :  { %vm790_vm15 = vcmp.eq.s32.totalorder %v788_v38, 0  ;;  %vm789_vm2 = vcmp.lt.s32.totalorder %v788_v38, 2 }
 0x363   :  { %v674_v47 = vxor.u32 2147483648, %v673_v35  ;;  %vm686_vm0 = vcmp.eq.s32.totalorder %v684_v59, 0  ;;  %vm689_vm1 = vcmp.eq.s32.totalorder %v684_v59, 2  ;;  %v792_v29 = vsel %vm790_vm15, %v2858_v36, %v791_v16 }
 0x364   :  { %vm685_vm3 = vcmp.lt.s32.totalorder %v684_v59, 2 }
 0x365   :  { %v675_v17 = vsel %vm592_vm13, %v674_v47, %v673_v35  ;;  %vm793_vm13 = vcmp.eq.s32.totalorder %v788_v38, 2 }
 0x366   :  { %v678_v28 = vsel %vm2853_vm14, %v2713_v34, %v675_v17  ;;  %vm1098_vm14 = vcmp.lt.s32.totalorder %v1097_v30, 2  ;;  %v795_v47 = vsel %vm793_vm13, %v794_v12, %v2865_v63 }
 0x367   :  { %2118 = vcosq.f32 %v678_v28  ;;  %v796_v11 = vsel %vm789_vm2, %v792_v29, %v795_v47 }
 0x368   :  { %2120 = vsinq.f32 %v678_v28  ;;  %v797_v12 = vsel %vm786_vm9, nan, %v796_v11 }
 0x369   :  { %2122 = vrcp.f32 %v1209_v32 }
 0x371   :  { %v2119_v8 = vpop.eup %2118 }
 0x372   :  { %v2121_v10 = vpop.eup %2120  ;;  %v690_v31 = vxor.u32 2147483648, %v2119_v8 }
 0x373   :  { %v687_v45 = vxor.u32 2147483648, %v2121_v10  ;;  %v2123_v28 = vpop.eup %2122 }
 0x374   :  { %v1104_v24 = vsel %vm1102_vm10, %v690_v31, %v2121_v10  ;;  %v691_v9 = vsel %vm689_vm1, %v690_v31, %v2121_v10  ;;  %v1217_v36 = vmul.f32 %v2123_v28, %v797_v12 }
 0x375   :  { %v1101_v40 = vsel %vm1099_vm11, %v2119_v8, %v687_v45  ;;  %v688_v7 = vsel %vm686_vm0, %v2119_v8, %v687_v45 }
 0x376   :  { %v1105_v14 = vsel %vm1098_vm14, %v1101_v40, %v1104_v24  ;;  %v692_v26 = vsel %vm685_vm3, %v688_v7, %v691_v9 }
 0x377   :  { %v1106_v0 = vsel %vm682_vm12, nan, %v1105_v14  ;;  %v693_v63 = vsel %vm682_vm12, nan, %v692_v26 }
 0x378   :  { %2124 = vrcp.f32 %v1106_v0 }
 0x380   :  { %v1427_v41 = vpop.permute.xlu0 %1426 }
 0x381   :  { %v1432_v48 = vmul.f32 %v1427_v41, %v1214_v3  ;;  %v1433_v61 = vmul.f32 %v1427_v41, %v1215_v42 }
 0x382   :  { %v2125_v54 = vpop.eup %2124 }
 0x383   :  { %v1666_v57 = vmul.f32 %v1661_v18, %v1432_v48  ;;  %v1667_v25 = vmul.f32 %v1661_v18, %v1433_v61  ;;  %v1216_v16 = vmul.f32 %v2125_v54, %v693_v63 }
 0x384   :  { %v1647_v15 = vpop.permute.xlu0 %1646 }
 0x385   :  { %v1652_v21 = vmul.f32 %v1647_v15, %v1214_v3  ;;  %v1653_v50 = vmul.f32 %v1647_v15, %v1215_v42 }
 0x387   :  { %v1680_v35 = vmul.f32 %v1675_v56, %v1652_v21  ;;  %v1681_v1 = vmul.f32 %v1675_v56, %v1653_v50 }
 0x388   :  { %v1663_v55 = vpop.permute.xlu0 %1662 }
 0x389   :  { %v1685_v13 = vsub.f32 %v1667_v25, %v1681_v1  ;;  %v1684_v43 = vsub.f32 %v1666_v57, %v1680_v35 }
 0x38b   :  { %1707 = vrot.lane.b32.xlu1 %v1685_v13, %s2134_s3  ;;  %1705 = vrot.lane.b32.xlu0 %v1684_v43, %s2134_s3  ;;  %v1429_v17 = vpop.permute.xlu1 %1428 }
 0x38c   :  { %v1434_v27 = vmul.f32 %v1429_v17, %v1216_v16  ;;  %v1435_v18 = vmul.f32 %v1429_v17, %v1217_v36 }
 0x38e   :  { %v1668_v6 = vmul.f32 %v1663_v55, %v1434_v27  ;;  %v1669_v62 = vmul.f32 %v1663_v55, %v1435_v18 }
 0x38f   :  { %v1649_v19 = vpop.permute.xlu1 %1648 }
 0x390   :  { %v1654_v5 = vmul.f32 %v1649_v19, %v1216_v16  ;;  %v1655_v20 = vmul.f32 %v1649_v19, %v1217_v36 }
 0x393   :  { %v1677_v23 = vpop.permute.xlu1 %1676 }
 0x394   :  { %v1682_v37 = vmul.f32 %v1677_v23, %v1654_v5  ;;  %v1683_v33 = vmul.f32 %v1677_v23, %v1655_v20 }
 0x396   :  { %v1686_v58 = vsub.f32 %v1668_v6, %v1682_v37  ;;  %v1687_v2 = vsub.f32 %v1669_v62, %v1683_v33 }
 0x398   :  { %1711 = vrot.lane.b32.xlu1 %v1687_v2, %s2134_s3  ;;  %1709 = vrot.lane.b32.xlu0 %v1686_v58, %s2134_s3 }
 0x3fd   :  { %v1708_v51 = vpop.permute.xlu1 %1707  ;;  %v1706_v34 = vpop.permute.xlu0 %1705 }
 0x3fe   :  { %v1714_v30 = vsel %vm1713_vm4, %v1706_v34, %v1708_v51 }
 0x3ff   :  { %1970 = vmatprep.mubr.msk.f32.mxu0 %vm1716_vm5, %v1714_v30 }
 0x40a   :  { %v1712_v44 = vpop.permute.xlu1 %1711  ;;  %v1710_v39 = vpop.permute.xlu0 %1709 }
 0x40b   :  { %v1715_v22 = vsel %vm1713_vm4, %v1710_v39, %v1712_v44 }
 0x40c   :  { %1971 = vmatmul.mubr.msk.f32.vlgmr.msra.gmra.mrb[2].mxu0 %vm1716_vm5, %v1715_v22 }
 0x4df   :  { %v1972_v4 = vpop.f32.mrb[2].mxu0 }
 0x4e0   :  { %1803 = vst.msk [vmem:[%s2937_s11 + $0x8] sm:$0xf] %vm1802_vm6, %v1972_v4  ;;  %v1791_v52 = vpop.f32.mrb[3].mxu0 }
 0x4e1   :  { %1801 = vst.msk [vmem:[%s2937_s11] sm:$0xff] %vm1800_vm7, %v1791_v52 }

// kernel: neural_laplace_forward.2
= control target key start
LH: loop header
LB: loop body
LE: loop exit
PB: predicated region body
PF: predicated region fallthrough
CT: control target
= control target key end

     0   :  { %vm55_vm0 = vcmask 1041408   ;;  %vm48_vm1 = vcmask 15360   ;;  %v3203_v0 = vmov 0.0|0.0   ;;  %vm3204_vm2 = vmmov 0   ;;  %s3708_s2 = inlined_call_operand.vmem [shape: f32[32,96], index: 2, kind: input, shape index: {}]   ;;  %s3709_s1 = inlined_call_operand.vmem [shape: f32[2,96], index: 1, kind: input, shape index: {}]   ;;  %s3710_s0 = inlined_call_operand.vmem [shape: f32[16,2], index: 0, kind: input, shape index: {}]   ;;  %s3711_s4 = inlined_call_operand.vmem [shape: f32[1,32], index: 4, kind: input, shape index: {}]   ;;  %s3712_s3 = inlined_call_operand.vmem [shape: f32[1,96], index: 3, kind: input, shape index: {}]   ;;  %s3713_s6 = inlined_call_operand.vmem [shape: f32[32,96], index: 6, kind: input, shape index: {}]   ;;  %s3714_s5 = inlined_call_operand.vmem [shape: f32[32,96], index: 5, kind: input, shape index: {}]   ;;  %s3715_s8 = inlined_call_operand.vmem [shape: f32[1,32], index: 8, kind: input, shape index: {}]   ;;  %s3716_s7 = inlined_call_operand.vmem [shape: f32[1,96], index: 7, kind: input, shape index: {}]   ;;  %s3717_s9 = inlined_call_operand.vmem [shape: f32[32,2], index: 9, kind: input, shape index: {}]   ;;  %s3718_s10 = inlined_call_operand.vmem [shape: f32[1,2], index: 10, kind: input, shape index: {}]   ;;  %s3719_s11 = inlined_call_operand.vmem [shape: f32[2,2], index: 11, kind: output, shape index: {}]  }
   0x1   :  { %2951 = vmatprep.subr.bf16.mxu1 %v3203_v0  ;;  %v135_v1 = vld [vmem:[%s3708_s2] sm:$0xff]  ;;  %v136_v2 = vld [vmem:[%s3708_s2 + $0x8] sm:$0xff]  ;;  %v137_v3 = vld [vmem:[%s3708_s2 + $0x10] sm:$0xff]  ;;  %v3205_v8 = vmov 0.0   ;;  %vm139_vm3 = vcmask 261120   ;;  %vm2490_vm4 = vcmask 9216  }
   0x2   :  { %v3278_v4 = vpack.c.bf16 %v136_v2, %v135_v1  ;;  %v138_v5 = vld [vmem:[%s3708_s2 + $0x18] sm:$0xff]  ;;  %v40_v6 = vld [vmem:[%s3709_s1] sm:$0x3]  ;;  %2684 = vmatprep.mubr.msk.f32.mxu1 %vm3204_vm2, %v3205_v8  ;;  %v39_v9 = vld [vmem:[%s3710_s0 + $0x8] sm:$0xff]  ;;  %s3206_s1 = smov 64  }
   0x3   :  { %v38_v7 = vld [vmem:[%s3710_s0] sm:$0xff]  ;;  %2671 = vmatprep.subr.msk.mxu0 %vm55_vm0, %v40_v6  ;;  %v3300_v11 = vpack.c.bf16 %v138_v5, %v137_v3  ;;  %v341_v33 = vld [vmem:[%s3713_s6 + $0x8] sm:$0xff]  ;;  %v342_v34 = vld [vmem:[%s3713_s6 + $0x10] sm:$0xff] }
   0x4   :  { %2673 = vmatprep.mubr.msk.f32.mxu0 %vm48_vm1, %v38_v7  ;;  %v2501_v10 = vld [vmem:[%s3711_s4] ss:$0 sm:$0xff]  ;;  %2953 = vmatpush3.bf16.msra.mxu1 %v3278_v4  ;;  %v343_v36 = vld [vmem:[%s3713_s6 + $0x18] sm:$0xff]  ;;  %v253_v38 = vld [vmem:[%s3714_s5 + $0x8] sm:$0xff] }
   0x5   :  { %2672 = vmatpush3.msk.msra.mxu0 %vm55_vm0, %v40_v6  ;;  %2954 = vmatprep.subr.bf16.mxu1 %v3203_v0  ;;  %v2496_v13 = vld [vmem:[%s3712_s3] ss:$0 sm:$0xff]  ;;  %v254_v40 = vld [vmem:[%s3714_s5 + $0x10] sm:$0xff]  ;;  %v255_v41 = vld [vmem:[%s3714_s5 + $0x18] sm:$0xff]  ;;  %v3357_v42 = vpack.c.bf16 %v343_v36, %v342_v34 }
   0x6   :  { %2674 = vmatmul.mubr.msk.f32.vlgmr.msra.gmra.mrb[0].mxu0 %vm48_vm1, %v39_v9  ;;  %228 = vrot.lane.b32.xlu0 %v2501_v10, %s3206_s1  ;;  %v340_v32 = vld [vmem:[%s3713_s6] sm:$0xff]  ;;  %v3361_v43 = vpack.c.bf16 %v255_v41, %v254_v40  ;;  %s3207_s6 = smov 96  }
   0x7   :  { %2957 = vmatprep.subr.bf16.mxu0 %v3203_v0  ;;  %2695 = vmatprep.mubr.msk.f32.mxu0 %vm3204_vm2, %v3205_v8  ;;  %v3337_v35 = vpack.c.bf16 %v341_v33, %v340_v32  ;;  %v252_v37 = vld [vmem:[%s3714_s5] sm:$0xff] }
   0x8   :  { %2956 = vmatpush3.bf16.msra.mxu1 %v3300_v11  ;;  %v3348_v39 = vpack.c.bf16 %v253_v38, %v252_v37  ;;  %v2505_v50 = vld [vmem:[%s3715_s8] ss:$0 sm:$0xff] }
   0x9   :  { %2963 = vmatprep.subr.bf16.mxu1 %v3203_v0  ;;  %v3405_v57 = vld [vmem:[%s3716_s7] ss:$0 sm:$0xff] }
   0xa   :  { %2959 = vmatpush3.bf16.msra.mxu0 %v3348_v39 }
   0xb   :  { %2685 = vmatmul.mubr.f32.vlgmr.msra.gmra.mrb[0].mxu1 %v3205_v8  ;;  %2960 = vmatprep.subr.bf16.mxu0 %v3203_v0 }
   0xc   :  { %2706 = vmatprep.mubr.msk.f32.mxu1 %vm3204_vm2, %v3205_v8  ;;  %2965 = vmatpush3.bf16.msra.mxu1 %v3337_v35 }
   0xd   :  { %2966 = vmatprep.subr.bf16.mxu1 %v3203_v0 }
   0xe   :  { %2962 = vmatpush3.bf16.msra.mxu0 %v3361_v43 }
   0xf   :  { %2969 = vmatprep.subr.bf16.mxu0 %v3203_v0 }
  0x10   :  { %2968 = vmatpush3.bf16.msra.mxu1 %v3357_v42 }
  0x11   :  { %2975 = vmatprep.subr.bf16.mxu1 %v3203_v0 }
  0x13   :  { %2707 = vmatmul.mubr.f32.vlgmr.msra.gmra.mrb[2].mxu1 %v3205_v8 }
  0x14   :  { %2977 = vmatpush3.bf16.msra.mxu1 %v3348_v39  ;;  %2728 = vmatprep.mubr.msk.f32.mxu1 %vm3204_vm2, %v3205_v8 }
  0x15   :  { %2978 = vmatprep.subr.bf16.mxu1 %v3203_v0 }
  0x18   :  { %2980 = vmatpush3.bf16.msra.mxu1 %v3361_v43 }
  0x19   :  { %2987 = vmatprep.subr.bf16.mxu1 %v3203_v0 }
  0x78   :  { %v3319_v16 = vpop.permute.xlu0 %228 }
  0xd9   :  { %v2675_v12 = vpop.f32.mrb[0].mxu0 }
  0xda   :  { %v125_v14 = vpop.f32.mrb[1].mxu0  ;;  %v3323_v21 = vadd.f32 %v2675_v12, %v2496_v13 }
  0xdb   :  { %v3317_v15 = vadd.f32 %v2496_v13, %v125_v14 }
  0xde   :  { %v209_v17 = vpop.f32.mrb[0].mxu1 }
  0xdf   :  { %v231_v18 = vadd.f32 %v3319_v16, %v209_v17  ;;  %v2686_v19 = vpop.f32.mrb[1].mxu1  ;;  %v214_v22 = vrot.slane %v209_v17, 2 }
  0xe1   :  { %v233_v20 = vrot.slane %v231_v18, 2  ;;  %v216_v23 = vadd.f32 %v214_v22, %v3323_v21 }
  0xe3   :  { %234 = vrot.lane.b32.xlu0 %v233_v20, %s3206_s1  ;;  %v2500_v24 = vmul.f32 -1.442695, %v216_v23 }
  0xe5   :  { %3106 = vpow2.f32 %v2500_v24 }
  0xe6   :  { %v410_v52 = vpop.f32.mrb[2].mxu1 }
  0xe7   :  { %v2708_v53 = vpop.f32.mrb[3].mxu1 }
  0xef   :  { %v3107_v25 = vpop.eup %3106 }
  0xf0   :  { %v220_v26 = vadd.f32 1.0, %v3107_v25 }
  0xf2   :  { %3108 = vrcp.f32 %v220_v26 }
  0xfc   :  { %v3109_v27 = vpop.eup %3108 }
  0xfd   :  { %v244_v45 = vsub.f32 1.0, %v3109_v27  ;;  %v250_v47 = vmul.f32 0.0, %v3109_v27 }
 0x155   :  { %v235_v28 = vpop.permute.xlu0 %234 }
 0x156   :  { %v237_v29 = vmul.f32 %v3109_v27, %v235_v28 }
 0x158   :  { %239 = vrot.lane.b32.xlu1 %v237_v29, %s3206_s1 }
 0x1ca   :  { %v240_v30 = vpop.permute.xlu1 %239 }
 0x1cb   :  { %v242_v31 = vadd.f32 %v240_v30, %v3323_v21 }
 0x1cd   :  { %3110 = vtanh.f32 %v242_v31 }
 0x1d7   :  { %v3111_v44 = vpop.eup %3110 }
 0x1d8   :  { %246 = vrot.lane.b32.xlu1 %v3111_v44, %s3207_s6 }
 0x1dc   :  { %426 = vrot.lane.b32.xlu1 %v2505_v50, %s3206_s1 }
 0x24a   :  { %v247_v46 = vpop.permute.xlu1 %246 }
 0x24b   :  { %v249_v48 = vmul.f32 %v247_v46, %v244_v45 }
 0x24d   :  { %v3376_v49 = vadd.f32 %v250_v47, %v249_v48 }
 0x24e   :  { %v3384_v54 = vpop.permute.xlu1 %426 }
 0x24f   :  { %v264_v51 = vrot.slane %v3376_v49, 6  ;;  %v429_v55 = vadd.f32 %v3384_v54, %v410_v52  ;;  %v548_v34 = vrot.slane %v3376_v49, 2 }
 0x251   :  { %265 = vrot.lane.b32.xlu0 %v264_v51, %s3207_s6  ;;  %431 = vrot.lane.b32.xlu1 %v429_v55, %s3206_s1 }
 0x2c3   :  { %v266_v56 = vpop.permute.xlu0 %265  ;;  %v432_v7 = vpop.permute.xlu1 %431 }
 0x2c4   :  { %2696 = vmatmul.mubr.msk.f32.vlgmr.msra.gmra.mrb[2].mxu0 %vm139_vm3, %v266_v56 }
 0x2c5   :  { %2971 = vmatpush3.bf16.msra.mxu0 %v3278_v4  ;;  %2717 = vmatprep.mubr.msk.f32.mxu0 %vm3204_vm2, %v3205_v8 }
 0x2c6   :  { %2972 = vmatprep.subr.bf16.mxu0 %v3203_v0 }
 0x2c9   :  { %2974 = vmatpush3.bf16.msra.mxu0 %v3300_v11 }
 0x2ca   :  { %2981 = vmatprep.subr.bf16.mxu0 %v3203_v0 }
 0x2cc   :  { %2718 = vmatmul.mubr.msk.f32.vlgmr.msra.gmra.mrb[4].mxu0 %vm139_vm3, %v266_v56 }
 0x2cd   :  { %2983 = vmatpush3.bf16.msra.mxu0 %v3337_v35  ;;  %2739 = vmatprep.mubr.msk.f32.mxu0 %vm3204_vm2, %v3205_v8 }
 0x2ce   :  { %2984 = vmatprep.subr.bf16.mxu0 %v3203_v0 }
 0x2d1   :  { %2986 = vmatpush3.bf16.msra.mxu0 %v3357_v42 }
 0x2d2   :  { %2993 = vmatprep.subr.bf16.mxu0 %v3203_v0 }
 0x397   :  { %v335_v58 = vpop.f32.mrb[2].mxu0 }
 0x398   :  { %v336_v59 = vadd.f32 %v3405_v57, %v335_v58  ;;  %v2697_v60 = vpop.f32.mrb[3].mxu0 }
 0x39a   :  { %v414_v61 = vadd.f32 %v410_v52, %v336_v59 }
 0x39c   :  { %v2504_v62 = vmul.f32 -1.442695, %v414_v61 }
 0x39e   :  { %3112 = vpow2.f32 %v2504_v62 }
 0x39f   :  { %v515_v63 = vpop.f32.mrb[4].mxu0 }
 0x3a0   :  { %v529_v1 = vadd.f32 %v515_v63, %v3319_v16  ;;  %v2719_v2 = vpop.f32.mrb[5].mxu0  ;;  %v520_v12 = vrot.slane %v515_v63, 4 }
 0x3a2   :  { %v531_v3 = vrot.slane %v529_v1, 4  ;;  %v522_v13 = vadd.f32 %v520_v12, %v3323_v21 }
 0x3a4   :  { %532 = vrot.lane.b32.xlu0 %v531_v3, %s3206_s1  ;;  %v2507_v14 = vmul.f32 -1.442695, %v522_v13 }
 0x3a8   :  { %v3113_v5 = vpop.eup %3112 }
 0x3a9   :  { %v418_v6 = vadd.f32 1.0, %v3113_v5 }
 0x3ab   :  { %3114 = vrcp.f32 %v418_v6 }
 0x3ac   :  { %3116 = vpow2.f32 %v2507_v14 }
 0x3b5   :  { %v3115_v9 = vpop.eup %3114 }
 0x3b6   :  { %v434_v10 = vmul.f32 %v3115_v9, %v432_v7  ;;  %v3117_v17 = vpop.eup %3116  ;;  %v441_v29 = vsub.f32 1.0, %v3115_v9  ;;  %v447_v31 = vmul.f32 0.0, %v3115_v9 }
 0x3b7   :  { %v526_v18 = vadd.f32 1.0, %v3117_v17 }
 0x3b8   :  { %436 = vrot.lane.b32.xlu1 %v434_v10, %s3206_s1 }
 0x3b9   :  { %3118 = vrcp.f32 %v526_v18 }
 0x3c3   :  { %v3119_v19 = vpop.eup %3118 }
 0x3c4   :  { %v542_v36 = vsub.f32 1.0, %v3119_v19  ;;  %v550_v38 = vmul.f32 %v3119_v19, %v548_v34 }
 0x416   :  { %v533_v20 = vpop.permute.xlu0 %532 }
 0x417   :  { %v535_v22 = vmul.f32 %v3119_v19, %v533_v20 }
 0x419   :  { %537 = vrot.lane.b32.xlu0 %v535_v22, %s3206_s1 }
 0x42a   :  { %v437_v23 = vpop.permute.xlu1 %436 }
 0x42b   :  { %v439_v24 = vadd.f32 %v437_v23, %v336_v59 }
 0x42d   :  { %3120 = vtanh.f32 %v439_v24 }
 0x437   :  { %v3121_v25 = vpop.eup %3120 }
 0x438   :  { %443 = vrot.lane.b32.xlu1 %v3121_v25, %s3207_s6 }
 0x48b   :  { %v538_v26 = vpop.permute.xlu0 %537 }
 0x48c   :  { %v540_v27 = vadd.f32 %v538_v26, %v3323_v21 }
 0x48e   :  { %3122 = vtanh.f32 %v540_v27 }
 0x498   :  { %v3123_v28 = vpop.eup %3122 }
 0x499   :  { %544 = vrot.lane.b32.xlu0 %v3123_v28, %s3207_s6 }
 0x4aa   :  { %v444_v30 = vpop.permute.xlu1 %443 }
 0x4ab   :  { %v446_v32 = vmul.f32 %v444_v30, %v441_v29 }
 0x4ad   :  { %v3416_v33 = vadd.f32 %v447_v31, %v446_v32 }
 0x4af   :  { %629 = vrot.lane.b32.xlu1 %v3416_v33, %s3207_s6 }
 0x50b   :  { %v545_v37 = vpop.permute.xlu0 %544 }
 0x50c   :  { %v547_v40 = vmul.f32 %v545_v37, %v542_v36 }
 0x50e   :  { %v3421_v41 = vadd.f32 %v550_v38, %v547_v40 }
 0x510   :  { %v553_v44 = vrot.slane %v3421_v41, 4  ;;  %v829_v28 = vrot.slane %v3421_v41, 2 }
 0x512   :  { %554 = vrot.lane.b32.xlu0 %v553_v44, %s3207_s6 }
 0x521   :  { %v630_v45 = vpop.permute.xlu1 %629 }
 0x522   :  { %2740 = vmatmul.mubr.msk.f32.vlgmr.msra.gmra.mrb[6].mxu0 %vm139_vm3, %v630_v45 }
 0x523   :  { %2995 = vmatpush3.bf16.msra.mxu0 %v3348_v39  ;;  %2761 = vmatprep.mubr.msk.f32.mxu0 %vm3204_vm2, %v3205_v8 }
 0x524   :  { %2996 = vmatprep.subr.bf16.mxu0 %v3203_v0 }
 0x527   :  { %2998 = vmatpush3.bf16.msra.mxu0 %v3361_v43 }
 0x528   :  { %3005 = vmatprep.subr.bf16.mxu0 %v3203_v0 }
 0x584   :  { %v555_v46 = vpop.permute.xlu0 %554 }
 0x585   :  { %2729 = vmatmul.mubr.msk.f32.vlgmr.msra.gmra.mrb[4].mxu1 %vm139_vm3, %v555_v46 }
 0x586   :  { %2989 = vmatpush3.bf16.msra.mxu1 %v3278_v4  ;;  %2750 = vmatprep.mubr.msk.f32.mxu1 %vm3204_vm2, %v3205_v8 }
 0x587   :  { %2990 = vmatprep.subr.bf16.mxu1 %v3203_v0 }
 0x58a   :  { %2992 = vmatpush3.bf16.msra.mxu1 %v3300_v11 }
 0x58b   :  { %2999 = vmatprep.subr.bf16.mxu1 %v3203_v0 }
 0x58d   :  { %2751 = vmatmul.mubr.msk.f32.vlgmr.msra.gmra.mrb[6].mxu1 %vm139_vm3, %v555_v46 }
 0x58e   :  { %3001 = vmatpush3.bf16.msra.mxu1 %v3337_v35  ;;  %2772 = vmatprep.mubr.msk.f32.mxu1 %vm3204_vm2, %v3205_v8 }
 0x58f   :  { %3002 = vmatprep.subr.bf16.mxu1 %v3203_v0 }
 0x592   :  { %3004 = vmatpush3.bf16.msra.mxu1 %v3357_v42 }
 0x593   :  { %3011 = vmatprep.subr.bf16.mxu1 %v3203_v0 }
 0x5f5   :  { %v699_v47 = vpop.f32.mrb[6].mxu0 }
 0x5f6   :  { %v710_v48 = vadd.f32 %v699_v47, %v3384_v54  ;;  %v2741_v49 = vpop.f32.mrb[7].mxu0 }
 0x5f8   :  { %712 = vrot.lane.b32.xlu1 %v710_v48, %s3206_s1 }
 0x658   :  { %v624_v50 = vpop.f32.mrb[4].mxu1 }
 0x659   :  { %v625_v51 = vadd.f32 %v3405_v57, %v624_v50  ;;  %v2730_v52 = vpop.f32.mrb[5].mxu1 }
 0x65b   :  { %v703_v53 = vadd.f32 %v699_v47, %v625_v51 }
 0x65d   :  { %v2510_v55 = vmul.f32 -1.442695, %v703_v53 }
 0x65f   :  { %3124 = vpow2.f32 %v2510_v55 }
 0x660   :  { %v796_v56 = vpop.f32.mrb[6].mxu1 }
 0x661   :  { %v810_v58 = vadd.f32 %v796_v56, %v3319_v16  ;;  %v2752_v59 = vpop.f32.mrb[7].mxu1  ;;  %v801_v3 = vrot.slane %v796_v56, 6 }
 0x663   :  { %v812_v60 = vrot.slane %v810_v58, 6  ;;  %v803_v5 = vadd.f32 %v801_v3, %v3323_v21 }
 0x665   :  { %813 = vrot.lane.b32.xlu0 %v812_v60, %s3206_s1  ;;  %v2512_v6 = vmul.f32 -1.442695, %v803_v5 }
 0x669   :  { %v3125_v61 = vpop.eup %3124 }
 0x66a   :  { %v707_v62 = vadd.f32 1.0, %v3125_v61  ;;  %v713_v1 = vpop.permute.xlu1 %712 }
 0x66c   :  { %3126 = vrcp.f32 %v707_v62 }
 0x66d   :  { %3128 = vpow2.f32 %v2512_v6 }
 0x676   :  { %v3127_v63 = vpop.eup %3126 }
 0x677   :  { %v715_v2 = vmul.f32 %v3127_v63, %v713_v1  ;;  %v3129_v7 = vpop.eup %3128  ;;  %v722_v23 = vsub.f32 1.0, %v3127_v63  ;;  %v728_v25 = vmul.f32 %v3127_v63, %v3416_v33 }
 0x678   :  { %v807_v9 = vadd.f32 1.0, %v3129_v7 }
 0x679   :  { %717 = vrot.lane.b32.xlu1 %v715_v2, %s3206_s1 }
 0x67a   :  { %3130 = vrcp.f32 %v807_v9 }
 0x684   :  { %v3131_v10 = vpop.eup %3130 }
 0x685   :  { %v823_v29 = vsub.f32 1.0, %v3131_v10  ;;  %v831_v31 = vmul.f32 %v3131_v10, %v829_v28 }
 0x6d7   :  { %v814_v12 = vpop.permute.xlu0 %813 }
 0x6d8   :  { %v816_v13 = vmul.f32 %v3131_v10, %v814_v12 }
 0x6da   :  { %818 = vrot.lane.b32.xlu0 %v816_v13, %s3206_s1 }
 0x6eb   :  { %v718_v14 = vpop.permute.xlu1 %717 }
 0x6ec   :  { %v720_v17 = vadd.f32 %v718_v14, %v625_v51 }
 0x6ee   :  { %3132 = vtanh.f32 %v720_v17 }
 0x6f8   :  { %v3133_v18 = vpop.eup %3132 }
 0x6f9   :  { %724 = vrot.lane.b32.xlu1 %v3133_v18, %s3207_s6 }
 0x74c   :  { %v819_v19 = vpop.permute.xlu0 %818 }
 0x74d   :  { %v821_v20 = vadd.f32 %v819_v19, %v3323_v21 }
 0x74f   :  { %3134 = vtanh.f32 %v821_v20 }
 0x759   :  { %v3135_v22 = vpop.eup %3134 }
 0x75a   :  { %825 = vrot.lane.b32.xlu0 %v3135_v22, %s3207_s6 }
 0x76b   :  { %v725_v24 = vpop.permute.xlu1 %724 }
 0x76c   :  { %v727_v26 = vmul.f32 %v725_v24, %v722_v23 }
 0x76e   :  { %v3458_v27 = vadd.f32 %v728_v25, %v727_v26 }
 0x770   :  { %910 = vrot.lane.b32.xlu1 %v3458_v27, %s3207_s6 }
 0x7cc   :  { %v826_v30 = vpop.permute.xlu0 %825 }
 0x7cd   :  { %v828_v32 = vmul.f32 %v826_v30, %v823_v29 }
 0x7cf   :  { %v3463_v34 = vadd.f32 %v831_v31, %v828_v32 }
 0x7d1   :  { %v834_v36 = vrot.slane %v3463_v34, 2 }
 0x7d3   :  { %835 = vrot.lane.b32.xlu0 %v834_v36, %s3207_s6 }
 0x7e2   :  { %v911_v33 = vpop.permute.xlu1 %910 }
 0x7e3   :  { %2773 = vmatmul.mubr.msk.f32.vlgmr.msra.gmra.mrb[8].mxu1 %vm139_vm3, %v911_v33 }
 0x7e4   :  { %3013 = vmatpush3.bf16.msra.mxu1 %v3348_v39  ;;  %2794 = vmatprep.mubr.msk.f32.mxu1 %vm3204_vm2, %v3205_v8 }
 0x7e5   :  { %3014 = vmatprep.subr.bf16.mxu1 %v3203_v0 }
 0x7e8   :  { %3016 = vmatpush3.bf16.msra.mxu1 %v3361_v43 }
 0x7e9   :  { %3023 = vmatprep.subr.bf16.mxu1 %v3203_v0 }
 0x845   :  { %v836_v37 = vpop.permute.xlu0 %835 }
 0x846   :  { %2762 = vmatmul.mubr.msk.f32.vlgmr.msra.gmra.mrb[8].mxu0 %vm139_vm3, %v836_v37 }
 0x847   :  { %3007 = vmatpush3.bf16.msra.mxu0 %v3278_v4  ;;  %2783 = vmatprep.mubr.msk.f32.mxu0 %vm3204_vm2, %v3205_v8 }
 0x848   :  { %3008 = vmatprep.subr.bf16.mxu0 %v3203_v0 }
 0x84b   :  { %3010 = vmatpush3.bf16.msra.mxu0 %v3300_v11 }
 0x84c   :  { %3017 = vmatprep.subr.bf16.mxu0 %v3203_v0 }
 0x84e   :  { %2784 = vmatmul.mubr.msk.f32.vlgmr.msra.gmra.mrb[10].mxu0 %vm139_vm3, %v836_v37 }
 0x84f   :  { %3019 = vmatpush3.bf16.msra.mxu0 %v3337_v35  ;;  %2805 = vmatprep.mubr.msk.f32.mxu0 %vm3204_vm2, %v3205_v8 }
 0x850   :  { %3020 = vmatprep.subr.bf16.mxu0 %v3203_v0 }
 0x853   :  { %3022 = vmatpush3.bf16.msra.mxu0 %v3357_v42 }
 0x854   :  { %3029 = vmatprep.subr.bf16.mxu0 %v3203_v0 }
 0x8b6   :  { %v980_v38 = vpop.f32.mrb[8].mxu1 }
 0x8b7   :  { %v991_v40 = vadd.f32 %v980_v38, %v3384_v54  ;;  %v2774_v41 = vpop.f32.mrb[9].mxu1 }
 0x8b9   :  { %993 = vrot.lane.b32.xlu1 %v991_v40, %s3206_s1 }
 0x919   :  { %v905_v44 = vpop.f32.mrb[8].mxu0 }
 0x91a   :  { %v906_v45 = vadd.f32 %v3405_v57, %v905_v44  ;;  %v2763_v46 = vpop.f32.mrb[9].mxu0 }
 0x91c   :  { %v984_v47 = vadd.f32 %v980_v38, %v906_v45 }
 0x91e   :  { %v2515_v48 = vmul.f32 -1.442695, %v984_v47 }
 0x920   :  { %3136 = vpow2.f32 %v2515_v48 }
 0x921   :  { %v1077_v49 = vpop.f32.mrb[10].mxu0 }
 0x922   :  { %v1088_v50 = vadd.f32 %v1077_v49, %v3319_v16  ;;  %v2785_v51 = vpop.f32.mrb[11].mxu0  ;;  %v1081_v59 = vadd.f32 %v1077_v49, %v3323_v21 }
 0x924   :  { %1090 = vrot.lane.b32.xlu0 %v1088_v50, %s3206_s1  ;;  %v2517_v60 = vmul.f32 -1.442695, %v1081_v59 }
 0x92a   :  { %v3137_v52 = vpop.eup %3136 }
 0x92b   :  { %v988_v53 = vadd.f32 1.0, %v3137_v52  ;;  %v994_v56 = vpop.permute.xlu1 %993 }
 0x92d   :  { %3138 = vrcp.f32 %v988_v53 }
 0x92e   :  { %3140 = vpow2.f32 %v2517_v60 }
 0x937   :  { %v3139_v55 = vpop.eup %3138 }
 0x938   :  { %v996_v58 = vmul.f32 %v3139_v55, %v994_v56  ;;  %v3141_v61 = vpop.eup %3140  ;;  %v1003_v12 = vsub.f32 1.0, %v3139_v55  ;;  %v1009_v14 = vmul.f32 %v3139_v55, %v3458_v27 }
 0x939   :  { %v1085_v62 = vadd.f32 1.0, %v3141_v61 }
 0x93a   :  { %998 = vrot.lane.b32.xlu1 %v996_v58, %s3206_s1 }
 0x93b   :  { %3142 = vrcp.f32 %v1085_v62 }
 0x945   :  { %v3143_v63 = vpop.eup %3142 }
 0x946   :  { %v1100_v19 = vsub.f32 1.0, %v3143_v63  ;;  %v1107_v22 = vmul.f32 %v3143_v63, %v834_v36 }
 0x996   :  { %v1091_v1 = vpop.permute.xlu0 %1090 }
 0x997   :  { %v1093_v2 = vmul.f32 %v3143_v63, %v1091_v1 }
 0x999   :  { %1095 = vrot.lane.b32.xlu0 %v1093_v2, %s3206_s1 }
 0x9ac   :  { %v999_v3 = vpop.permute.xlu1 %998 }
 0x9ad   :  { %v1001_v5 = vadd.f32 %v999_v3, %v906_v45 }
 0x9af   :  { %3144 = vtanh.f32 %v1001_v5 }
 0x9b9   :  { %v3145_v6 = vpop.eup %3144 }
 0x9ba   :  { %1005 = vrot.lane.b32.xlu1 %v3145_v6, %s3207_s6 }
 0xa0b   :  { %v1096_v7 = vpop.permute.xlu0 %1095 }
 0xa0c   :  { %v1098_v9 = vadd.f32 %v1096_v7, %v3323_v21 }
 0xa0e   :  { %3146 = vtanh.f32 %v1098_v9 }
 0xa18   :  { %v3147_v10 = vpop.eup %3146 }
 0xa19   :  { %1102 = vrot.lane.b32.xlu0 %v3147_v10, %s3207_s6 }
 0xa2c   :  { %v1006_v13 = vpop.permute.xlu1 %1005 }
 0xa2d   :  { %v1008_v17 = vmul.f32 %v1006_v13, %v1003_v12 }
 0xa2f   :  { %v3502_v18 = vadd.f32 %v1009_v14, %v1008_v17 }
 0xa31   :  { %1185 = vrot.lane.b32.xlu1 %v3502_v18, %s3207_s6 }
 0xa8b   :  { %v1103_v20 = vpop.permute.xlu0 %1102 }
 0xa8c   :  { %v1105_v21 = vmul.f32 %v1103_v20, %v1100_v19 }
 0xa8e   :  { %v3508_v23 = vadd.f32 %v1107_v22, %v1105_v21 }
 0xa90   :  { %1110 = vrot.lane.b32.xlu0 %v3508_v23, %s3207_s6  ;;  %v1385_v6 = vrot.slane %v3508_v23, 2 }
 0xaa3   :  { %v1186_v24 = vpop.permute.xlu1 %1185 }
 0xaa4   :  { %2806 = vmatmul.mubr.msk.f32.vlgmr.msra.gmra.mrb[12].mxu0 %vm139_vm3, %v1186_v24 }
 0xaa5   :  { %3031 = vmatpush3.bf16.msra.mxu0 %v3348_v39  ;;  %2827 = vmatprep.mubr.msk.f32.mxu0 %vm3204_vm2, %v3205_v8 }
 0xaa6   :  { %3032 = vmatprep.subr.bf16.mxu0 %v3203_v0 }
 0xaa9   :  { %3034 = vmatpush3.bf16.msra.mxu0 %v3361_v43 }
 0xaaa   :  { %3041 = vmatprep.subr.bf16.mxu0 %v3203_v0 }
 0xb02   :  { %v1111_v25 = vpop.permute.xlu0 %1110 }
 0xb03   :  { %2795 = vmatmul.mubr.msk.f32.vlgmr.msra.gmra.mrb[10].mxu1 %vm139_vm3, %v1111_v25 }
 0xb04   :  { %3025 = vmatpush3.bf16.msra.mxu1 %v3278_v4  ;;  %2816 = vmatprep.mubr.msk.f32.mxu1 %vm3204_vm2, %v3205_v8 }
 0xb05   :  { %3026 = vmatprep.subr.bf16.mxu1 %v3203_v0 }
 0xb08   :  { %3028 = vmatpush3.bf16.msra.mxu1 %v3300_v11 }
 0xb09   :  { %3035 = vmatprep.subr.bf16.mxu1 %v3203_v0 }
 0xb0b   :  { %2817 = vmatmul.mubr.msk.f32.vlgmr.msra.gmra.mrb[12].mxu1 %vm139_vm3, %v1111_v25 }
 0xb0c   :  { %3037 = vmatpush3.bf16.msra.mxu1 %v3337_v35  ;;  %2838 = vmatprep.mubr.msk.f32.mxu1 %vm3204_vm2, %v3205_v8 }
 0xb0d   :  { %3038 = vmatprep.subr.bf16.mxu1 %v3203_v0 }
 0xb10   :  { %3040 = vmatpush3.bf16.msra.mxu1 %v3357_v42 }
 0xb11   :  { %3047 = vmatprep.subr.bf16.mxu1 %v3203_v0 }
 0xb77   :  { %v1255_v26 = vpop.f32.mrb[12].mxu0 }
 0xb78   :  { %v1266_v27 = vadd.f32 %v1255_v26, %v3384_v54  ;;  %v2807_v28 = vpop.f32.mrb[13].mxu0 }
 0xb7a   :  { %1268 = vrot.lane.b32.xlu1 %v1266_v27, %s3206_s1 }
 0xbd6   :  { %v1180_v29 = vpop.f32.mrb[10].mxu1 }
 0xbd7   :  { %v1181_v30 = vadd.f32 %v3405_v57, %v1180_v29  ;;  %v2796_v31 = vpop.f32.mrb[11].mxu1 }
 0xbd9   :  { %v1259_v32 = vadd.f32 %v1255_v26, %v1181_v30 }
 0xbdb   :  { %v2520_v34 = vmul.f32 -1.442695, %v1259_v32 }
 0xbdd   :  { %3148 = vpow2.f32 %v2520_v34 }
 0xbde   :  { %v1352_v36 = vpop.f32.mrb[12].mxu1 }
 0xbdf   :  { %v1366_v33 = vadd.f32 %v1352_v36, %v3319_v16  ;;  %v2818_v37 = vpop.f32.mrb[13].mxu1  ;;  %v1357_v47 = vrot.slane %v1352_v36, 2 }
 0xbe1   :  { %v1368_v38 = vrot.slane %v1366_v33, 2  ;;  %v1359_v48 = vadd.f32 %v1357_v47, %v3317_v15 }
 0xbe3   :  { %1369 = vrot.lane.b32.xlu0 %v1368_v38, %s3206_s1  ;;  %v2522_v49 = vmul.f32 -1.442695, %v1359_v48 }
 0xbe7   :  { %v3149_v40 = vpop.eup %3148 }
 0xbe8   :  { %v1263_v41 = vadd.f32 1.0, %v3149_v40 }
 0xbea   :  { %3150 = vrcp.f32 %v1263_v41 }
 0xbeb   :  { %3152 = vpow2.f32 %v2522_v49 }
 0xbec   :  { %v1269_v45 = vpop.permute.xlu1 %1268 }
 0xbf4   :  { %v3151_v44 = vpop.eup %3150 }
 0xbf5   :  { %v1271_v46 = vmul.f32 %v3151_v44, %v1269_v45  ;;  %v3153_v50 = vpop.eup %3152  ;;  %v1278_v63 = vsub.f32 1.0, %v3151_v44  ;;  %v1284_v2 = vmul.f32 %v3151_v44, %v3502_v18 }
 0xbf6   :  { %v1363_v51 = vadd.f32 1.0, %v3153_v50 }
 0xbf7   :  { %1273 = vrot.lane.b32.xlu1 %v1271_v46, %s3206_s1 }
 0xbf8   :  { %3154 = vrcp.f32 %v1363_v51 }
 0xc02   :  { %v3155_v52 = vpop.eup %3154 }
 0xc03   :  { %v1379_v7 = vsub.f32 1.0, %v3155_v52  ;;  %v1387_v10 = vmul.f32 %v3155_v52, %v1385_v6 }
 0xc55   :  { %v1370_v53 = vpop.permute.xlu0 %1369 }
 0xc56   :  { %v1372_v55 = vmul.f32 %v3155_v52, %v1370_v53 }
 0xc58   :  { %1374 = vrot.lane.b32.xlu0 %v1372_v55, %s3206_s1 }
 0xc69   :  { %v1274_v56 = vpop.permute.xlu1 %1273 }
 0xc6a   :  { %v1276_v58 = vadd.f32 %v1274_v56, %v1181_v30 }
 0xc6c   :  { %3156 = vtanh.f32 %v1276_v58 }
 0xc76   :  { %v3157_v59 = vpop.eup %3156 }
 0xc77   :  { %1280 = vrot.lane.b32.xlu1 %v3157_v59, %s3207_s6 }
 0xcca   :  { %v1375_v60 = vpop.permute.xlu0 %1374 }
 0xccb   :  { %v1377_v61 = vadd.f32 %v1375_v60, %v3317_v15 }
 0xccd   :  { %3158 = vtanh.f32 %v1377_v61 }
 0xcd7   :  { %v3159_v62 = vpop.eup %3158 }
 0xcd8   :  { %1381 = vrot.lane.b32.xlu0 %v3159_v62, %s3207_s6 }
 0xce9   :  { %v1281_v1 = vpop.permute.xlu1 %1280 }
 0xcea   :  { %v1283_v3 = vmul.f32 %v1281_v1, %v1278_v63 }
 0xcec   :  { %v3545_v5 = vadd.f32 %v1284_v2, %v1283_v3 }
 0xcee   :  { %1466 = vrot.lane.b32.xlu0 %v3545_v5, %s3207_s6 }
 0xd4a   :  { %v1382_v9 = vpop.permute.xlu0 %1381 }
 0xd4b   :  { %v1384_v12 = vmul.f32 %v1382_v9, %v1379_v7 }
 0xd4d   :  { %v3550_v13 = vadd.f32 %v1387_v10, %v1384_v12 }
 0xd4f   :  { %v1390_v14 = vrot.slane %v3550_v13, 6  ;;  %v1666_v61 = vrot.slane %v3550_v13, 2 }
 0xd51   :  { %1391 = vrot.lane.b32.xlu1 %v1390_v14, %s3207_s6 }
 0xd60   :  { %v1467_v17 = vpop.permute.xlu0 %1466 }
 0xd61   :  { %2839 = vmatmul.mubr.msk.f32.vlgmr.msra.gmra.mrb[14].mxu1 %vm139_vm3, %v1467_v17 }
 0xd62   :  { %3049 = vmatpush3.bf16.msra.mxu1 %v3348_v39  ;;  %2860 = vmatprep.mubr.msk.f32.mxu1 %vm3204_vm2, %v3205_v8 }
 0xd63   :  { %3050 = vmatprep.subr.bf16.mxu1 %v3203_v0 }
 0xd66   :  { %3052 = vmatpush3.bf16.msra.mxu1 %v3361_v43 }
 0xd67   :  { %3059 = vmatprep.subr.bf16.mxu1 %v3203_v0 }
 0xdc3   :  { %v1392_v18 = vpop.permute.xlu1 %1391 }
 0xdc4   :  { %2828 = vmatmul.mubr.msk.f32.vlgmr.msra.gmra.mrb[14].mxu0 %vm139_vm3, %v1392_v18 }
 0xdc5   :  { %3043 = vmatpush3.bf16.msra.mxu0 %v3278_v4  ;;  %2849 = vmatprep.mubr.msk.f32.mxu0 %vm3204_vm2, %v3205_v8 }
 0xdc6   :  { %3044 = vmatprep.subr.bf16.mxu0 %v3203_v0 }
 0xdc9   :  { %3046 = vmatpush3.bf16.msra.mxu0 %v3300_v11 }
 0xdca   :  { %3053 = vmatprep.subr.bf16.mxu0 %v3203_v0 }
 0xdcc   :  { %2850 = vmatmul.mubr.msk.f32.vlgmr.msra.gmra.mrb[16].mxu0 %vm139_vm3, %v1392_v18 }
 0xdcd   :  { %3055 = vmatpush3.bf16.msra.mxu0 %v3337_v35  ;;  %2871 = vmatprep.mubr.msk.f32.mxu0 %vm3204_vm2, %v3205_v8 }
 0xdce   :  { %3056 = vmatprep.subr.bf16.mxu0 %v3203_v0 }
 0xdd1   :  { %3058 = vmatpush3.bf16.msra.mxu0 %v3357_v42 }
 0xdd2   :  { %3065 = vmatprep.subr.bf16.mxu0 %v3203_v0 }
 0xe34   :  { %v1536_v19 = vpop.f32.mrb[14].mxu1 }
 0xe35   :  { %v1547_v20 = vadd.f32 %v1536_v19, %v3384_v54  ;;  %v2840_v22 = vpop.f32.mrb[15].mxu1 }
 0xe37   :  { %1549 = vrot.lane.b32.xlu0 %v1547_v20, %s3206_s1 }
 0xe97   :  { %v1461_v21 = vpop.f32.mrb[14].mxu0 }
 0xe98   :  { %v1462_v23 = vadd.f32 %v3405_v57, %v1461_v21  ;;  %v2829_v24 = vpop.f32.mrb[15].mxu0 }
 0xe9a   :  { %v1540_v25 = vadd.f32 %v1536_v19, %v1462_v23 }
 0xe9c   :  { %v2525_v26 = vmul.f32 -1.442695, %v1540_v25 }
 0xe9e   :  { %3160 = vpow2.f32 %v2525_v26 }
 0xe9f   :  { %v1633_v27 = vpop.f32.mrb[16].mxu0 }
 0xea0   :  { %v1647_v28 = vadd.f32 %v1633_v27, %v3319_v16  ;;  %v2851_v29 = vpop.f32.mrb[17].mxu0  ;;  %v1638_v37 = vrot.slane %v1633_v27, 4 }
 0xea2   :  { %v1649_v30 = vrot.slane %v1647_v28, 4  ;;  %v1640_v38 = vadd.f32 %v1638_v37, %v3317_v15 }
 0xea4   :  { %1650 = vrot.lane.b32.xlu1 %v1649_v30, %s3206_s1  ;;  %v2527_v40 = vmul.f32 -1.442695, %v1640_v38 }
 0xea8   :  { %v3161_v31 = vpop.eup %3160 }
 0xea9   :  { %v1544_v32 = vadd.f32 1.0, %v3161_v31  ;;  %v1550_v36 = vpop.permute.xlu0 %1549 }
 0xeab   :  { %3162 = vrcp.f32 %v1544_v32 }
 0xeac   :  { %3164 = vpow2.f32 %v2527_v40 }
 0xeb5   :  { %v3163_v34 = vpop.eup %3162 }
 0xeb6   :  { %v1552_v33 = vmul.f32 %v3163_v34, %v1550_v36  ;;  %v3165_v41 = vpop.eup %3164  ;;  %v1559_v55 = vsub.f32 1.0, %v3163_v34  ;;  %v1565_v58 = vmul.f32 %v3163_v34, %v3545_v5 }
 0xeb7   :  { %v1644_v44 = vadd.f32 1.0, %v3165_v41 }
 0xeb8   :  { %1554 = vrot.lane.b32.xlu0 %v1552_v33, %s3206_s1 }
 0xeb9   :  { %3166 = vrcp.f32 %v1644_v44 }
 0xec3   :  { %v3167_v45 = vpop.eup %3166 }
 0xec4   :  { %v1660_v62 = vsub.f32 1.0, %v3167_v45  ;;  %v1668_v1 = vmul.f32 %v3167_v45, %v1666_v61 }
 0xf16   :  { %v1651_v46 = vpop.permute.xlu1 %1650 }
 0xf17   :  { %v1653_v47 = vmul.f32 %v3167_v45, %v1651_v46 }
 0xf19   :  { %1655 = vrot.lane.b32.xlu1 %v1653_v47, %s3206_s1 }
 0xf2a   :  { %v1555_v48 = vpop.permute.xlu0 %1554 }
 0xf2b   :  { %v1557_v49 = vadd.f32 %v1555_v48, %v1462_v23 }
 0xf2d   :  { %3168 = vtanh.f32 %v1557_v49 }
 0xf37   :  { %v3169_v50 = vpop.eup %3168 }
 0xf38   :  { %1561 = vrot.lane.b32.xlu0 %v3169_v50, %s3207_s6 }
 0xf8b   :  { %v1656_v51 = vpop.permute.xlu1 %1655 }
 0xf8c   :  { %v1658_v52 = vadd.f32 %v1656_v51, %v3317_v15 }
 0xf8e   :  { %3170 = vtanh.f32 %v1658_v52 }
 0xf98   :  { %v3171_v53 = vpop.eup %3170 }
 0xf99   :  { %1662 = vrot.lane.b32.xlu1 %v3171_v53, %s3207_s6 }
 0xfaa   :  { %v1562_v56 = vpop.permute.xlu0 %1561 }
 0xfab   :  { %v1564_v59 = vmul.f32 %v1562_v56, %v1559_v55 }
 0xfad   :  { %v3587_v60 = vadd.f32 %v1565_v58, %v1564_v59 }
 0xfaf   :  { %1747 = vrot.lane.b32.xlu0 %v3587_v60, %s3207_s6 }
0x100b   :  { %v1663_v63 = vpop.permute.xlu1 %1662 }
0x100c   :  { %v1665_v2 = vmul.f32 %v1663_v63, %v1660_v62 }
0x100e   :  { %v3592_v3 = vadd.f32 %v1668_v1, %v1665_v2 }
0x1010   :  { %v1671_v6 = vrot.slane %v3592_v3, 4  ;;  %v1947_v52 = vrot.slane %v3592_v3, 2 }
0x1012   :  { %1672 = vrot.lane.b32.xlu1 %v1671_v6, %s3207_s6 }
0x1021   :  { %v1748_v7 = vpop.permute.xlu0 %1747 }
0x1022   :  { %2872 = vmatmul.mubr.msk.f32.vlgmr.msra.gmra.mrb[18].mxu0 %vm139_vm3, %v1748_v7 }
0x1023   :  { %3067 = vmatpush3.bf16.msra.mxu0 %v3348_v39  ;;  %2893 = vmatprep.mubr.msk.f32.mxu0 %vm3204_vm2, %v3205_v8 }
0x1024   :  { %3068 = vmatprep.subr.bf16.mxu0 %v3203_v0 }
0x1027   :  { %3070 = vmatpush3.bf16.msra.mxu0 %v3361_v43 }
0x1028   :  { %3077 = vmatprep.subr.bf16.mxu0 %v3203_v0 }
0x1084   :  { %v1673_v5 = vpop.permute.xlu1 %1672 }
0x1085   :  { %2861 = vmatmul.mubr.msk.f32.vlgmr.msra.gmra.mrb[16].mxu1 %vm139_vm3, %v1673_v5 }
0x1086   :  { %3061 = vmatpush3.bf16.msra.mxu1 %v3278_v4  ;;  %2882 = vmatprep.mubr.msk.f32.mxu1 %vm3204_vm2, %v3205_v8 }
0x1087   :  { %3062 = vmatprep.subr.bf16.mxu1 %v3203_v0 }
0x108a   :  { %3064 = vmatpush3.bf16.msra.mxu1 %v3300_v11 }
0x108b   :  { %3071 = vmatprep.subr.bf16.mxu1 %v3203_v0 }
0x108d   :  { %2883 = vmatmul.mubr.msk.f32.vlgmr.msra.gmra.mrb[18].mxu1 %vm139_vm3, %v1673_v5 }
0x108e   :  { %3073 = vmatpush3.bf16.msra.mxu1 %v3337_v35  ;;  %2904 = vmatprep.mubr.msk.f32.mxu1 %vm3204_vm2, %v3205_v8 }
0x108f   :  { %3074 = vmatprep.subr.bf16.mxu1 %v3203_v0 }
0x1092   :  { %3076 = vmatpush3.bf16.msra.mxu1 %v3357_v42 }
0x1093   :  { %3083 = vmatprep.subr.bf16.mxu1 %v3203_v0 }
0x10f5   :  { %v1817_v9 = vpop.f32.mrb[18].mxu0 }
0x10f6   :  { %v1828_v10 = vadd.f32 %v1817_v9, %v3384_v54  ;;  %v2873_v12 = vpop.f32.mrb[19].mxu0 }
0x10f8   :  { %1830 = vrot.lane.b32.xlu0 %v1828_v10, %s3206_s1 }
0x1158   :  { %v1742_v13 = vpop.f32.mrb[16].mxu1 }
0x1159   :  { %v1743_v14 = vadd.f32 %v3405_v57, %v1742_v13  ;;  %v2862_v17 = vpop.f32.mrb[17].mxu1 }
0x115b   :  { %v1821_v18 = vadd.f32 %v1817_v9, %v1743_v14 }
0x115d   :  { %v2530_v19 = vmul.f32 -1.442695, %v1821_v18 }
0x115f   :  { %3172 = vpow2.f32 %v2530_v19 }
0x1160   :  { %v1914_v20 = vpop.f32.mrb[18].mxu1 }
0x1161   :  { %v1928_v22 = vadd.f32 %v1914_v20, %v3319_v16  ;;  %v2884_v21 = vpop.f32.mrb[19].mxu1  ;;  %v1919_v29 = vrot.slane %v1914_v20, 6 }
0x1163   :  { %v1930_v23 = vrot.slane %v1928_v22, 6  ;;  %v1921_v30 = vadd.f32 %v1919_v29, %v3317_v15 }
0x1165   :  { %1931 = vrot.lane.b32.xlu1 %v1930_v23, %s3206_s1  ;;  %v2532_v31 = vmul.f32 -1.442695, %v1921_v30 }
0x1169   :  { %v3173_v24 = vpop.eup %3172 }
0x116a   :  { %v1825_v25 = vadd.f32 1.0, %v3173_v24  ;;  %v1831_v27 = vpop.permute.xlu0 %1830 }
0x116c   :  { %3174 = vrcp.f32 %v1825_v25 }
0x116d   :  { %3176 = vpow2.f32 %v2532_v31 }
0x1176   :  { %v3175_v26 = vpop.eup %3174 }
0x1177   :  { %v1833_v28 = vmul.f32 %v3175_v26, %v1831_v27  ;;  %v3177_v32 = vpop.eup %3176  ;;  %v1840_v47 = vsub.f32 1.0, %v3175_v26  ;;  %v1846_v49 = vmul.f32 %v3175_v26, %v3587_v60 }
0x1178   :  { %v1925_v34 = vadd.f32 1.0, %v3177_v32 }
0x1179   :  { %1835 = vrot.lane.b32.xlu0 %v1833_v28, %s3206_s1 }
0x117a   :  { %3178 = vrcp.f32 %v1925_v34 }
0x1184   :  { %v3179_v36 = vpop.eup %3178 }
0x1185   :  { %v1941_v53 = vsub.f32 1.0, %v3179_v36  ;;  %v1949_v56 = vmul.f32 %v3179_v36, %v1947_v52 }
0x11d7   :  { %v1932_v33 = vpop.permute.xlu1 %1931 }
0x11d8   :  { %v1934_v37 = vmul.f32 %v3179_v36, %v1932_v33 }
0x11da   :  { %1936 = vrot.lane.b32.xlu1 %v1934_v37, %s3206_s1 }
0x11eb   :  { %v1836_v38 = vpop.permute.xlu0 %1835 }
0x11ec   :  { %v1838_v40 = vadd.f32 %v1836_v38, %v1743_v14 }
0x11ee   :  { %3180 = vtanh.f32 %v1838_v40 }
0x11f8   :  { %v3181_v41 = vpop.eup %3180 }
0x11f9   :  { %1842 = vrot.lane.b32.xlu0 %v3181_v41, %s3207_s6 }
0x124c   :  { %v1937_v44 = vpop.permute.xlu1 %1936 }
0x124d   :  { %v1939_v45 = vadd.f32 %v1937_v44, %v3317_v15 }
0x124f   :  { %3182 = vtanh.f32 %v1939_v45  ;;  %v3202_v45 = vld [vmem:[%s3716_s7] ss:$0 sm:$0xff] }
0x1259   :  { %v3183_v46 = vpop.eup %3182 }
0x125a   :  { %1943 = vrot.lane.b32.xlu1 %v3183_v46, %s3207_s6 }
0x126b   :  { %v1843_v48 = vpop.permute.xlu0 %1842 }
0x126c   :  { %v1845_v50 = vmul.f32 %v1843_v48, %v1840_v47 }
0x126e   :  { %v3629_v51 = vadd.f32 %v1846_v49, %v1845_v50 }
0x1270   :  { %2028 = vrot.lane.b32.xlu0 %v3629_v51, %s3207_s6 }
0x12cc   :  { %v1944_v55 = vpop.permute.xlu1 %1943 }
0x12cd   :  { %v1946_v58 = vmul.f32 %v1944_v55, %v1941_v53 }
0x12cf   :  { %v3634_v59 = vadd.f32 %v1949_v56, %v1946_v58  ;;  %v2404_v56 = vld [vmem:[%s3717_s9] sm:$0xff]  ;;  %v2405_v58 = vld [vmem:[%s3717_s9 + $0x8] sm:$0xff] }
0x12d1   :  { %v1952_v61 = vrot.slane %v3634_v59, 2  ;;  %v2406_v59 = vld [vmem:[%s3717_s9 + $0x10] sm:$0xff] }
0x12d3   :  { %1953 = vrot.lane.b32.xlu1 %v1952_v61, %s3207_s6 }
0x12e2   :  { %v2029_v60 = vpop.permute.xlu0 %2028 }
0x12e3   :  { %2905 = vmatmul.mubr.msk.f32.vlgmr.msra.gmra.mrb[20].mxu1 %vm139_vm3, %v2029_v60  ;;  %v2407_v60 = vld [vmem:[%s3717_s9 + $0x18] sm:$0xff] }
0x12e4   :  { %3085 = vmatpush3.bf16.msra.mxu1 %v3348_v39  ;;  %2926 = vmatprep.mubr.msk.f32.mxu1 %vm3204_vm2, %v3205_v8 }
0x12e5   :  { %3086 = vmatprep.subr.bf16.mxu1 %v3203_v0 }
0x12e8   :  { %3088 = vmatpush3.bf16.msra.mxu1 %v3361_v43 }
0x12e9   :  { %3095 = vmatprep.subr.bf16.mxu1 %v3203_v0 }
0x1345   :  { %v1954_v62 = vpop.permute.xlu1 %1953 }
0x1346   :  { %2894 = vmatmul.mubr.msk.f32.vlgmr.msra.gmra.mrb[20].mxu0 %vm139_vm3, %v1954_v62 }
0x1347   :  { %3079 = vmatpush3.bf16.msra.mxu0 %v3278_v4  ;;  %2915 = vmatprep.mubr.msk.f32.mxu0 %vm3204_vm2, %v3205_v8 }
0x1348   :  { %3080 = vmatprep.subr.bf16.mxu0 %v3203_v0 }
0x134b   :  { %3082 = vmatpush3.bf16.msra.mxu0 %v3300_v11 }
0x134c   :  { %3089 = vmatprep.subr.bf16.mxu0 %v3203_v0 }
0x134e   :  { %2916 = vmatmul.mubr.msk.f32.vlgmr.msra.gmra.mrb[22].mxu0 %vm139_vm3, %v1954_v62  ;;  %v3099_v62 = vpack.c.bf16 %v2407_v60, %v2406_v59 }
0x134f   :  { %3091 = vmatpush3.bf16.msra.mxu0 %v3337_v35  ;;  %2937 = vmatprep.mubr.msk.f32.mxu0 %vm3204_vm2, %v3205_v8 }
0x1350   :  { %3092 = vmatprep.subr.bf16.mxu0 %v3203_v0 }
0x1353   :  { %3094 = vmatpush3.bf16.msra.mxu0 %v3357_v42 }
0x13b6   :  { %v2098_v4 = vpop.f32.mrb[20].mxu1 }
0x13b7   :  { %v2109_v39 = vadd.f32 %v2098_v4, %v3384_v54  ;;  %v2906_v43 = vpop.f32.mrb[21].mxu1 }
0x13b9   :  { %2111 = vrot.lane.b32.xlu0 %v2109_v39, %s3206_s1 }
0x1419   :  { %v2023_v11 = vpop.f32.mrb[20].mxu0 }
0x141a   :  { %v2024_v63 = vadd.f32 %v3405_v57, %v2023_v11  ;;  %v2895_v1 = vpop.f32.mrb[21].mxu0 }
0x141c   :  { %v2102_v2 = vadd.f32 %v2098_v4, %v2024_v63 }
0x141e   :  { %v2535_v3 = vmul.f32 -1.442695, %v2102_v2 }
0x1420   :  { %3184 = vpow2.f32 %v2535_v3  ;;  %v2541_v3 = vld [vmem:[%s3718_s10] ss:$0 sm:$0xff] }
0x1421   :  { %v2195_v35 = vpop.f32.mrb[22].mxu0 }
0x1422   :  { %v2206_v6 = vadd.f32 %v2195_v35, %v3319_v16  ;;  %v2917_v7 = vpop.f32.mrb[23].mxu0  ;;  %v2199_v57 = vadd.f32 %v2195_v35, %v3317_v15 }
0x1424   :  { %2208 = vrot.lane.b32.xlu1 %v2206_v6, %s3206_s1  ;;  %v2537_v13 = vmul.f32 -1.442695, %v2199_v57 }
0x142a   :  { %v3185_v42 = vpop.eup %3184 }
0x142b   :  { %v2106_v5 = vadd.f32 1.0, %v3185_v42  ;;  %v2112_v10 = vpop.permute.xlu0 %2111 }
0x142d   :  { %3186 = vrcp.f32 %v2106_v5 }
0x142e   :  { %3188 = vpow2.f32 %v2537_v13 }
0x1437   :  { %v3187_v9 = vpop.eup %3186 }
0x1438   :  { %v2114_v12 = vmul.f32 %v3187_v9, %v2112_v10  ;;  %v3189_v14 = vpop.eup %3188  ;;  %v2121_v26 = vsub.f32 1.0, %v3187_v9  ;;  %v2127_v28 = vmul.f32 %v3187_v9, %v3629_v51 }
0x1439   :  { %v2203_v17 = vadd.f32 1.0, %v3189_v14 }
0x143a   :  { %2116 = vrot.lane.b32.xlu0 %v2114_v12, %s3206_s1 }
0x143b   :  { %3190 = vrcp.f32 %v2203_v17 }
0x1445   :  { %v3191_v18 = vpop.eup %3190 }
0x1446   :  { %v2218_v31 = vsub.f32 1.0, %v3191_v18  ;;  %v2225_v34 = vmul.f32 %v3191_v18, %v1952_v61  ;;  %v3096_v61 = vpack.c.bf16 %v2405_v58, %v2404_v56 }
0x1496   :  { %v2209_v16 = vpop.permute.xlu1 %2208 }
0x1497   :  { %v2211_v19 = vmul.f32 %v3191_v18, %v2209_v16 }
0x1499   :  { %2213 = vrot.lane.b32.xlu1 %v2211_v19, %s3206_s1 }
0x14ac   :  { %v2117_v20 = vpop.permute.xlu0 %2116 }
0x14ad   :  { %v2119_v22 = vadd.f32 %v2117_v20, %v2024_v63 }
0x14af   :  { %3192 = vtanh.f32 %v2119_v22 }
0x14b9   :  { %v3193_v21 = vpop.eup %3192 }
0x14ba   :  { %2123 = vrot.lane.b32.xlu0 %v3193_v21, %s3207_s6 }
0x150b   :  { %v2214_v23 = vpop.permute.xlu1 %2213 }
0x150c   :  { %v2216_v24 = vadd.f32 %v2214_v23, %v3317_v15 }
0x150e   :  { %3194 = vtanh.f32 %v2216_v24 }
0x1518   :  { %v3195_v25 = vpop.eup %3194 }
0x1519   :  { %2220 = vrot.lane.b32.xlu1 %v3195_v25, %s3207_s6 }
0x152c   :  { %v2124_v27 = vpop.permute.xlu0 %2123 }
0x152d   :  { %v2126_v29 = vmul.f32 %v2124_v27, %v2121_v26 }
0x152f   :  { %v2128_v30 = vadd.f32 %v2127_v28, %v2126_v29 }
0x1531   :  { %2303 = vrot.lane.b32.xlu0 %v2128_v30, %s3207_s6 }
0x158b   :  { %v2221_v32 = vpop.permute.xlu1 %2220 }
0x158c   :  { %v2223_v36 = vmul.f32 %v2221_v32, %v2218_v31 }
0x158e   :  { %v2226_v33 = vadd.f32 %v2225_v34, %v2223_v36 }
0x1590   :  { %2228 = vrot.lane.b32.xlu1 %v2226_v33, %s3207_s6 }
0x15a3   :  { %v2304_v15 = vpop.permute.xlu0 %2303 }
0x15a4   :  { %2938 = vmatmul.mubr.msk.f32.vlgmr.msra.gmra.mrb[24].mxu0 %vm139_vm3, %v2304_v15 }
0x1602   :  { %v2229_v37 = vpop.permute.xlu1 %2228 }
0x1603   :  { %2927 = vmatmul.mubr.msk.f32.vlgmr.msra.gmra.mrb[22].mxu1 %vm139_vm3, %v2229_v37 }
0x1604   :  { %2948 = vmatprep.mubr.msk.f32.mxu1 %vm3204_vm2, %v3205_v8  ;;  %3097 = vmatpush3.bf16.msra.mxu1 %v3096_v61 }
0x1605   :  { %3098 = vmatprep.subr.bf16.mxu1 %v3203_v0 }
0x1608   :  { %3100 = vmatpush3.bf16.msra.mxu1 %v3099_v62 }
0x1677   :  { %v2373_v38 = vpop.f32.mrb[24].mxu0 }
0x1678   :  { %v2384_v40 = vadd.f32 %v2373_v38, %v3384_v54  ;;  %v2939_v41 = vpop.f32.mrb[25].mxu0 }
0x167a   :  { %2386 = vrot.lane.b32.xlu0 %v2384_v40, %s3206_s1 }
0x16d6   :  { %v2298_v44 = vpop.f32.mrb[22].mxu1 }
0x16d7   :  { %v2299_v46 = vadd.f32 %v3202_v45, %v2298_v44  ;;  %v2928_v47 = vpop.f32.mrb[23].mxu1 }
0x16d9   :  { %v2377_v48 = vadd.f32 %v2373_v38, %v2299_v46 }
0x16db   :  { %v2540_v49 = vmul.f32 -1.442695, %v2377_v48 }
0x16dd   :  { %3196 = vpow2.f32 %v2540_v49 }
0x16e7   :  { %v3197_v50 = vpop.eup %3196 }
0x16e8   :  { %v2381_v51 = vadd.f32 1.0, %v3197_v50 }
0x16ea   :  { %3198 = vrcp.f32 %v2381_v51 }
0x16ec   :  { %v2387_v52 = vpop.permute.xlu0 %2386 }
0x16f4   :  { %v3199_v8 = vpop.eup %3198 }
0x16f5   :  { %v2389_v53 = vmul.f32 %v3199_v8, %v2387_v52  ;;  %v2396_v39 = vsub.f32 1.0, %v3199_v8  ;;  %v2402_v11 = vmul.f32 %v3199_v8, %v2128_v30 }
0x16f7   :  { %2391 = vrot.lane.b32.xlu1 %v2389_v53, %s3206_s1 }
0x1769   :  { %v2392_v54 = vpop.permute.xlu1 %2391 }
0x176a   :  { %v2394_v55 = vadd.f32 %v2392_v54, %v2299_v46 }
0x176c   :  { %3200 = vtanh.f32 %v2394_v55 }
0x1776   :  { %v3201_v4 = vpop.eup %3200 }
0x1777   :  { %2398 = vrot.lane.b32.xlu0 %v3201_v4, %s3207_s6 }
0x17e9   :  { %v2399_v43 = vpop.permute.xlu0 %2398 }
0x17ea   :  { %v2401_v63 = vmul.f32 %v2399_v43, %v2396_v39 }
0x17ec   :  { %v2403_v1 = vadd.f32 %v2402_v11, %v2401_v63 }
0x17ee   :  { %2416 = vrot.lane.b32.xlu1 %v2403_v1, %s3207_s6 }
0x1860   :  { %v2417_v2 = vpop.permute.xlu1 %2416 }
0x1861   :  { %2949 = vmatmul.mubr.msk.f32.vlgmr.msra.gmra.mrb[24].mxu1 %vm139_vm3, %v2417_v2 }
0x1934   :  { %v2486_v35 = vpop.f32.mrb[24].mxu1 }
0x1935   :  { %v2487_v0 = vadd.f32 %v2541_v3, %v2486_v35  ;;  %v2950_v6 = vpop.f32.mrb[25].mxu1 }
0x1937   :  { %2491 = vst.msk [vmem:[%s3719_s11] sm:$0x3] %vm2490_vm4, %v2487_v0 }

</bundles_post_ra>
